<compile_context>
chip_gen: v5e
topology: v5e:2x2
jax: 0.10.0
libtpu: 0.0.40
codegen_flags: <defaults>
</compile_context>

<pallas_src>
import functools

import jax
import jax.numpy as jnp
import numpy as np
from jax.experimental import pallas as pl
from jax.experimental.pallas import tpu as pltpu


def _round_up(a, b):
    return (a + b - 1) // b * b


def _vq_kernel(x_ref, e_ref, esq_ref, xvq_ref, idx_ref, sse_ref, *, m_total, tm):
    """One grid step quantizes a tile of `tm` flattened pixels.

    x_ref   : (tm, D)     VMEM  input latents (f32)
    e_ref   : (K_pad, D)  VMEM  padded codebook (constant block, zero pad rows)
    esq_ref : (1, K_pad)  VMEM  precomputed ||e_k||^2 (huge sentinel on pad cols)
    xvq_ref : (tm, D)     VMEM  quantized latents (exact codebook rows)
    idx_ref : (1, tm)     VMEM  argmin codebook indices (int32, lane-dense)
    sse_ref : (1, 128)    VMEM  per-tile SSE partial (lane-dense, broadcast scalar)
    """
    i = pl.program_id(0)

    x = x_ref[...]                                   # (tm, D) f32
    e = e_ref[...]                                   # (K_pad, D) f32
    e_sq = esq_ref[...]                              # (1, K_pad) f32

    # x @ e^T on the MXU.
    xe = jax.lax.dot_general(
        x, e, (((1,), (1,)), ((), ())),
        preferred_element_type=jnp.float32)          # (tm, K_pad)

    # ||x||^2 is constant per row -> drop it from the argmin operand.
    d = e_sq - 2.0 * xe                              # (tm, K_pad)

    # Nearest code (first index on ties); pad columns have huge e_sq -> never win.
    idx = jnp.argmin(d, axis=1).astype(jnp.int32)    # (tm,)

    # Gather codebook rows via one-hot matmul (MXU-friendly, exact in f32).
    onehot = (jax.lax.broadcasted_iota(jnp.int32, d.shape, 1)
              == idx[:, None]).astype(jnp.float32)   # (tm, K_pad)
    x_vq = jnp.dot(onehot, e, preferred_element_type=jnp.float32)  # (tm, D)

    xvq_ref[...] = x_vq
    idx_ref[...] = idx.reshape(1, tm)                # lane-dense store

    # SSE from the min distance: ||x - e_idx||^2 = ||x||^2 + min_k(||e_k||^2 - 2 x.e_k)
    x_sq = jnp.sum(x * x, axis=1, keepdims=True)     # (tm, 1)
    d_min = jnp.min(d, axis=1, keepdims=True)        # (tm, 1)
    row = i * tm + jax.lax.broadcasted_iota(jnp.int32, (tm, 1), 0)
    valid = (row < m_total).astype(jnp.float32)      # mask out padded rows
    tile_sse = jnp.sum(valid * (x_sq + d_min))
    sse_ref[...] = jnp.full(sse_ref.shape, tile_sse, dtype=jnp.float32)


@functools.partial(jax.jit, static_argnames=("beta", "tm"))
def codebook_forward(x_nchw, embedding, *, beta=0.25, tm=512):
    """Forward pass equivalent to Codebook.forward.

    x_nchw   : (B, C, H, W) float32, C == latent_dim
    embedding: (K, D) float32 codebook
    returns  : (x_vq_nchw, min_encoding_indices, loss)
    """
    B, C, H, W = x_nchw.shape
    K, D = embedding.shape
    assert C == D

    # NCHW -> NHWC -> (M, D)
    x_nhwc = jnp.transpose(x_nchw, (0, 2, 3, 1))
    x_flat = x_nhwc.reshape(-1, D)
    M = x_flat.shape[0]

    # Row tile: multiple of 128 (lane-dense idx/SSE stores); pad M up and mask
    # the padded rows' SSE contribution inside the kernel.
    tm_eff = min(_round_up(tm, 128), _round_up(M, 128))
    M_pad = _round_up(M, tm_eff)
    num_tiles = M_pad // tm_eff
    if M_pad != M:
        x_flat = jnp.pad(x_flat, ((0, M_pad - M), (0, 0)))

    # Pad the codebook to a multiple of 128 rows; sentinel norms on pad rows so
    # they never win the argmin.  Row norms are hoisted out of the kernel.
    K_pad = _round_up(K, 128)
    e_sq = jnp.sum(embedding.astype(jnp.float32) ** 2, axis=1)          # (K,)
    e_sq_pad = jnp.concatenate(
        [e_sq, jnp.full((K_pad - K,), 1e30, dtype=jnp.float32)])[None, :]  # (1, K_pad)
    e_pad = jnp.pad(embedding.astype(jnp.float32), ((0, K_pad - K), (0, 0)))

    kernel = functools.partial(_vq_kernel, m_total=M, tm=tm_eff)

    xvq_flat, idx2d, sse_partials = pl.pallas_call(
        kernel,
        out_shape=(
            jax.ShapeDtypeStruct((M_pad, D), jnp.float32),
            jax.ShapeDtypeStruct((num_tiles, tm_eff), jnp.int32),
            jax.ShapeDtypeStruct((num_tiles, 128), jnp.float32),
        ),
        grid_spec=pltpu.PrefetchScalarGridSpec(
            num_scalar_prefetch=0,
            grid=(num_tiles,),
            in_specs=[
                pl.BlockSpec((tm_eff, D), lambda i: (i, 0)),   # x row tile
                pl.BlockSpec((K_pad, D), lambda i: (0, 0)),    # full codebook (resident)
                pl.BlockSpec((1, K_pad), lambda i: (0, 0)),    # precomputed ||e||^2
            ],
            out_specs=[
                pl.BlockSpec((tm_eff, D), lambda i: (i, 0)),   # x_vq tile
                pl.BlockSpec((1, tm_eff), lambda i: (i, 0)),   # lane-dense indices
                pl.BlockSpec((1, 128), lambda i: (i, 0)),      # per-tile SSE partial
            ],
        ),
        compiler_params=pltpu.CompilerParams(
            dimension_semantics=("parallel",),
            vmem_limit_bytes=32 * 1024 * 1024,
        ),
    )(x_flat, e_pad, e_sq_pad)

    # Reduce per-tile SSE partials in the wrapper (keeps the grid fully parallel).
    sse = jnp.sum(sse_partials[:, 0])

    # loss forward value: mean((xq-x)^2) + beta*mean((xq-x)^2)
    # (detach only affects gradients, not the forward value)
    loss = (1.0 + beta) * sse / jnp.float32(M * D)

    # straight-through estimator value: x + (x_vq - x) == x_vq
    x_vq_nchw = jnp.transpose(xvq_flat[:M].reshape(B, H, W, D), (0, 3, 1, 2))
    min_encoding_indices = idx2d.reshape(-1)[:M]

    # TODO(synk): straight-through / detach gradient semantics are a training-time
    # concern only; the forward values above match the PyTorch module exactly.
    return x_vq_nchw, min_encoding_indices, loss


def _reference(x_nchw, embedding, beta):
    """Pure-JAX reference mirroring the PyTorch module."""
    B, C, H, W = x_nchw.shape
    x = jnp.transpose(x_nchw, (0, 2, 3, 1))
    xf = x.reshape(-1, C)
    d = (jnp.sum(xf ** 2, axis=1, keepdims=True)
         + jnp.sum(embedding ** 2, axis=1)
         - 2.0 * xf @ embedding.T)
    idx = jnp.argmin(d, axis=1)
    x_vq = embedding[idx].reshape(x.shape)
    loss = jnp.mean((x_vq - x) ** 2) + beta * jnp.mean((x_vq - x) ** 2)
    x_vq = x + (x_vq - x)
    return jnp.transpose(x_vq, (0, 3, 1, 2)), idx, loss


if __name__ == "__main__":
    # Small, module-consistent shapes: batch=2, latent_dim=4, spatial=16x16,
    # codebook_size=16, beta=0.25.  M = 2*16*16 = 512 rows.
    B, D, H, W = 2, 4, 16, 16
    K = 16
    beta = 0.25

    key = jax.random.PRNGKey(0)
    kx, ke = jax.random.split(key)
    x = jax.random.normal(kx, (B, D, H, W), dtype=jnp.float32)
    # nn.Embedding weight init: uniform(-1/K, 1/K), shape (codebook_size, latent_dim)
    embedding = jax.random.uniform(
        ke, (K, D), dtype=jnp.float32, minval=-1.0 / K, maxval=1.0 / K)

    x_vq, indices, loss = codebook_forward(x, embedding, beta=beta, tm=512)
    jax.block_until_ready((x_vq, indices, loss))

    # correctness check against a pure-JAX reference
    x_vq_r, idx_r, loss_r = _reference(x, embedding, beta)
    np.testing.assert_allclose(np.asarray(x_vq), np.asarray(x_vq_r),
                               rtol=1e-5, atol=1e-5)
    np.testing.assert_array_equal(np.asarray(indices), np.asarray(idx_r))
    np.testing.assert_allclose(float(loss), float(loss_r), rtol=1e-5, atol=1e-6)

    print("KERNEL_OK")
</pallas_src>

<mosaic_0001>
module attributes {stable_mosaic.version = 11 : i64} {
  func.func @_vq_kernel(%arg0: i32, %arg1: memref<512x4xf32, #tpu.memory_space<vmem>>, %arg2: memref<128x4xf32, #tpu.memory_space<vmem>>, %arg3: memref<1x128xf32, #tpu.memory_space<vmem>>, %arg4: memref<512x4xf32, #tpu.memory_space<vmem>>, %arg5: memref<1x512xi32, #tpu.memory_space<vmem>>, %arg6: memref<1x128xf32, #tpu.memory_space<vmem>>) attributes {dimension_semantics = [#tpu.dimension_semantics<parallel>], iteration_bounds = array<i64: 1>, scalar_prefetch = 0 : i64, scratch_operands = 0 : i64, tpu.core_type = #tpu.core_type<tc>, window_params = [{transform_indices = @transform_0, window_bounds = array<i64: 512, 4>}, {pipeline_mode = #tpu.pipeline_mode<synchronous>, transform_indices = @transform_1, window_bounds = array<i64: 128, 4>}, {pipeline_mode = #tpu.pipeline_mode<synchronous>, transform_indices = @transform_2, window_bounds = array<i64: 1, 128>}, {transform_indices = @transform_3, window_bounds = array<i64: 512, 4>}, {transform_indices = @transform_4, window_bounds = array<i64: 1, 512>}, {transform_indices = @transform_5, window_bounds = array<i64: 1, 128>}]} {
    %c0 = arith.constant 0 : index
    %c0_0 = arith.constant 0 : index
    %0 = vector.load %arg1[%c0, %c0_0] : memref<512x4xf32, #tpu.memory_space<vmem>>, vector<512x4xf32>
    %c0_1 = arith.constant 0 : index
    %c0_2 = arith.constant 0 : index
    %1 = vector.load %arg2[%c0_1, %c0_2] : memref<128x4xf32, #tpu.memory_space<vmem>>, vector<128x4xf32>
    %c0_3 = arith.constant 0 : index
    %c0_4 = arith.constant 0 : index
    %2 = vector.load %arg3[%c0_3, %c0_4] : memref<1x128xf32, #tpu.memory_space<vmem>>, vector<1x128xf32>
    %cst = arith.constant dense<0.000000e+00> : vector<512x128xf32>
    %3 = tpu.matmul %0, %1, %cst {dimension_numbers = #tpu.dot_dimension_numbers<[1], [1], [0], [0], [0, 0, 1, 0], [], []>} : vector<512x4xf32>, vector<128x4xf32>, vector<512x128xf32> -> vector<512x128xf32>
    %cst_5 = arith.constant 2.000000e+00 : f32
    %4 = vector.broadcast %cst_5 : f32 to vector<512x128xf32>
    %5 = arith.mulf %4, %3 : vector<512x128xf32>
    %6 = vector.broadcast %2 : vector<1x128xf32> to vector<512x128xf32>
    %7 = arith.subf %6, %5 : vector<512x128xf32>
    %8 = tpu.reduce_index %7 {axis = 1 : i32, kind = #tpu.reduction_kind<arg_min>} : vector<512x128xf32> -> vector<512xi32>
    %9 = tpu.iota {dimensions = array<i32: 1>} : vector<512x128xi32>
    %10 = vector.shape_cast %8 : vector<512xi32> to vector<512x1xi32>
    %11 = vector.broadcast %10 : vector<512x1xi32> to vector<512x128xi32>
    %12 = arith.cmpi eq, %9, %11 : vector<512x128xi32>
    %13 = arith.extui %12 : vector<512x128xi1> to vector<512x128xi32>
    %14 = arith.sitofp %13 : vector<512x128xi32> to vector<512x128xf32>
    %cst_6 = arith.constant dense<0.000000e+00> : vector<512x4xf32>
    %15 = tpu.matmul %14, %1, %cst_6 {dimension_numbers = #tpu.dot_dimension_numbers<[1], [0], [0], [1], [0, 0, 1, 1], [], []>} : vector<512x128xf32>, vector<128x4xf32>, vector<512x4xf32> -> vector<512x4xf32>
    %c0_7 = arith.constant 0 : index
    %c0_8 = arith.constant 0 : index
    %16 = vector.load %arg4[%c0_7, %c0_8] : memref<512x4xf32, #tpu.memory_space<vmem>>, vector<512x4xf32>
    tpu.vector_store %arg4[%c0_7, %c0_8], %15 {strides = array<i32>} : memref<512x4xf32, #tpu.memory_space<vmem>>, vector<512x4xf32>,
    %17 = vector.shape_cast %8 : vector<512xi32> to vector<1x512xi32>
    %c0_9 = arith.constant 0 : index
    %c0_10 = arith.constant 0 : index
    %18 = vector.load %arg5[%c0_9, %c0_10] : memref<1x512xi32, #tpu.memory_space<vmem>>, vector<1x512xi32>
    tpu.vector_store %arg5[%c0_9, %c0_10], %17 {strides = array<i32>} : memref<1x512xi32, #tpu.memory_space<vmem>>, vector<1x512xi32>,
    %19 = arith.mulf %0, %0 : vector<512x4xf32>
    %cst_11 = arith.constant dense<0.000000e+00> : vector<512xf32>
    %20 = vector.multi_reduction <add>, %19, %cst_11 [1] : vector<512x4xf32> to vector<512xf32>
    %21 = vector.shape_cast %20 : vector<512xf32> to vector<512x1xf32>
    %cst_12 = arith.constant dense<0x7F800000> : vector<512xf32>
    %22 = vector.multi_reduction <minimumf>, %7, %cst_12 [1] : vector<512x128xf32> to vector<512xf32>
    %23 = vector.shape_cast %22 : vector<512xf32> to vector<512x1xf32>
    %c512_i32 = arith.constant 512 : i32
    %24 = arith.muli %arg0, %c512_i32 : i32
    %25 = tpu.iota {dimensions = array<i32: 0>} : vector<512x1xi32>
    %26 = vector.broadcast %24 : i32 to vector<512x1xi32>
    %27 = arith.addi %26, %25 : vector<512x1xi32>
    %c512_i32_13 = arith.constant 512 : i32
    %28 = vector.broadcast %c512_i32_13 : i32 to vector<512x1xi32>
    %29 = arith.cmpi slt, %27, %28 : vector<512x1xi32>
    %30 = arith.extui %29 : vector<512x1xi1> to vector<512x1xi32>
    %31 = arith.sitofp %30 : vector<512x1xi32> to vector<512x1xf32>
    %32 = arith.addf %21, %23 : vector<512x1xf32>
    %33 = arith.mulf %31, %32 : vector<512x1xf32>
    %34 = vector.shape_cast %33 : vector<512x1xf32> to vector<1x512x1xf32>
    %cst_14 = arith.constant dense<0.000000e+00> : vector<1xf32>
    %35 = vector.multi_reduction <add>, %34, %cst_14 [1, 2] : vector<1x512x1xf32> to vector<1xf32>
    %36 = vector.shape_cast %35 : vector<1xf32> to vector<1x1x1xf32>
    %37 = vector.extract %36[0, 0, 0] : f32 from vector<1x1x1xf32>
    %38 = vector.broadcast %37 : f32 to vector<1x128xf32>
    %c0_15 = arith.constant 0 : index
    %c0_16 = arith.constant 0 : index
    %39 = vector.load %arg6[%c0_15, %c0_16] : memref<1x128xf32, #tpu.memory_space<vmem>>, vector<1x128xf32>
    tpu.vector_store %arg6[%c0_15, %c0_16], %38 {strides = array<i32>} : memref<1x128xf32, #tpu.memory_space<vmem>>, vector<1x128xf32>,
    return
  }
  func.func @transform_0(%arg0: i32) -> (i32, i32) {
    %c0_i32 = arith.constant 0 : i32
    %c0_i32_0 = arith.constant 0 : i32
    return %arg0, %c0_i32 : i32, i32
  }
  func.func @transform_1(%arg0: i32) -> (i32, i32) {
    %c0_i32 = arith.constant 0 : i32
    %c0_i32_0 = arith.constant 0 : i32
    %c0_i32_1 = arith.constant 0 : i32
    return %c0_i32, %c0_i32_0 : i32, i32
  }
  func.func @transform_2(%arg0: i32) -> (i32, i32) {
    %c0_i32 = arith.constant 0 : i32
    %c0_i32_0 = arith.constant 0 : i32
    %c0_i32_1 = arith.constant 0 : i32
    return %c0_i32, %c0_i32_0 : i32, i32
  }
  func.func @transform_3(%arg0: i32) -> (i32, i32) {
    %c0_i32 = arith.constant 0 : i32
    %c0_i32_0 = arith.constant 0 : i32
    return %arg0, %c0_i32 : i32, i32
  }
  func.func @transform_4(%arg0: i32) -> (i32, i32) {
    %c0_i32 = arith.constant 0 : i32
    %c0_i32_0 = arith.constant 0 : i32
    return %arg0, %c0_i32 : i32, i32
  }
  func.func @transform_5(%arg0: i32) -> (i32, i32) {
    %c0_i32 = arith.constant 0 : i32
    %c0_i32_0 = arith.constant 0 : i32
    return %arg0, %c0_i32 : i32, i32
  }
}

</mosaic_0001>

<bundles_post_ra>
// kernel: codebook_forward.1
= control target key start
LH: loop header
LB: loop body
LE: loop exit
PB: predicated region body
PF: predicated region fallthrough
CT: control target
= control target key end

     0   :  { %vm99_vm0 = vcmask 31744   ;;  %s6723_s0 = inlined_call_operand.vmem [shape: f32[512,4], index: 0, kind: input, shape index: {}]   ;;  %s6724_s1 = inlined_call_operand.vmem [shape: f32[128,4], index: 1, kind: input, shape index: {}]   ;;  %s6725_s2 = inlined_call_operand.vmem [shape: f32[1,128], index: 2, kind: input, shape index: {}]   ;;  %s6726_s3 = inlined_call_operand.vmem [shape: f32[512,4], index: 3, kind: output, shape index: {0}]   ;;  %s6727_s4 = inlined_call_operand.hbm [shape: s32[1,512], index: 4, kind: output, shape index: {1}]   ;;  %s6728_s5 = inlined_call_operand.vmem [shape: f32[1,128], index: 5, kind: output, shape index: {2}]  }
   0x1   :  { %v4094_v0 = vld [vmem:[%s6724_s1 + $0x78] sm:$0xff]  ;;  %v4105_v1 = vld [vmem:[%s6724_s1 + $0x70] sm:$0xff] }
   0x2   :  { %3728 = vmatpush.xpose.msk.msra.mxu0 %vm99_vm0, %v4094_v0  ;;  %3936 = vmatpush.xpose.msk.msra.mxu2 %vm99_vm0, %v4094_v0 }
   0x3   :  { %3937 = vmatpush.xpose.msk.msra.mxu3 %vm99_vm0, %v4094_v0  ;;  %3968 = vmatpush.msra.mxu1 %v4094_v0 }
   0x4   :  { %11 = vsyncpa [#allocation3], 0  ;;  %v4116_v2 = vld [vmem:[%s6724_s1 + $0x68] sm:$0xff]  ;;  %v4124_v3 = vld [vmem:[%s6724_s1 + $0x60] sm:$0xff]  ;;  %s3713_s12 = sshll.u32 %s6727_s4, 4  ;;  %s3714_s12 = int_to_ptr.hbm [resolvable:$true] %s3713_s12 }
   0x5   :  { %3970 = vmatpush.msra.mxu1 %v4105_v1  ;;  %v4134_v4 = vld [vmem:[%s6724_s1 + $0x58] sm:$0xff]  ;;  %v4142_v5 = vld [vmem:[%s6724_s1 + $0x50] sm:$0xff]  ;;  %v4152_v6 = vld [vmem:[%s6724_s1 + $0x48] sm:$0xff] }
   0x6   :  { %3729 = vmatpush.xpose.msk.msra.mxu0 %vm99_vm0, %v4105_v1  ;;  %3938 = vmatpush.xpose.msk.msra.mxu2 %vm99_vm0, %v4105_v1  ;;  %v4160_v7 = vld [vmem:[%s6724_s1 + $0x40] sm:$0xff]  ;;  %v4170_v8 = vld [vmem:[%s6724_s1 + $0x38] sm:$0xff]  ;;  %v4178_v9 = vld [vmem:[%s6724_s1 + $0x30] sm:$0xff] }
   0x7   :  { %3939 = vmatpush.xpose.msk.msra.mxu3 %vm99_vm0, %v4105_v1  ;;  %3972 = vmatpush.msra.mxu1 %v4116_v2  ;;  %v4188_v10 = vld [vmem:[%s6724_s1 + $0x28] sm:$0xff]  ;;  %v4196_v11 = vld [vmem:[%s6724_s1 + $0x20] sm:$0xff]  ;;  %v4206_v12 = vld [vmem:[%s6724_s1 + $0x18] sm:$0xff] }
   0x8   :  { %v4214_v13 = vld [vmem:[%s6724_s1 + $0x10] sm:$0xff]  ;;  %v4224_v14 = vld [vmem:[%s6724_s1 + $0x8] sm:$0xff]  ;;  %v4232_v15 = vld [vmem:[%s6724_s1] sm:$0xff] }
   0x9   :  { %3974 = vmatpush.msra.mxu1 %v4124_v3  ;;  %v18_v16 = vld [vmem:[%s6723_s0] sm:$0xff]  ;;  %v4266_v19 = vld [vmem:[%s6723_s0 + $0x10] sm:$0xff]  ;;  %v4271_v20 = vld [vmem:[%s6723_s0 + $0x8] sm:$0xff] }
   0xa   :  { %3730 = vmatpush.xpose.msk.msra.mxu0 %vm99_vm0, %v4116_v2  ;;  %3940 = vmatpush.xpose.msk.msra.mxu2 %vm99_vm0, %v4116_v2  ;;  %v2730_v17 = vmul.f32 %v18_v16, %v18_v16  ;;  %v4280_v21 = vld [vmem:[%s6723_s0 + $0x18] sm:$0xff]  ;;  %v2732_v22 = vmul.f32 %v4266_v19, %v4266_v19  ;;  %v2731_v23 = vmul.f32 %v4271_v20, %v4271_v20  ;;  %v4302_v28 = vld [vmem:[%s6723_s0 + $0x28] sm:$0xff]  ;;  %v4307_v29 = vld [vmem:[%s6723_s0 + $0x30] sm:$0xff] }
   0xb   :  { %3941 = vmatpush.xpose.msk.msra.mxu3 %vm99_vm0, %v4116_v2  ;;  %3976 = vmatpush.msra.mxu1 %v4134_v4  ;;  %v2733_v24 = vmul.f32 %v4280_v21, %v4280_v21  ;;  %v4312_v30 = vld [vmem:[%s6723_s0 + $0x20] sm:$0xff]  ;;  %v2735_v31 = vmul.f32 %v4302_v28, %v4302_v28  ;;  %v2736_v32 = vmul.f32 %v4307_v29, %v4307_v29  ;;  %v4329_v34 = vld [vmem:[%s6723_s0 + $0x48] sm:$0xff]  ;;  %v4334_v35 = vld [vmem:[%s6723_s0 + $0x38] sm:$0xff] }
   0xc   :  { %v2794_v18 = vsel %vm99_vm0, %v2730_v17, 0.0  ;;  %v2800_v25 = vsel %vm99_vm0, %v2732_v22, 0.0  ;;  %v2797_v26 = vsel %vm99_vm0, %v2731_v23, 0.0  ;;  %v2734_v33 = vmul.f32 %v4312_v30, %v4312_v30  ;;  %v4342_v39 = vld [vmem:[%s6723_s0 + $0x40] sm:$0xff]  ;;  %v4351_v40 = vld [vmem:[%s6723_s0 + $0xe8] sm:$0xff]  ;;  %v4381_v48 = vld [vmem:[%s6723_s0 + $0x50] sm:$0xff] }
   0xd   :  { %3978 = vmatpush.msra.mxu1 %v4142_v5  ;;  %2795 = vadd.xlane.f32.xlu2 %v2794_v18  ;;  %v2803_v27 = vsel %vm99_vm0, %v2733_v24, 0.0  ;;  %v2809_v36 = vsel %vm99_vm0, %v2735_v31, 0.0  ;;  %v2812_v37 = vsel %vm99_vm0, %v2736_v32, 0.0  ;;  %v2739_v41 = vmul.f32 %v4329_v34, %v4329_v34  ;;  %v78_v43 = vld [vmem:[%s6723_s0 + $0x1e0] sm:$0xff]  ;;  %v4389_v50 = vld [vmem:[%s6723_s0 + $0x58] sm:$0xff]  ;;  %v4394_v51 = vld [vmem:[%s6723_s0 + $0xf0] sm:$0xff] }
   0xe   :  { %3731 = vmatpush.xpose.msk.msra.mxu0 %vm99_vm0, %v4124_v3  ;;  %3942 = vmatpush.xpose.msk.msra.mxu2 %vm99_vm0, %v4124_v3  ;;  %v2806_v38 = vsel %vm99_vm0, %v2734_v33, 0.0  ;;  %v2737_v42 = vmul.f32 %v4334_v35, %v4334_v35  ;;  %v2738_v44 = vmul.f32 %v4342_v39, %v4342_v39  ;;  %v4376_v47 = vld [vmem:[%s6723_s0 + $0x60] sm:$0xff]  ;;  %v2740_v53 = vmul.f32 %v4381_v48, %v4381_v48  ;;  %v79_v54 = vld [vmem:[%s6723_s0 + $0x1e8] sm:$0xff]  ;;  %v4420_v58 = vld [vmem:[%s6723_s0 + $0x78] sm:$0xff] }
   0xf   :  { %3943 = vmatpush.xpose.msk.msra.mxu3 %vm99_vm0, %v4124_v3  ;;  %3980 = vmatpush.msra.mxu1 %v4152_v6  ;;  %v2821_v45 = vsel %vm99_vm0, %v2739_v41, 0.0  ;;  %v2742_v52 = vmul.f32 %v4376_v47, %v4376_v47  ;;  %v2741_v55 = vmul.f32 %v4389_v50, %v4389_v50  ;;  %v4425_v59 = vld [vmem:[%s6723_s0 + $0x68] sm:$0xff]  ;;  %v4433_v61 = vld [vmem:[%s6723_s0 + $0x70] sm:$0xff]  ;;  %v4438_v62 = vld [vmem:[%s6723_s0 + $0xf8] sm:$0xff]  ;;  %v2745_v63 = vmul.f32 %v4420_v58, %v4420_v58 }
  0x10   :  { %2801 = vadd.xlane.f32.xlu0 %v2800_v25  ;;  %2798 = vadd.xlane.f32.xlu1 %v2797_v26  ;;  %v2815_v46 = vsel %vm99_vm0, %v2737_v42, 0.0  ;;  %v2818_v49 = vsel %vm99_vm0, %v2738_v44, 0.0  ;;  %v2824_v57 = vsel %vm99_vm0, %v2740_v53, 0.0  ;;  %v4477_v17 = vld [vmem:[%s6723_s0 + $0x88] sm:$0xff]  ;;  %v4482_v18 = vld [vmem:[%s6723_s0 + $0x100] sm:$0xff] }
  0x11   :  { %3982 = vmatpush.msra.mxu1 %v4160_v7  ;;  %v2830_v56 = vsel %vm99_vm0, %v2742_v52, 0.0  ;;  %v2827_v60 = vsel %vm99_vm0, %v2741_v55, 0.0  ;;  %v2747_v22 = vmul.f32 %v4477_v17, %v4477_v17  ;;  %v4508_v24 = vld [vmem:[%s6723_s0 + $0xa8] sm:$0xff]  ;;  %v4521_v25 = vld [vmem:[%s6723_s0 + $0xa0] sm:$0xff] }
  0x12   :  { %3732 = vmatpush.xpose.msk.msra.mxu0 %vm99_vm0, %v4134_v4  ;;  %3944 = vmatpush.xpose.msk.msra.mxu2 %vm99_vm0, %v4134_v4  ;;  %v51_v26 = vld [vmem:[%s6723_s0 + $0x108] sm:$0xff]  ;;  %v2750_v31 = vmul.f32 %v4521_v25, %v4521_v25  ;;  %v4606_v55 = vld [vmem:[%s6723_s0 + $0xe0] sm:$0xff] }
  0x13   :  { %3945 = vmatpush.xpose.msk.msra.mxu3 %vm99_vm0, %v4134_v4  ;;  %3984 = vmatpush.msra.mxu1 %v4170_v8 }
  0x15   :  { %3986 = vmatpush.msra.mxu1 %v4178_v9  ;;  %2804 = vadd.xlane.f32.xlu2 %v2803_v27  ;;  %v2751_v27 = vmul.f32 %v4508_v24, %v4508_v24 }
  0x16   :  { %3733 = vmatpush.xpose.msk.msra.mxu0 %vm99_vm0, %v4142_v5  ;;  %3946 = vmatpush.xpose.msk.msra.mxu2 %vm99_vm0, %v4142_v5 }
  0x17   :  { %3947 = vmatpush.xpose.msk.msra.mxu3 %vm99_vm0, %v4142_v5  ;;  %3988 = vmatpush.msra.mxu1 %v4188_v10  ;;  %v2857_v32 = vsel %vm99_vm0, %v2751_v27, 0.0 }
  0x18   :  { %2813 = vadd.xlane.f32.xlu0 %v2812_v37  ;;  %2807 = vadd.xlane.f32.xlu1 %v2806_v38 }
  0x19   :  { %3990 = vmatpush.msra.mxu1 %v4196_v11 }
  0x1a   :  { %3734 = vmatpush.xpose.msk.msra.mxu0 %vm99_vm0, %v4152_v6  ;;  %3948 = vmatpush.xpose.msk.msra.mxu2 %vm99_vm0, %v4152_v6 }
  0x1b   :  { %3949 = vmatpush.xpose.msk.msra.mxu3 %vm99_vm0, %v4152_v6  ;;  %3992 = vmatpush.msra.mxu1 %v4206_v12 }
  0x1d   :  { %3994 = vmatpush.msra.mxu1 %v4214_v13  ;;  %2810 = vadd.xlane.f32.xlu2 %v2809_v36  ;;  %v52_v36 = vld [vmem:[%s6723_s0 + $0x110] sm:$0xff] }
  0x1e   :  { %3735 = vmatpush.xpose.msk.msra.mxu0 %vm99_vm0, %v4160_v7  ;;  %3950 = vmatpush.xpose.msk.msra.mxu2 %vm99_vm0, %v4160_v7 }
  0x1f   :  { %3951 = vmatpush.xpose.msk.msra.mxu3 %vm99_vm0, %v4160_v7  ;;  %3996 = vmatpush.msra.mxu1 %v4224_v14 }
  0x20   :  { %2822 = vadd.xlane.f32.xlu0 %v2821_v45  ;;  %2816 = vadd.xlane.f32.xlu1 %v2815_v46  ;;  %v53_v45 = vld [vmem:[%s6723_s0 + $0x118] sm:$0xff] }
  0x21   :  { %3998 = vmatpush.msra.mxu1 %v4232_v15 }
  0x22   :  { %3736 = vmatpush.xpose.msk.msra.mxu0 %vm99_vm0, %v4170_v8  ;;  %3952 = vmatpush.xpose.msk.msra.mxu2 %vm99_vm0, %v4170_v8 }
  0x23   :  { %3953 = vmatpush.xpose.msk.msra.mxu3 %vm99_vm0, %v4170_v8 }
  0x25   :  { %2819 = vadd.xlane.f32.xlu2 %v2818_v49 }
  0x26   :  { %3737 = vmatpush.xpose.msk.msra.mxu0 %vm99_vm0, %v4178_v9  ;;  %3954 = vmatpush.xpose.msk.msra.mxu2 %vm99_vm0, %v4178_v9 }
  0x27   :  { %3955 = vmatpush.xpose.msk.msra.mxu3 %vm99_vm0, %v4178_v9 }
  0x28   :  { %2831 = vadd.xlane.f32.xlu0 %v2830_v56  ;;  %2825 = vadd.xlane.f32.xlu1 %v2824_v57  ;;  %v54_v57 = vld [vmem:[%s6723_s0 + $0x120] sm:$0xff] }
  0x2a   :  { %3738 = vmatpush.xpose.msk.msra.mxu0 %vm99_vm0, %v4188_v10  ;;  %3956 = vmatpush.xpose.msk.msra.mxu2 %vm99_vm0, %v4188_v10 }
  0x2b   :  { %3957 = vmatpush.xpose.msk.msra.mxu3 %vm99_vm0, %v4188_v10 }
  0x2d   :  { %2828 = vadd.xlane.f32.xlu2 %v2827_v60  ;;  %v2758_v60 = vmul.f32 %v4606_v55, %v4606_v55 }
  0x2e   :  { %3739 = vmatpush.xpose.msk.msra.mxu0 %vm99_vm0, %v4196_v11  ;;  %3958 = vmatpush.xpose.msk.msra.mxu2 %vm99_vm0, %v4196_v11 }
  0x2f   :  { %3959 = vmatpush.xpose.msk.msra.mxu3 %vm99_vm0, %v4196_v11 }
  0x32   :  { %3740 = vmatpush.xpose.msk.msra.mxu0 %vm99_vm0, %v4206_v12  ;;  %3960 = vmatpush.xpose.msk.msra.mxu2 %vm99_vm0, %v4206_v12 }
  0x33   :  { %3961 = vmatpush.xpose.msk.msra.mxu3 %vm99_vm0, %v4206_v12 }
  0x36   :  { %3741 = vmatpush.xpose.msk.msra.mxu0 %vm99_vm0, %v4214_v13  ;;  %3962 = vmatpush.xpose.msk.msra.mxu2 %vm99_vm0, %v4214_v13 }
  0x37   :  { %3963 = vmatpush.xpose.msk.msra.mxu3 %vm99_vm0, %v4214_v13 }
  0x3a   :  { %3742 = vmatpush.xpose.msk.msra.mxu0 %vm99_vm0, %v4224_v14  ;;  %3964 = vmatpush.xpose.msk.msra.mxu2 %vm99_vm0, %v4224_v14 }
  0x3b   :  { %3965 = vmatpush.xpose.msk.msra.mxu3 %vm99_vm0, %v4224_v14 }
  0x3e   :  { %3743 = vmatpush.xpose.msk.msra.mxu0 %vm99_vm0, %v4232_v15  ;;  %3966 = vmatpush.xpose.msk.msra.mxu2 %vm99_vm0, %v4232_v15 }
  0x3f   :  { %3967 = vmatpush.xpose.msk.msra.mxu3 %vm99_vm0, %v4232_v15 }
  0x41   :  { %3744 = vmatmul.msk.f32.vlgmr.msra.gmra.mxu0 %vm99_vm0, %v18_v16  ;;  %3773 = vmatmul.msk.f32.vlgmr.msra.gmra.mxu2 %vm99_vm0, %v4351_v40 }
  0x42   :  { %1002 = vmatpush.msrb.mxu0 %v4094_v0  ;;  %3804 = vmatmul.msk.f32.vlgmr.msra.gmra.mxu3 %vm99_vm0, %v78_v43  ;;  %v4576_v43 = vld [vmem:[%s6723_s0 + $0xd8] sm:$0xff] }
  0x43   :  { %3969 = vmatpush.msrb.mxu3 %v4094_v0  ;;  %v2743_v0 = vmul.f32 %v4425_v59, %v4425_v59  ;;  %v2757_v46 = vmul.f32 %v4576_v43, %v4576_v43 }
  0x44   :  { %1003 = vmatpush.msrb.mxu0 %v4105_v1 }
  0x45   :  { %3971 = vmatpush.msrb.mxu3 %v4105_v1  ;;  %v80_v1 = vld [vmem:[%s6723_s0 + $0x1f0] sm:$0xff]  ;;  %v2875_v53 = vsel %vm99_vm0, %v2757_v46, 0.0 }
  0x46   :  { %1004 = vmatpush.msrb.mxu0 %v4116_v2 }
  0x47   :  { %3973 = vmatpush.msrb.mxu3 %v4116_v2  ;;  %v2744_v2 = vmul.f32 %v4433_v61, %v4433_v61 }
  0x48   :  { %1005 = vmatpush.msrb.mxu0 %v4124_v3 }
  0x49   :  { %3975 = vmatpush.msrb.mxu3 %v4124_v3  ;;  %3745 = vmatmul.msk.f32.gmra.mxu0 %vm99_vm0, %v4271_v20  ;;  %v2839_v3 = vsel %vm99_vm0, %v2745_v63, 0.0  ;;  %v2836_v16 = vsel %vm99_vm0, %v2744_v2, 0.0  ;;  %v81_v20 = vld [vmem:[%s6723_s0 + $0x1f8] sm:$0xff]  ;;  %v2759_v63 = vmul.f32 %v4351_v40, %v4351_v40  ;;  %v2761_v40 = vmul.f32 %v4438_v62, %v4438_v62 }
  0x4a   :  { %1006 = vmatpush.msrb.mxu0 %v4134_v4  ;;  %3774 = vmatmul.msk.f32.gmra.mxu2 %vm99_vm0, %v4394_v51 }
  0x4b   :  { %3805 = vmatmul.msk.f32.gmra.mxu3 %vm99_vm0, %v79_v54  ;;  %2840 = vadd.xlane.f32.xlu0 %v2839_v3  ;;  %v2881_v2 = vsel %vm99_vm0, %v2759_v63, 0.0  ;;  %v2763_v3 = vmul.f32 %v51_v26, %v51_v26 }
  0x4c   :  { %1007 = vmatpush.msrb.mxu0 %v4142_v5  ;;  %3977 = vmatpush.msrb.mxu3 %v4134_v4  ;;  %v2833_v4 = vsel %vm99_vm0, %v2743_v0, 0.0 }
  0x4d   :  { %2834 = vadd.xlane.f32.xlu1 %v2833_v4  ;;  %2837 = vadd.xlane.f32.xlu2 %v2836_v16  ;;  %v2893_v4 = vsel %vm99_vm0, %v2763_v3, 0.0  ;;  %v2887_v16 = vsel %vm99_vm0, %v2761_v40, 0.0  ;;  %v64_v40 = vld [vmem:[%s6723_s0 + $0x170] sm:$0xff] }
  0x4e   :  { %1008 = vmatpush.msrb.mxu0 %v4152_v6  ;;  %3979 = vmatpush.msrb.mxu3 %v4142_v5  ;;  %v4464_v5 = vld [vmem:[%s6723_s0 + $0x90] sm:$0xff] }
  0x50   :  { %1009 = vmatpush.msrb.mxu0 %v4160_v7  ;;  %3981 = vmatpush.msrb.mxu3 %v4152_v6  ;;  %v4469_v6 = vld [vmem:[%s6723_s0 + $0x80] sm:$0xff] }
  0x51   :  { %3746 = vmatmul.msk.f32.gmra.mxu0 %vm99_vm0, %v4266_v19  ;;  %v2748_v19 = vmul.f32 %v4464_v5, %v4464_v5 }
  0x52   :  { %1010 = vmatpush.msrb.mxu0 %v4170_v8  ;;  %3775 = vmatmul.msk.f32.gmra.mxu2 %vm99_vm0, %v4438_v62  ;;  %v56_v62 = vld [vmem:[%s6723_s0 + $0x130] sm:$0xff] }
  0x53   :  { %3806 = vmatmul.msk.f32.gmra.mxu3 %vm99_vm0, %v80_v1  ;;  %v2878_v1 = vsel %vm99_vm0, %v2758_v60, 0.0  ;;  %v2768_v27 = vmul.f32 %v56_v62, %v56_v62 }
  0x54   :  { %1011 = vmatpush.msrb.mxu0 %v4178_v9  ;;  %3983 = vmatpush.msrb.mxu3 %v4160_v7  ;;  %v2746_v7 = vmul.f32 %v4469_v6, %v4469_v6 }
  0x56   :  { %1012 = vmatpush.msrb.mxu0 %v4188_v10  ;;  %3985 = vmatpush.msrb.mxu3 %v4170_v8  ;;  %v2848_v8 = vsel %vm99_vm0, %v2748_v19, 0.0  ;;  %v2842_v23 = vsel %vm99_vm0, %v2746_v7, 0.0  ;;  %v2766_v7 = vmul.f32 %v54_v57, %v54_v57 }
  0x57   :  { %2849 = vadd.xlane.f32.xlu0 %v2848_v8  ;;  %2843 = vadd.xlane.f32.xlu1 %v2842_v23  ;;  %v57_v8 = vld [vmem:[%s6723_s0 + $0x138] sm:$0xff] }
  0x58   :  { %1013 = vmatpush.msrb.mxu0 %v4196_v11  ;;  %3987 = vmatpush.msrb.mxu3 %v4178_v9  ;;  %v4513_v9 = vld [vmem:[%s6723_s0 + $0x98] sm:$0xff] }
  0x59   :  { %3747 = vmatmul.msk.f32.gmra.mxu0 %vm99_vm0, %v4280_v21  ;;  %v2845_v21 = vsel %vm99_vm0, %v2747_v22, 0.0 }
  0x5a   :  { %1014 = vmatpush.msrb.mxu0 %v4206_v12  ;;  %3776 = vmatmul.msk.f32.gmra.mxu2 %vm99_vm0, %v4482_v18 }
  0x5b   :  { %3807 = vmatmul.msk.f32.gmra.mxu3 %vm99_vm0, %v81_v20  ;;  %2846 = vadd.xlane.f32.xlu2 %v2845_v21  ;;  %v2764_v20 = vmul.f32 %v52_v36, %v52_v36  ;;  %v2769_v21 = vmul.f32 %v57_v8, %v57_v8 }
  0x5c   :  { %1015 = vmatpush.msrb.mxu0 %v4214_v13  ;;  %3989 = vmatpush.msrb.mxu3 %v4188_v10  ;;  %v2749_v10 = vmul.f32 %v4513_v9, %v4513_v9 }
  0x5d   :  { %v2896_v22 = vsel %vm99_vm0, %v2764_v20, 0.0 }
  0x5e   :  { %1016 = vmatpush.msrb.mxu0 %v4224_v14  ;;  %3991 = vmatpush.msrb.mxu3 %v4196_v11  ;;  %v2851_v33 = vsel %vm99_vm0, %v2749_v10, 0.0  ;;  %v4544_v11 = vld [vmem:[%s6723_s0 + $0xc0] sm:$0xff] }
  0x5f   :  { %2858 = vadd.xlane.f32.xlu0 %v2857_v32  ;;  %2852 = vadd.xlane.f32.xlu1 %v2851_v33  ;;  %v2754_v37 = vmul.f32 %v4544_v11, %v4544_v11  ;;  %v58_v32 = vld [vmem:[%s6723_s0 + $0x140] sm:$0xff]  ;;  %v59_v33 = vld [vmem:[%s6723_s0 + $0x148] sm:$0xff] }
  0x60   :  { %1017 = vmatpush.msrb.mxu0 %v4232_v15  ;;  %3993 = vmatpush.msrb.mxu3 %v4206_v12  ;;  %v4549_v12 = vld [vmem:[%s6723_s0 + $0xb0] sm:$0xff] }
  0x61   :  { %3748 = vmatmul.msk.f32.gmra.mxu0 %vm99_vm0, %v4312_v30  ;;  %v2854_v30 = vsel %vm99_vm0, %v2750_v31, 0.0  ;;  %v2752_v38 = vmul.f32 %v4549_v12, %v4549_v12  ;;  %v2866_v41 = vsel %vm99_vm0, %v2754_v37, 0.0  ;;  %v2908_v31 = vsel %vm99_vm0, %v2768_v27, 0.0 }
  0x62   :  { %3777 = vmatmul.msk.f32.gmra.mxu2 %vm99_vm0, %v51_v26  ;;  %3995 = vmatpush.msrb.mxu3 %v4214_v13  ;;  %v4556_v13 = vld [vmem:[%s6723_s0 + $0xb8] sm:$0xff] }
  0x63   :  { %2855 = vadd.xlane.f32.xlu2 %v2854_v30  ;;  %v2860_v42 = vsel %vm99_vm0, %v2752_v38, 0.0  ;;  %v60_v38 = vld [vmem:[%s6723_s0 + $0x150] sm:$0xff] }
  0x64   :  { %3997 = vmatpush.msrb.mxu3 %v4224_v14  ;;  %v2753_v14 = vmul.f32 %v4556_v13, %v4556_v13 }
  0x66   :  { %3999 = vmatpush.msrb.mxu3 %v4232_v15  ;;  %v4581_v15 = vld [vmem:[%s6723_s0 + $0xc8] sm:$0xff]  ;;  %v2863_v44 = vsel %vm99_vm0, %v2753_v14, 0.0 }
  0x67   :  { %2867 = vadd.xlane.f32.xlu0 %v2866_v41  ;;  %2861 = vadd.xlane.f32.xlu1 %v2860_v42  ;;  %v2755_v49 = vmul.f32 %v4581_v15, %v4581_v15  ;;  %v61_v42 = vld [vmem:[%s6723_s0 + $0x158] sm:$0xff] }
  0x69   :  { %3749 = vmatmul.msk.f32.gmra.mxu0 %vm99_vm0, %v4302_v28  ;;  %v4587_v28 = vld [vmem:[%s6723_s0 + $0xd0] sm:$0xff]  ;;  %v2869_v54 = vsel %vm99_vm0, %v2755_v49, 0.0 }
  0x6a   :  { %3778 = vmatmul.msk.f32.gmra.mxu2 %vm99_vm0, %v52_v36  ;;  %v2756_v52 = vmul.f32 %v4587_v28, %v4587_v28  ;;  %v2771_v36 = vmul.f32 %v59_v33, %v59_v33 }
  0x6b   :  { %2864 = vadd.xlane.f32.xlu2 %v2863_v44 }
  0x6c   :  { %v2872_v56 = vsel %vm99_vm0, %v2756_v52, 0.0 }
  0x6f   :  { %2876 = vadd.xlane.f32.xlu0 %v2875_v53  ;;  %2870 = vadd.xlane.f32.xlu1 %v2869_v54 }
  0x71   :  { %3750 = vmatmul.msk.f32.gmra.mxu0 %vm99_vm0, %v4307_v29  ;;  %v2760_v29 = vmul.f32 %v4394_v51, %v4394_v51  ;;  %v55_v51 = vld [vmem:[%s6723_s0 + $0x128] sm:$0xff] }
  0x72   :  { %3779 = vmatmul.msk.f32.gmra.mxu2 %vm99_vm0, %v53_v45  ;;  %v2767_v26 = vmul.f32 %v55_v51, %v55_v51 }
  0x73   :  { %2873 = vadd.xlane.f32.xlu2 %v2872_v56  ;;  %v2884_v0 = vsel %vm99_vm0, %v2760_v29, 0.0  ;;  %v63_v56 = vld [vmem:[%s6723_s0 + $0x168] sm:$0xff] }
  0x74   :  { %v2905_v10 = vsel %vm99_vm0, %v2767_v26, 0.0 }
  0x77   :  { %2885 = vadd.xlane.f32.xlu0 %v2884_v0  ;;  %2879 = vadd.xlane.f32.xlu1 %v2878_v1 }
  0x79   :  { %3751 = vmatmul.msk.f32.gmra.mxu0 %vm99_vm0, %v4334_v35  ;;  %v2762_v35 = vmul.f32 %v4482_v18, %v4482_v18  ;;  %v2765_v18 = vmul.f32 %v53_v45, %v53_v45  ;;  %v4701_v45 = vld [vmem:[%s6725_s2] ss:$0 sm:$0xff] }
  0x7a   :  { %3780 = vmatmul.msk.f32.gmra.mxu2 %vm99_vm0, %v54_v57 }
  0x7b   :  { %2882 = vadd.xlane.f32.xlu2 %v2881_v2  ;;  %v2890_v19 = vsel %vm99_vm0, %v2762_v35, 0.0  ;;  %v2899_v23 = vsel %vm99_vm0, %v2765_v18, 0.0 }
  0x7f   :  { %2894 = vadd.xlane.f32.xlu0 %v2893_v4  ;;  %2888 = vadd.xlane.f32.xlu1 %v2887_v16 }
  0x80   :  { %v4668_v37 = vpop.xlane.xlu2 %2795 }
  0x81   :  { %3752 = vmatmul.msk.f32.gmra.mxu0 %vm99_vm0, %v4342_v39  ;;  %v2902_v39 = vsel %vm99_vm0, %v2766_v7, 0.0 }
  0x82   :  { %3781 = vmatmul.msk.f32.gmra.mxu2 %vm99_vm0, %v55_v51 }
  0x83   :  { %2891 = vadd.xlane.f32.xlu2 %v2890_v19  ;;  %v4683_v41 = vpop.xlane.xlu0 %2801 }
  0x87   :  { %2903 = vadd.xlane.f32.xlu0 %v2902_v39  ;;  %2897 = vadd.xlane.f32.xlu1 %v2896_v22  ;;  %v65_v22 = vld [vmem:[%s6723_s0 + $0x178] sm:$0xff] }
  0x88   :  { %v4677_v14 = vpop.xlane.xlu2 %2804 }
  0x89   :  { %3753 = vmatmul.msk.f32.gmra.mxu0 %vm99_vm0, %v4329_v34  ;;  %v2911_v34 = vsel %vm99_vm0, %v2769_v21, 0.0 }
  0x8a   :  { %3782 = vmatmul.msk.f32.gmra.mxu2 %vm99_vm0, %v56_v62 }
  0x8b   :  { %2900 = vadd.xlane.f32.xlu2 %v2899_v23  ;;  %v4703_v49 = vpop.xlane.xlu0 %2813 }
  0x8f   :  { %2912 = vadd.xlane.f32.xlu0 %v2911_v34  ;;  %2906 = vadd.xlane.f32.xlu1 %v2905_v10 }
  0x91   :  { %3754 = vmatmul.msk.f32.gmra.mxu0 %vm99_vm0, %v4381_v48  ;;  %v2770_v48 = vmul.f32 %v58_v32, %v58_v32 }
  0x92   :  { %3783 = vmatmul.msk.f32.gmra.mxu2 %vm99_vm0, %v57_v8 }
  0x93   :  { %2909 = vadd.xlane.f32.xlu2 %v2908_v31  ;;  %v2914_v30 = vsel %vm99_vm0, %v2770_v48, 0.0  ;;  %v4718_v2 = vpop.xlane.xlu0 %2822 }
  0x99   :  { %3755 = vmatmul.msk.f32.gmra.mxu0 %vm99_vm0, %v4389_v50  ;;  %v2917_v50 = vsel %vm99_vm0, %v2771_v36, 0.0 }
  0x9a   :  { %3784 = vmatmul.msk.f32.gmra.mxu2 %vm99_vm0, %v58_v32  ;;  %2918 = vadd.xlane.f32.xlu1 %v2917_v50  ;;  %v66_v32 = vld [vmem:[%s6723_s0 + $0x180] sm:$0xff] }
  0x9b   :  { %2915 = vadd.xlane.f32.xlu2 %v2914_v30  ;;  %v4739_v18 = vpop.xlane.xlu0 %2831 }
  0xa1   :  { %3756 = vmatmul.msk.f32.gmra.mxu0 %vm99_vm0, %v4376_v47  ;;  %v4681_v47 = vpop.xlane.xlu1 %2798 }
  0xa2   :  { %3785 = vmatmul.msk.f32.gmra.mxu2 %vm99_vm0, %v59_v33 }
  0xa9   :  { %3757 = vmatmul.msk.f32.gmra.mxu0 %vm99_vm0, %v4425_v59  ;;  %v4691_v59 = vpop.xlane.xlu2 %2810  ;;  %v4693_v44 = vpop.xlane.xlu1 %2807 }
  0xaa   :  { %3786 = vmatmul.msk.f32.gmra.mxu2 %vm99_vm0, %v60_v38 }
  0xb1   :  { %3758 = vmatmul.msk.f32.gmra.mxu0 %vm99_vm0, %v4433_v61  ;;  %v62_v61 = vld [vmem:[%s6723_s0 + $0x160] sm:$0xff]  ;;  %v4709_v54 = vpop.xlane.xlu2 %2819  ;;  %v4714_v60 = vpop.xlane.xlu1 %2816 }
  0xb2   :  { %3787 = vmatmul.msk.f32.gmra.mxu2 %vm99_vm0, %v61_v42 }
  0xb9   :  { %3759 = vmatmul.msk.f32.gmra.mxu0 %vm99_vm0, %v4420_v58  ;;  %v4726_v19 = vpop.xlane.xlu2 %2828  ;;  %v4731_v7 = vpop.xlane.xlu1 %2825 }
  0xba   :  { %3788 = vmatmul.msk.f32.gmra.mxu2 %vm99_vm0, %v62_v61  ;;  %v67_v61 = vld [vmem:[%s6723_s0 + $0x188] sm:$0xff] }
  0xbe   :  { %v357_v46 = vpop.f32.mrf.mxu0  ;;  %v4754_v31 = vpop.xlane.xlu0 %2840 }
  0xbf   :  { %v549_v52 = vmul.f32 2.0, %v357_v46 }
  0xc1   :  { %v616_v58 = vsub.f32 %v4701_v45, %v549_v52  ;;  %3760 = vmatmul.msk.f32.gmra.mxu0 %vm99_vm0, %v4469_v6  ;;  %v4748_v26 = vpop.xlane.xlu2 %2837  ;;  %v4752_v27 = vpop.xlane.xlu1 %2834 }
  0xc2   :  { %3789 = vmatmul.msk.f32.gmra.mxu2 %vm99_vm0, %v63_v56  ;;  %v68_v56 = vld [vmem:[%s6723_s0 + $0x190] sm:$0xff] }
  0xc3   :  { %680 = vmin.index.xlane.f32.xlu0 %v616_v58 }
  0xc4   :  { %v444_v53 = vpop.f32.mrf.mxu2 }
  0xc5   :  { %v578_v57 = vmul.f32 2.0, %v444_v53  ;;  %v537_v29 = vpop.f32.mrf.mxu3 }
  0xc6   :  { %v360_v63 = vpop.f32.mrf.mxu0  ;;  %v609_v51 = vmul.f32 2.0, %v537_v29 }
  0xc7   :  { %v550_v0 = vmul.f32 2.0, %v360_v63  ;;  %v645_v1 = vsub.f32 %v4701_v45, %v578_v57 }
  0xc8   :  { %v4729_v62 = vsub.f32 %v4701_v45, %v609_v51 }
  0xc9   :  { %738 = vmin.index.xlane.f32.xlu2 %v645_v1  ;;  %v617_v6 = vsub.f32 %v4701_v45, %v550_v0  ;;  %3761 = vmatmul.msk.f32.gmra.mxu0 %vm99_vm0, %v4477_v17 }
  0xca   :  { %6786 = vst [vmem:[#allocation5_spill] sm:$0xff] %v4729_v62  ;;  %3790 = vmatmul.msk.f32.gmra.mxu2 %vm99_vm0, %v64_v40  ;;  %v4770_v42 = vpop.xlane.xlu1 %2843 }
  0xcb   :  { %2986 = vmin.xlane.f32.xlu0 %v616_v58  ;;  %2988 = vmin.xlane.f32.xlu1 %v617_v6  ;;  %v4776_v58 = vpop.xlane.xlu0 %2849 }
  0xcd   :  { %v447_v3 = vpop.f32.mrf.mxu2 }
  0xce   :  { %v540_v35 = vpop.f32.mrf.mxu3  ;;  %v363_v16 = vpop.f32.mrf.mxu0  ;;  %v579_v34 = vmul.f32 2.0, %v447_v3  ;;  %v69_v3 = vld [vmem:[%s6723_s0 + $0x198] sm:$0xff] }
  0xcf   :  { %v610_v4 = vmul.f32 2.0, %v540_v35  ;;  %v551_v20 = vmul.f32 2.0, %v363_v16  ;;  %v4768_v38 = vpop.xlane.xlu2 %2846 }
  0xd0   :  { %v646_v36 = vsub.f32 %v4701_v45, %v579_v34 }
  0xd1   :  { %v4735_v17 = vsub.f32 %v4701_v45, %v610_v4  ;;  %3044 = vmin.xlane.f32.xlu2 %v645_v1  ;;  %3762 = vmatmul.msk.f32.gmra.mxu0 %vm99_vm0, %v4464_v5  ;;  %v618_v8 = vsub.f32 %v4701_v45, %v551_v20 }
  0xd2   :  { %3791 = vmatmul.msk.f32.gmra.mxu2 %vm99_vm0, %v65_v22  ;;  %v4786_v57 = vpop.xlane.xlu1 %2852 }
  0xd3   :  { %6787 = vst [vmem:[#allocation6_spill] sm:$0xff] %v4735_v17  ;;  %800 = vmin.index.xlane.f32.xlu0 %v4729_v62  ;;  %802 = vmin.index.xlane.f32.xlu1 %v4735_v17 }
  0xd5   :  { %v450_v39 = vpop.f32.mrf.mxu2 }
  0xd6   :  { %v543_v23 = vpop.f32.mrf.mxu3  ;;  %v366_v21 = vpop.f32.mrf.mxu0  ;;  %v580_v10 = vmul.f32 2.0, %v450_v39 }
  0xd7   :  { %v611_v5 = vmul.f32 2.0, %v543_v23  ;;  %v4781_v53 = vpop.xlane.xlu2 %2855 }
  0xd9   :  { %2990 = vmin.xlane.f32.xlu2 %v618_v8  ;;  %3763 = vmatmul.msk.f32.gmra.mxu0 %vm99_vm0, %v4513_v9  ;;  %v4760_v48 = vsub.f32 %v4701_v45, %v611_v5  ;;  %v647_v9 = vsub.f32 %v4701_v45, %v580_v10 }
  0xda   :  { %3792 = vmatmul.msk.f32.gmra.mxu2 %vm99_vm0, %v66_v32  ;;  %v4804_v39 = vpop.xlane.xlu1 %2861 }
  0xdb   :  { %682 = vmin.index.xlane.f32.xlu0 %v617_v6  ;;  %684 = vmin.index.xlane.f32.xlu1 %v618_v8  ;;  %6788 = vst [vmem:[#allocation7_spill] sm:$0xff] %v4760_v48  ;;  %v4790_v6 = vpop.xlane.xlu0 %2858 }
  0xdc   :  { %6789 = vst [vmem:[#allocation8_spill] sm:$0xff] %v4790_v6 }
  0xdd   :  { %v453_v33 = vpop.f32.mrf.mxu2  ;;  %6792 = vst [vmem:[#allocation11_spill] sm:$0xff] %v4804_v39 }
  0xde   :  { %v369_v30 = vpop.f32.mrf.mxu0  ;;  %v581_v50 = vmul.f32 2.0, %v453_v33  ;;  %v546_v1 = vpop.f32.mrf.mxu3 }
  0xdf   :  { %v612_v51 = vmul.f32 2.0, %v546_v1  ;;  %v4798_v35 = vpop.xlane.xlu2 %2864 }
  0xe0   :  { %v648_v46 = vsub.f32 %v4701_v45, %v581_v50  ;;  %6790 = vst [vmem:[#allocation9_spill] sm:$0xff] %v4798_v35 }
  0xe1   :  { %804 = vmin.index.xlane.f32.xlu2 %v4760_v48  ;;  %3764 = vmatmul.msk.f32.gmra.mxu0 %vm99_vm0, %v4521_v25  ;;  %v552_v25 = vmul.f32 2.0, %v366_v21  ;;  %v4801_v16 = vsub.f32 %v4701_v45, %v612_v51  ;;  %v70_v21 = vld [vmem:[%s6723_s0 + $0x1a0] sm:$0xff] }
  0xe2   :  { %3793 = vmatmul.msk.f32.gmra.mxu2 %vm99_vm0, %v67_v61  ;;  %v4822_v33 = vpop.xlane.xlu1 %2870 }
  0xe3   :  { %740 = vmin.index.xlane.f32.xlu0 %v646_v36  ;;  %742 = vmin.index.xlane.f32.xlu1 %v647_v9  ;;  %v619_v0 = vsub.f32 %v4701_v45, %v552_v25  ;;  %6791 = vst [vmem:[#allocation10_spill] sm:$0xff] %v4801_v16  ;;  %v4808_v22 = vpop.xlane.xlu0 %2867 }
  0xe4   :  { %6793 = vst [vmem:[#allocation12_spill] sm:$0xff] %v4808_v22 }
  0xe5   :  { %v456_v29 = vpop.f32.mrf.mxu2  ;;  %6795 = vst [vmem:[#allocation14_spill] sm:$0xff] %v4822_v33 }
  0xe6   :  { %v372_v52 = vpop.f32.mrf.mxu0  ;;  %v582_v8 = vmul.f32 2.0, %v456_v29  ;;  %v72_v29 = vld [vmem:[%s6723_s0 + $0x1b0] sm:$0xff] }
  0xe8   :  { %v649_v10 = vsub.f32 %v4701_v45, %v582_v8 }
  0xe9   :  { %744 = vmin.index.xlane.f32.xlu2 %v648_v46  ;;  %3765 = vmatmul.msk.f32.gmra.mxu0 %vm99_vm0, %v4508_v24  ;;  %v553_v24 = vmul.f32 2.0, %v369_v30 }
  0xea   :  { %3794 = vmatmul.msk.f32.gmra.mxu2 %vm99_vm0, %v68_v56  ;;  %v4834_v56 = vpop.xlane.xlu1 %2879 }
  0xeb   :  { %3046 = vmin.xlane.f32.xlu0 %v646_v36  ;;  %3048 = vmin.xlane.f32.xlu1 %v647_v9  ;;  %v620_v40 = vsub.f32 %v4701_v45, %v553_v24  ;;  %v4824_v36 = vpop.xlane.xlu0 %2876  ;;  %v71_v9 = vld [vmem:[%s6723_s0 + $0x1a8] sm:$0xff]  ;;  %6798 = vst [vmem:[#allocation17_spill] sm:$0xff] %v4834_v56 }
  0xec   :  { %6796 = vst [vmem:[#allocation15_spill] sm:$0xff] %v4824_v36 }
  0xed   :  { %v459_v20 = vpop.f32.mrf.mxu2 }
  0xee   :  { %v375_v63 = vpop.f32.mrf.mxu0  ;;  %v583_v23 = vmul.f32 2.0, %v459_v20 }
  0xf0   :  { %v650_v32 = vsub.f32 %v4701_v45, %v583_v23 }
  0xf1   :  { %3050 = vmin.xlane.f32.xlu2 %v648_v46  ;;  %3766 = vmatmul.msk.f32.gmra.mxu0 %vm99_vm0, %v4549_v12  ;;  %v554_v12 = vmul.f32 2.0, %v372_v52  ;;  %v555_v46 = vmul.f32 2.0, %v375_v63 }
  0xf2   :  { %3795 = vmatmul.msk.f32.gmra.mxu2 %vm99_vm0, %v69_v3 }
  0xf3   :  { %2992 = vmin.xlane.f32.xlu0 %v619_v0  ;;  %686 = vmin.index.xlane.f32.xlu1 %v619_v0  ;;  %v621_v5 = vsub.f32 %v4701_v45, %v554_v12  ;;  %v4840_v1 = vpop.xlane.xlu0 %2885 }
  0xf4   :  { %6799 = vst [vmem:[#allocation18_spill] sm:$0xff] %v4840_v1 }
  0xf5   :  { %v462_v30 = vpop.f32.mrf.mxu2 }
  0xf6   :  { %v378_v4 = vpop.f32.mrf.mxu0  ;;  %v584_v61 = vmul.f32 2.0, %v462_v30 }
  0xf7   :  { %v556_v52 = vmul.f32 2.0, %v378_v4 }
  0xf8   :  { %v651_v0 = vsub.f32 %v4701_v45, %v584_v61 }
  0xf9   :  { %688 = vmin.index.xlane.f32.xlu2 %v620_v40  ;;  %3767 = vmatmul.msk.f32.gmra.mxu0 %vm99_vm0, %v4556_v13  ;;  %v4818_v13 = vpop.xlane.xlu2 %2873  ;;  %v623_v51 = vsub.f32 %v4701_v45, %v556_v52  ;;  %v74_v52 = vld [vmem:[%s6723_s0 + $0x1c0] sm:$0xff] }
  0xfa   :  { %3796 = vmatmul.msk.f32.gmra.mxu2 %vm99_vm0, %v70_v21  ;;  %6794 = vst [vmem:[#allocation13_spill] sm:$0xff] %v4818_v13 }
  0xfb   :  { %806 = vmin.index.xlane.f32.xlu0 %v4801_v16  ;;  %2994 = vmin.xlane.f32.xlu1 %v620_v40  ;;  %v4849_v40 = vpop.xlane.xlu1 %2888  ;;  %v4851_v20 = vpop.xlane.xlu0 %2894 }
  0xfc   :  { %6801 = vst [vmem:[#allocation20_spill] sm:$0xff] %v4849_v40 }
  0xfd   :  { %v465_v25 = vpop.f32.mrf.mxu2  ;;  %6802 = vst [vmem:[#allocation21_spill] sm:$0xff] %v4851_v20 }
  0xfe   :  { %v381_v34 = vpop.f32.mrf.mxu0  ;;  %v585_v8 = vmul.f32 2.0, %v465_v25 }
  0xff   :  { %v557_v12 = vmul.f32 2.0, %v381_v34  ;;  %v73_v34 = vld [vmem:[%s6723_s0 + $0x1b8] sm:$0xff] }
 0x101   :  { %690 = vmin.index.xlane.f32.xlu2 %v621_v5  ;;  %3768 = vmatmul.msk.f32.gmra.mxu0 %vm99_vm0, %v4544_v11  ;;  %v4832_v11 = vpop.xlane.xlu2 %2882 }
 0x102   :  { %3797 = vmatmul.msk.f32.gmra.mxu2 %vm99_vm0, %v71_v9  ;;  %6797 = vst [vmem:[#allocation16_spill] sm:$0xff] %v4832_v11 }
 0x103   :  { %746 = vmin.index.xlane.f32.xlu0 %v649_v10  ;;  %748 = vmin.index.xlane.f32.xlu1 %v650_v32  ;;  %v4870_v9 = vpop.xlane.xlu0 %2903 }
 0x104   :  { %6805 = vst [vmem:[#allocation24_spill] sm:$0xff] %v4870_v9 }
 0x105   :  { %v468_v3 = vpop.f32.mrf.mxu2 }
 0x106   :  { %v384_v50 = vpop.f32.mrf.mxu0  ;;  %v586_v23 = vmul.f32 2.0, %v468_v3 }
 0x108   :  { %v653_v30 = vsub.f32 %v4701_v45, %v586_v23 }
 0x109   :  { %2996 = vmin.xlane.f32.xlu2 %v621_v5  ;;  %3769 = vmatmul.msk.f32.gmra.mxu0 %vm99_vm0, %v4581_v15  ;;  %v622_v15 = vsub.f32 %v4701_v45, %v555_v46  ;;  %v4847_v63 = vpop.xlane.xlu2 %2891 }
 0x10a   :  { %3798 = vmatmul.msk.f32.gmra.mxu2 %vm99_vm0, %v72_v29  ;;  %6800 = vst [vmem:[#allocation19_spill] sm:$0xff] %v4847_v63 }
 0x10b   :  { %3052 = vmin.xlane.f32.xlu0 %v649_v10  ;;  %3054 = vmin.xlane.f32.xlu1 %v650_v32  ;;  %v652_v32 = vsub.f32 %v4701_v45, %v585_v8 }
 0x10d   :  { %v471_v21 = vpop.f32.mrf.mxu2 }
 0x10e   :  { %v387_v24 = vpop.f32.mrf.mxu0  ;;  %v587_v29 = vmul.f32 2.0, %v471_v21 }
 0x110   :  { %v654_v3 = vsub.f32 %v4701_v45, %v587_v29 }
 0x111   :  { %750 = vmin.index.xlane.f32.xlu2 %v651_v0  ;;  %3770 = vmatmul.msk.f32.gmra.mxu0 %vm99_vm0, %v4587_v28  ;;  %v624_v28 = vsub.f32 %v4701_v45, %v557_v12  ;;  %v4856_v5 = vpop.xlane.xlu2 %2900  ;;  %v75_v12 = vld [vmem:[%s6723_s0 + $0x1c8] sm:$0xff] }
 0x112   :  { %6803 = vst [vmem:[#allocation22_spill] sm:$0xff] %v4856_v5  ;;  %3799 = vmatmul.msk.f32.gmra.mxu2 %vm99_vm0, %v73_v34 }
 0x113   :  { %692 = vmin.index.xlane.f32.xlu0 %v622_v15  ;;  %694 = vmin.index.xlane.f32.xlu1 %v623_v51 }
 0x115   :  { %v474_v61 = vpop.f32.mrf.mxu2 }
 0x116   :  { %v390_v4 = vpop.f32.mrf.mxu0 }
 0x117   :  { %v560_v16 = vmul.f32 2.0, %v390_v4 }
 0x119   :  { %3056 = vmin.xlane.f32.xlu2 %v651_v0  ;;  %3771 = vmatmul.msk.f32.gmra.mxu0 %vm99_vm0, %v4576_v43  ;;  %v4865_v43 = vpop.xlane.xlu1 %2897  ;;  %v4877_v25 = vpop.xlane.xlu2 %2909 }
 0x11a   :  { %6804 = vst [vmem:[#allocation23_spill] sm:$0xff] %v4865_v43  ;;  %3800 = vmatmul.msk.f32.gmra.mxu2 %vm99_vm0, %v74_v52 }
 0x11b   :  { %2998 = vmin.xlane.f32.xlu0 %v622_v15  ;;  %3000 = vmin.xlane.f32.xlu1 %v623_v51  ;;  %6806 = vst [vmem:[#allocation25_spill] sm:$0xff] %v4877_v25  ;;  %v559_v15 = vmul.f32 2.0, %v387_v24  ;;  %v4882_v51 = vpop.xlane.xlu0 %2912 }
 0x11c   :  { %6808 = vst [vmem:[#allocation27_spill] sm:$0xff] %v4882_v51 }
 0x11d   :  { %v626_v23 = vsub.f32 %v4701_v45, %v559_v15  ;;  %v477_v21 = vpop.f32.mrf.mxu2 }
 0x11e   :  { %v4858_v10 = vpop.f32.mrf.mxu0 }
 0x121   :  { %696 = vmin.index.xlane.f32.xlu2 %v624_v28  ;;  %3772 = vmatmul.msk.f32.gmra.mxu0 %vm99_vm0, %v4606_v55  ;;  %v4880_v0 = vpop.xlane.xlu1 %2906  ;;  %v558_v55 = vmul.f32 2.0, %v384_v50  ;;  %v6730_v50 = vlaneseq  ;;  %v4893_v24 = vpop.xlane.xlu2 %2915 }
 0x122   :  { %6807 = vst [vmem:[#allocation26_spill] sm:$0xff] %v4880_v0  ;;  %3801 = vmatmul.msk.f32.gmra.mxu2 %vm99_vm0, %v75_v12  ;;  %v588_v0 = vmul.f32 2.0, %v474_v61  ;;  %v589_v61 = vmul.f32 2.0, %v477_v21  ;;  %v561_v21 = vmul.f32 2.0, %v4858_v10 }
 0x123   :  { %752 = vmin.index.xlane.f32.xlu0 %v652_v32  ;;  %754 = vmin.index.xlane.f32.xlu1 %v653_v30  ;;  %v625_v8 = vsub.f32 %v4701_v45, %v558_v55  ;;  %6809 = vst [vmem:[#allocation28_spill] sm:$0xff] %v4893_v24 }
 0x125   :  { %v480_v24 = vpop.f32.mrf.mxu2 }
 0x126   :  { %v4872_v46 = vpop.f32.mrf.mxu0 }
 0x129   :  { %3002 = vmin.xlane.f32.xlu2 %v624_v28 }
 0x12b   :  { %3058 = vmin.xlane.f32.xlu0 %v652_v32  ;;  %3060 = vmin.xlane.f32.xlu1 %v653_v30  ;;  %v4895_v32 = vpop.xlane.xlu1 %2918  ;;  %v4898_v30 = vand.u32 127, %v6730_v50 }
 0x12c   :  { %6810 = vst [vmem:[#allocation29_spill] sm:$0xff] %v4895_v32  ;;  %v6731_v32 = vmov 1.0  }
 0x12e   :  { %v4890_v28 = vpop.f32.mrf.mxu0 }
 0x12f   :  { %v563_v43 = vmul.f32 2.0, %v4890_v28 }
 0x131   :  { %756 = vmin.index.xlane.f32.xlu2 %v654_v3 }
 0x133   :  { %698 = vmin.index.xlane.f32.xlu0 %v625_v8  ;;  %700 = vmin.index.xlane.f32.xlu1 %v626_v23 }
 0x136   :  { %v681_v34 = vpop.xlane.xlu0 %680  ;;  %v4901_v12 = vpop.f32.mrf.mxu0 }
 0x137   :  { %v1275_v52 = vperm.slane %v681_v34, 0  ;;  %v1276_v29 = vperm.slane %v681_v34, 1  ;;  %v1277_v55 = vperm.slane %v681_v34, 2  ;;  %v1278_v15 = vperm.slane %v681_v34, 3 }
 0x138   :  { %v1279_v51 = vperm.slane %v681_v34, 4  ;;  %vm810_vm1 = vcmp.eq.s32.totalorder %v4898_v30, %v681_v34  ;;  %v1280_v25 = vperm.slane %v681_v34, 5  ;;  %v1281_v50 = vperm.slane %v681_v34, 6 }
 0x139   :  { %1787 = vst [vmem:[#allocation1] ss:$9 sm:$0xff] %v1275_v52  ;;  %3062 = vmin.xlane.f32.xlu2 %v654_v3  ;;  %3872 = vmatmul.msk.f32.vlgmr.msrb.gmra.mxu0 %vm810_vm1, %v6731_v32  ;;  %v1282_v9 = vperm.slane %v681_v34, 7  ;;  %v627_v3 = vsub.f32 %v4701_v45, %v560_v16  ;;  %v590_v34 = vmul.f32 2.0, %v480_v24 }
 0x13a   :  { %1789 = vst [vmem:[#allocation1 + $0x1] ss:$9 sm:$0xff] %v1276_v29  ;;  %v655_v29 = vsub.f32 %v4701_v45, %v588_v0  ;;  %v77_v0 = vld [vmem:[%s6723_s0 + $0x1d8] sm:$0xff] }
 0x13b   :  { %1791 = vst [vmem:[#allocation1 + $0x2] ss:$9 sm:$0xff] %v1277_v55  ;;  %3004 = vmin.xlane.f32.xlu0 %v625_v8  ;;  %3006 = vmin.xlane.f32.xlu1 %v626_v23  ;;  %v76_v8 = vld [vmem:[%s6723_s0 + $0x1d0] sm:$0xff]  ;;  %v562_v55 = vmul.f32 2.0, %v4872_v46 }
 0x13c   :  { %1793 = vst [vmem:[#allocation1 + $0x3] ss:$9 sm:$0xff] %v1278_v15  ;;  %v4904_v4 = vpop.xlane.xlu2 %738  ;;  %3802 = vmatmul.msk.f32.gmra.mxu2 %vm99_vm0, %v76_v8 }
 0x13d   :  { %6811 = vst [vmem:[#allocation30_spill] sm:$0xff] %v4904_v4  ;;  %v629_v46 = vsub.f32 %v4701_v45, %v562_v55  ;;  %v6816_v55 = vmov 1.0  }
 0x13e   :  { %1795 = vst [vmem:[#allocation1 + $0x4] ss:$9 sm:$0xff] %v1279_v51  ;;  %v4907_v52 = vpop.xlane.xlu0 %2986  ;;  %v4909_v5 = vpop.xlane.xlu1 %2988 }
 0x13f   :  { %1797 = vst [vmem:[#allocation1 + $0x5] ss:$9 sm:$0xff] %v1280_v25  ;;  %v4916_v16 = vpop.f32.mrf.mxu0  ;;  %v483_v25 = vpop.f32.mrf.mxu2 }
 0x140   :  { %1799 = vst [vmem:[#allocation1 + $0x6] ss:$9 sm:$0xff] %v1281_v50 }
 0x141   :  { %1801 = vst [vmem:[#allocation1 + $0x7] ss:$9 sm:$0xff] %v1282_v9  ;;  %702 = vmin.index.xlane.f32.xlu2 %v627_v3  ;;  %v656_v9 = vsub.f32 %v4701_v45, %v589_v61 }
 0x143   :  { %758 = vmin.index.xlane.f32.xlu0 %v655_v29  ;;  %3064 = vmin.xlane.f32.xlu1 %v655_v29  ;;  %v4934_v29 = vsub.f32 %v4701_v45, %v590_v34 }
 0x144   :  { %v4918_v51 = vpop.xlane.xlu2 %3044  ;;  %3803 = vmatmul.msk.f32.gmra.mxu2 %vm99_vm0, %v77_v0 }
 0x145   :  { %6812 = vst [vmem:[#allocation31_spill] sm:$0xff] %v4918_v51  ;;  %v565_v51 = vmul.f32 2.0, %v4916_v16 }
 0x146   :  { %v4920_v23 = vpop.xlane.xlu0 %800  ;;  %v4922_v50 = vpop.xlane.xlu1 %802 }
 0x147   :  { %6813 = vst [vmem:[#allocation32_spill] sm:$0xff] %v4920_v23  ;;  %v4936_v8 = vpop.f32.mrf.mxu0  ;;  %v486_v32 = vpop.f32.mrf.mxu2 }
 0x148   :  { %6814 = vst [vmem:[#allocation33_spill] sm:$0xff] %v4922_v50  ;;  %v4942_v23 = vld [vmem:[#allocation1] sm:$0xff] }
 0x149   :  { %3008 = vmin.xlane.f32.xlu2 %v627_v3  ;;  %v628_v3 = vsub.f32 %v4701_v45, %v561_v21  ;;  %6815 = vst [vmem:[#allocation34_spill] sm:$0xff] %v4942_v23 }
 0x14b   :  { %3066 = vmin.xlane.f32.xlu0 %v656_v9  ;;  %760 = vmin.index.xlane.f32.xlu1 %v656_v9 }
 0x14c   :  { %v4931_v15 = vpop.xlane.xlu2 %2990 }
 0x14e   :  { %v683_v50 = vpop.xlane.xlu0 %682  ;;  %v4938_v61 = vpop.xlane.xlu1 %684 }
 0x14f   :  { %v1283_v24 = vperm.slane %v683_v50, 0  ;;  %v1284_v0 = vperm.slane %v683_v50, 1  ;;  %v1285_v10 = vperm.slane %v683_v50, 2  ;;  %v1286_v9 = vperm.slane %v683_v50, 3  ;;  %v4958_v23 = vpop.f32.mrf.mxu0  ;;  %v489_v40 = vpop.f32.mrf.mxu2 }
 0x150   :  { %v1287_v34 = vperm.slane %v683_v50, 4  ;;  %v1288_v20 = vperm.slane %v683_v50, 5  ;;  %v1289_v63 = vperm.slane %v683_v50, 6  ;;  %vm811_vm2 = vcmp.eq.s32.totalorder %v4898_v30, %v683_v50 }
 0x151   :  { %1803 = vst [vmem:[#allocation1] ss:$9 sm:$0xff] %v1283_v24  ;;  %762 = vmin.index.xlane.f32.xlu2 %v4934_v29  ;;  %vm812_vm3 = vcmp.eq.s32.totalorder %v4898_v30, %v4938_v61  ;;  %v1290_v21 = vperm.slane %v683_v50, 7  ;;  %3873 = vmatmul.msk.f32.gmra.mxu0 %vm811_vm2, %v6816_v55  ;;  %v630_v24 = vsub.f32 %v4701_v45, %v563_v43  ;;  %v591_v50 = vmul.f32 2.0, %v483_v25 }
 0x152   :  { %1804 = vst [vmem:[#allocation1 + $0x1] ss:$9 sm:$0xff] %v1284_v0  ;;  %3874 = vmatmul.msk.f32.vlgmr.msra.gmra.mxu1 %vm812_vm3, %v6816_v55  ;;  %v1293_v43 = vperm.slane %v4938_v61, 2 }
 0x153   :  { %1805 = vst [vmem:[#allocation1 + $0x2] ss:$9 sm:$0xff] %v1285_v10  ;;  %704 = vmin.index.xlane.f32.xlu0 %v628_v3  ;;  %706 = vmin.index.xlane.f32.xlu1 %v629_v46  ;;  %v4973_v25 = vsub.f32 %v4701_v45, %v591_v50  ;;  %v564_v50 = vmul.f32 2.0, %v4901_v12 }
 0x154   :  { %1806 = vst [vmem:[#allocation1 + $0x3] ss:$9 sm:$0xff] %v1286_v9  ;;  %v4950_v28 = vpop.xlane.xlu2 %804  ;;  %v592_v9 = vmul.f32 2.0, %v486_v32 }
 0x155   :  { %6817 = vst [vmem:[#allocation35_spill] sm:$0xff] %v4950_v28  ;;  %v1291_v28 = vperm.slane %v4938_v61, 0  ;;  %v631_v16 = vsub.f32 %v4701_v45, %v564_v50 }
 0x156   :  { %1807 = vst [vmem:[#allocation1 + $0x4] ss:$9 sm:$0xff] %v1287_v34  ;;  %v4954_v0 = vpop.xlane.xlu0 %740  ;;  %v4956_v10 = vpop.xlane.xlu1 %742  ;;  %v4976_v32 = vsub.f32 %v4701_v45, %v592_v9  ;;  %v1298_v9 = vperm.slane %v4938_v61, 7 }
 0x157   :  { %1808 = vst [vmem:[#allocation1 + $0x5] ss:$9 sm:$0xff] %v1288_v20  ;;  %v1292_v20 = vperm.slane %v4938_v61, 1  ;;  %v4980_v48 = vpop.f32.mrf.mxu0 }
 0x158   :  { %6818 = vst [vmem:[#allocation36_spill] sm:$0xff] %v4954_v0 }
 0x159   :  { %6819 = vst [vmem:[#allocation37_spill] sm:$0xff] %v4956_v10  ;;  %708 = vmin.index.xlane.f32.xlu2 %v630_v24 }
 0x15a   :  { %1809 = vst [vmem:[#allocation1 + $0x6] ss:$9 sm:$0xff] %v1289_v63 }
 0x15b   :  { %1810 = vst [vmem:[#allocation1 + $0x7] ss:$9 sm:$0xff] %v1290_v21  ;;  %3010 = vmin.xlane.f32.xlu0 %v628_v3  ;;  %3012 = vmin.xlane.f32.xlu1 %v629_v46  ;;  %v1294_v21 = vperm.slane %v4938_v61, 3  ;;  %v1295_v3 = vperm.slane %v4938_v61, 4  ;;  %v1296_v46 = vperm.slane %v4938_v61, 5 }
 0x15c   :  { %v4961_v34 = vpop.xlane.xlu2 %744 }
 0x15d   :  { %6820 = vst [vmem:[#allocation38_spill] sm:$0xff] %v4961_v34 }
 0x15e   :  { %v4965_v17 = vpop.xlane.xlu0 %3046  ;;  %v4967_v63 = vpop.xlane.xlu1 %3048 }
 0x15f   :  { %6821 = vst [vmem:[#allocation39_spill] sm:$0xff] %v4965_v17  ;;  %v593_v17 = vmul.f32 2.0, %v489_v40 }
 0x160   :  { %6822 = vst [vmem:[#allocation40_spill] sm:$0xff] %v4967_v63  ;;  %v492_v63 = vpop.f32.mrf.mxu2 }
 0x161   :  { %3014 = vmin.xlane.f32.xlu2 %v630_v24 }
 0x162   :  { %v4969_v1 = vld [vmem:[#allocation1] sm:$0xff] }
 0x163   :  { %6823 = vst [vmem:[#allocation41_spill] sm:$0xff] %v4969_v1  ;;  %v1297_v1 = vperm.slane %v4938_v61, 6  ;;  %764 = vmin.index.xlane.f32.xlu0 %v4973_v25  ;;  %766 = vmin.index.xlane.f32.xlu1 %v4976_v32  ;;  %v632_v61 = vsub.f32 %v4701_v45, %v565_v51 }
 0x164   :  { %1812 = vst [vmem:[#allocation1] ss:$9 sm:$0xff] %v1291_v28  ;;  %v4988_v40 = vpop.xlane.xlu2 %3050  ;;  %v4991_v28 = vsub.f32 %v4701_v45, %v593_v17  ;;  %v5001_v17 = vpop.f32.mrf.mxu0 }
 0x165   :  { %1813 = vst [vmem:[#allocation1 + $0x1] ss:$9 sm:$0xff] %v1292_v20  ;;  %v566_v20 = vmul.f32 2.0, %v4936_v8 }
 0x166   :  { %1814 = vst [vmem:[#allocation1 + $0x2] ss:$9 sm:$0xff] %v1293_v43  ;;  %v4993_v24 = vpop.xlane.xlu0 %2992  ;;  %v687_v12 = vpop.xlane.xlu1 %686 }
 0x167   :  { %1815 = vst [vmem:[#allocation1 + $0x3] ss:$9 sm:$0xff] %v1294_v21  ;;  %vm813_vm4 = vcmp.eq.s32.totalorder %v4898_v30, %v687_v12  ;;  %v1299_v43 = vperm.slane %v687_v12, 0  ;;  %v1300_v21 = vperm.slane %v687_v12, 1  ;;  %v1302_v51 = vperm.slane %v687_v12, 3 }
 0x168   :  { %1816 = vst [vmem:[#allocation1 + $0x4] ss:$9 sm:$0xff] %v1295_v3  ;;  %3875 = vmatmul.msk.f32.gmra.mxu1 %vm813_vm4, %v6816_v55  ;;  %v1301_v3 = vperm.slane %v687_v12, 2  ;;  %v1304_v56 = vperm.slane %v687_v12, 5  ;;  %v1305_v36 = vperm.slane %v687_v12, 6  ;;  %v1306_v34 = vperm.slane %v687_v12, 7 }
 0x169   :  { %1817 = vst [vmem:[#allocation1 + $0x5] ss:$9 sm:$0xff] %v1296_v46  ;;  %768 = vmin.index.xlane.f32.xlu2 %v4991_v28  ;;  %v633_v46 = vsub.f32 %v4701_v45, %v566_v20  ;;  %v594_v20 = vmul.f32 2.0, %v492_v63 }
 0x16a   :  { %6824 = vst [vmem:[#allocation42_spill] sm:$0xff] %v4988_v40  ;;  %v1303_v40 = vperm.slane %v687_v12, 4 }
 0x16b   :  { %1818 = vst [vmem:[#allocation1 + $0x6] ss:$9 sm:$0xff] %v1297_v1  ;;  %710 = vmin.index.xlane.f32.xlu0 %v631_v16  ;;  %712 = vmin.index.xlane.f32.xlu1 %v632_v61  ;;  %v495_v1 = vpop.f32.mrf.mxu2  ;;  %v5019_v12 = vsub.f32 %v4701_v45, %v594_v20 }
 0x16c   :  { %1819 = vst [vmem:[#allocation1 + $0x7] ss:$9 sm:$0xff] %v1298_v9  ;;  %v689_v11 = vpop.xlane.xlu2 %688 }
 0x16d   :  { %vm814_vm5 = vcmp.eq.s32.totalorder %v4898_v30, %v689_v11  ;;  %v1313_v10 = vperm.slane %v689_v11, 6 }
 0x16e   :  { %v5006_v8 = vpop.xlane.xlu0 %806  ;;  %v5008_v9 = vpop.xlane.xlu1 %2994 }
 0x16f   :  { %6826 = vst [vmem:[#allocation44_spill] sm:$0xff] %v5006_v8  ;;  %v595_v8 = vmul.f32 2.0, %v495_v1 }
 0x170   :  { %3876 = vmatmul.msk.f32.gmra.mxu1 %vm814_vm5, %v6816_v55 }
 0x171   :  { %714 = vmin.index.xlane.f32.xlu2 %v633_v46 }
 0x173   :  { %v5004_v50 = vld [vmem:[#allocation1] sm:$0xff]  ;;  %3016 = vmin.xlane.f32.xlu0 %v631_v16  ;;  %3018 = vmin.xlane.f32.xlu1 %v632_v61  ;;  %v568_v16 = vmul.f32 2.0, %v4980_v48  ;;  %v1309_v61 = vperm.slane %v689_v11, 2 }
 0x174   :  { %6825 = vst [vmem:[#allocation43_spill] sm:$0xff] %v5004_v50  ;;  %v498_v50 = vpop.f32.mrf.mxu2  ;;  %v5024_v63 = vpop.xlane.xlu2 %690 }
 0x175   :  { %1821 = vst [vmem:[#allocation1] ss:$9 sm:$0xff] %v1299_v43  ;;  %v5012_v43 = vpop.f32.mrf.mxu0  ;;  %vm815_vm6 = vcmp.eq.s32.totalorder %v4898_v30, %v5024_v63  ;;  %v1320_v4 = vperm.slane %v5024_v63, 5 }
 0x176   :  { %1822 = vst [vmem:[#allocation1 + $0x1] ss:$9 sm:$0xff] %v1300_v21  ;;  %v5014_v21 = vpop.xlane.xlu0 %746 }
 0x177   :  { %1823 = vst [vmem:[#allocation1 + $0x2] ss:$9 sm:$0xff] %v1301_v3  ;;  %v5016_v3 = vpop.xlane.xlu1 %748 }
 0x178   :  { %1824 = vst [vmem:[#allocation1 + $0x3] ss:$9 sm:$0xff] %v1302_v51  ;;  %v5022_v51 = vsub.f32 %v4701_v45, %v595_v8  ;;  %3877 = vmatmul.msk.f32.gmra.mxu1 %vm815_vm6, %v6816_v55  ;;  %v1312_v8 = vperm.slane %v689_v11, 5 }
 0x179   :  { %1825 = vst [vmem:[#allocation1 + $0x4] ss:$9 sm:$0xff] %v1303_v40  ;;  %3020 = vmin.xlane.f32.xlu2 %v633_v46  ;;  %v596_v40 = vmul.f32 2.0, %v498_v50  ;;  %v1310_v46 = vperm.slane %v689_v11, 3 }
 0x17a   :  { %1826 = vst [vmem:[#allocation1 + $0x5] ss:$9 sm:$0xff] %v1304_v56  ;;  %v1307_v56 = vperm.slane %v689_v11, 0 }
 0x17b   :  { %1827 = vst [vmem:[#allocation1 + $0x6] ss:$9 sm:$0xff] %v1305_v36  ;;  %v567_v36 = vmul.f32 2.0, %v4958_v23  ;;  %770 = vmin.index.xlane.f32.xlu0 %v5019_v12  ;;  %772 = vmin.index.xlane.f32.xlu1 %v5022_v51  ;;  %v5036_v50 = vsub.f32 %v4701_v45, %v596_v40  ;;  %v1311_v23 = vperm.slane %v689_v11, 4 }
 0x17c   :  { %1828 = vst [vmem:[#allocation1 + $0x7] ss:$9 sm:$0xff] %v1306_v34  ;;  %v1308_v34 = vperm.slane %v689_v11, 1  ;;  %v5045_v40 = vpop.xlane.xlu2 %2996 }
 0x17d   :  { %6827 = vst [vmem:[#allocation45_spill] sm:$0xff] %v5014_v21  ;;  %v423_v20 = vpop.f32.mrf.mxu0  ;;  %v635_v21 = vsub.f32 %v4701_v45, %v568_v16 }
 0x17e   :  { %6828 = vst [vmem:[#allocation46_spill] sm:$0xff] %v5016_v3  ;;  %v5038_v48 = vpop.xlane.xlu0 %3052  ;;  %v634_v3 = vsub.f32 %v4701_v45, %v567_v36  ;;  %v569_v36 = vmul.f32 2.0, %v5001_v17  ;;  %v1318_v17 = vperm.slane %v5024_v63, 3 }
 0x17f   :  { %6830 = vst [vmem:[#allocation48_spill] sm:$0xff] %v5038_v48  ;;  %v5042_v0 = vpop.xlane.xlu1 %3054 }
 0x180   :  { %6831 = vst [vmem:[#allocation49_spill] sm:$0xff] %v5042_v0 }
 0x181   :  { %774 = vmin.index.xlane.f32.xlu2 %v5036_v50 }
 0x183   :  { %v5033_v1 = vld [vmem:[#allocation1] sm:$0xff]  ;;  %716 = vmin.index.xlane.f32.xlu0 %v634_v3  ;;  %718 = vmin.index.xlane.f32.xlu1 %v635_v21 }
 0x184   :  { %6829 = vst [vmem:[#allocation47_spill] sm:$0xff] %v5033_v1  ;;  %v1314_v1 = vperm.slane %v689_v11, 7  ;;  %v1316_v11 = vperm.slane %v5024_v63, 1  ;;  %v5063_v0 = vpop.xlane.xlu2 %750 }
 0x185   :  { %1830 = vst [vmem:[#allocation1] ss:$9 sm:$0xff] %v1307_v56  ;;  %v501_v56 = vpop.f32.mrf.mxu2 }
 0x186   :  { %1831 = vst [vmem:[#allocation1 + $0x1] ss:$9 sm:$0xff] %v1308_v34  ;;  %v5048_v16 = vpop.xlane.xlu0 %692  ;;  %v1315_v34 = vperm.slane %v5024_v63, 0  ;;  %v597_v62 = vmul.f32 2.0, %v501_v56 }
 0x187   :  { %1832 = vst [vmem:[#allocation1 + $0x2] ss:$9 sm:$0xff] %v1309_v61  ;;  %v426_v61 = vpop.f32.mrf.mxu0  ;;  %vm816_vm7 = vcmp.eq.s32.totalorder %v4898_v30, %v5048_v16  ;;  %v1329_v33 = vperm.slane %v5048_v16, 6 }
 0x188   :  { %1833 = vst [vmem:[#allocation1 + $0x3] ss:$9 sm:$0xff] %v1310_v46  ;;  %v5052_v46 = vpop.xlane.xlu1 %694  ;;  %3878 = vmatmul.msk.f32.gmra.mxu1 %vm816_vm7, %v6816_v55 }
 0x189   :  { %1834 = vst [vmem:[#allocation1 + $0x4] ss:$9 sm:$0xff] %v1311_v23  ;;  %v1317_v23 = vperm.slane %v5024_v63, 2  ;;  %vm817_vm8 = vcmp.eq.s32.totalorder %v4898_v30, %v5052_v46 }
 0x18a   :  { %1835 = vst [vmem:[#allocation1 + $0x5] ss:$9 sm:$0xff] %v1312_v8  ;;  %v636_v8 = vsub.f32 %v4701_v45, %v569_v36 }
 0x18b   :  { %1836 = vst [vmem:[#allocation1 + $0x6] ss:$9 sm:$0xff] %v1313_v10  ;;  %3022 = vmin.xlane.f32.xlu0 %v634_v3  ;;  %3024 = vmin.xlane.f32.xlu1 %v635_v21  ;;  %v1321_v3 = vperm.slane %v5024_v63, 6  ;;  %v1322_v21 = vperm.slane %v5024_v63, 7 }
 0x18c   :  { %1837 = vst [vmem:[#allocation1 + $0x7] ss:$9 sm:$0xff] %v1314_v1  ;;  %v1319_v1 = vperm.slane %v5024_v63, 4  ;;  %720 = vmin.index.xlane.f32.xlu2 %v636_v8 }
 0x18d   :  { %6833 = vst [vmem:[#allocation51_spill] sm:$0xff] %v5063_v0  ;;  %v504_v48 = vpop.f32.mrf.mxu2  ;;  %v1326_v0 = vperm.slane %v5048_v16, 3 }
 0x18e   :  { %v598_v36 = vmul.f32 2.0, %v504_v48  ;;  %v570_v48 = vmul.f32 2.0, %v5012_v43 }
 0x18f   :  { %v5076_v56 = vpop.f32.mrf.mxu0 }
 0x190   :  { %v5080_v63 = vpop.xlane.xlu1 %3000  ;;  %3879 = vmatmul.msk.f32.gmra.mxu1 %vm817_vm8, %v6816_v55  ;;  %v637_v43 = vsub.f32 %v4701_v45, %v570_v48  ;;  %v1330_v48 = vperm.slane %v5048_v16, 7  ;;  %v573_v35 = vmul.f32 2.0, %v5076_v56 }
 0x193   :  { %v5058_v10 = vld [vmem:[#allocation1] sm:$0xff] }
 0x194   :  { %6832 = vst [vmem:[#allocation50_spill] sm:$0xff] %v5058_v10  ;;  %v5074_v10 = vsub.f32 %v4701_v45, %v598_v36  ;;  %3026 = vmin.xlane.f32.xlu2 %v636_v8  ;;  %v1327_v8 = vperm.slane %v5048_v16, 4 }
 0x195   :  { %1839 = vst [vmem:[#allocation1] ss:$9 sm:$0xff] %v1315_v34  ;;  %v5071_v34 = vsub.f32 %v4701_v45, %v597_v62  ;;  %v507_v62 = vpop.f32.mrf.mxu2 }
 0x196   :  { %1840 = vst [vmem:[#allocation1 + $0x1] ss:$9 sm:$0xff] %v1316_v11  ;;  %v5078_v11 = vpop.xlane.xlu0 %2998  ;;  %778 = vmin.index.xlane.f32.xlu1 %v5074_v10 }
 0x197   :  { %1841 = vst [vmem:[#allocation1 + $0x2] ss:$9 sm:$0xff] %v1317_v23  ;;  %776 = vmin.index.xlane.f32.xlu0 %v5071_v34  ;;  %v571_v23 = vmul.f32 2.0, %v423_v20 }
 0x198   :  { %1842 = vst [vmem:[#allocation1 + $0x3] ss:$9 sm:$0xff] %v1318_v17  ;;  %v1323_v17 = vperm.slane %v5048_v16, 0  ;;  %v5106_v22 = vpop.xlane.xlu1 %754 }
 0x199   :  { %1843 = vst [vmem:[#allocation1 + $0x4] ss:$9 sm:$0xff] %v1319_v1  ;;  %v599_v1 = vmul.f32 2.0, %v507_v62  ;;  %v638_v20 = vsub.f32 %v4701_v45, %v571_v23  ;;  %v1328_v62 = vperm.slane %v5048_v16, 5  ;;  %vm847_vm10 = vcmp.eq.s32.totalorder %v4898_v30, %v5106_v22 }
 0x19a   :  { %1844 = vst [vmem:[#allocation1 + $0x5] ss:$9 sm:$0xff] %v1320_v4  ;;  %v5085_v4 = vpop.xlane.xlu2 %3056  ;;  %3909 = vmatmul.msk.f32.vlgmr.msrb.gmra.mxu3 %vm847_vm10, %v6816_v55 }
 0x19b   :  { %6834 = vst [vmem:[#allocation52_spill] sm:$0xff] %v5074_v10  ;;  %v5096_v13 = vsub.f32 %v4701_v45, %v599_v1 }
 0x19c   :  { %1845 = vst [vmem:[#allocation1 + $0x6] ss:$9 sm:$0xff] %v1321_v3  ;;  %v1324_v3 = vperm.slane %v5048_v16, 1 }
 0x19d   :  { %1846 = vst [vmem:[#allocation1 + $0x7] ss:$9 sm:$0xff] %v1322_v21  ;;  %v1325_v21 = vperm.slane %v5048_v16, 2  ;;  %780 = vmin.index.xlane.f32.xlu2 %v5096_v13  ;;  %v1331_v16 = vperm.slane %v5052_v46, 0 }
 0x19e   :  { %6835 = vst [vmem:[#allocation53_spill] sm:$0xff] %v5085_v4  ;;  %v5101_v4 = vpop.f32.mrf.mxu0  ;;  %724 = vmin.index.xlane.f32.xlu1 %v638_v20 }
 0x19f   :  { %6838 = vst [vmem:[#allocation56_spill] sm:$0xff] %v5106_v22  ;;  %722 = vmin.index.xlane.f32.xlu0 %v637_v43 }
 0x1a2   :  { %v5110_v23 = vpop.xlane.xlu2 %696 }
 0x1a3   :  { %vm818_vm9 = vcmp.eq.s32.totalorder %v4898_v30, %v5110_v23  ;;  %v1345_v10 = vperm.slane %v5110_v23, 6 }
 0x1a4   :  { %v5091_v36 = vld [vmem:[#allocation1] sm:$0xff]  ;;  %3880 = vmatmul.msk.f32.gmra.mxu1 %vm818_vm9, %v6816_v55 }
 0x1a5   :  { %6836 = vst [vmem:[#allocation54_spill] sm:$0xff] %v5091_v36  ;;  %v5104_v36 = vpop.xlane.xlu0 %752 }
 0x1a6   :  { %1848 = vst [vmem:[#allocation1] ss:$9 sm:$0xff] %v1323_v17  ;;  %v572_v17 = vmul.f32 2.0, %v426_v61  ;;  %v5120_v1 = vpop.f32.mrf.mxu0  ;;  %3030 = vmin.xlane.f32.xlu1 %v638_v20  ;;  %v1337_v20 = vperm.slane %v5052_v46, 6 }
 0x1a7   :  { %1849 = vst [vmem:[#allocation1 + $0x1] ss:$9 sm:$0xff] %v1324_v3  ;;  %3028 = vmin.xlane.f32.xlu0 %v637_v43  ;;  %v1336_v43 = vperm.slane %v5052_v46, 5 }
 0x1a8   :  { %1850 = vst [vmem:[#allocation1 + $0x2] ss:$9 sm:$0xff] %v1325_v21  ;;  %v639_v61 = vsub.f32 %v4701_v45, %v572_v17  ;;  %v5125_v21 = vpop.xlane.xlu1 %3060  ;;  %v1334_v45 = vperm.slane %v5052_v46, 3  ;;  %v1335_v17 = vperm.slane %v5052_v46, 4 }
 0x1a9   :  { %6837 = vst [vmem:[#allocation55_spill] sm:$0xff] %v5104_v36 }
 0x1aa   :  { %1851 = vst [vmem:[#allocation1 + $0x3] ss:$9 sm:$0xff] %v1326_v0  ;;  %v510_v0 = vpop.f32.mrf.mxu2  ;;  %726 = vmin.index.xlane.f32.xlu2 %v639_v61 }
 0x1ab   :  { %1852 = vst [vmem:[#allocation1 + $0x4] ss:$9 sm:$0xff] %v1327_v8  ;;  %v1333_v8 = vperm.slane %v5052_v46, 2 }
 0x1ac   :  { %1853 = vst [vmem:[#allocation1 + $0x5] ss:$9 sm:$0xff] %v1328_v62 }
 0x1ad   :  { %1854 = vst [vmem:[#allocation1 + $0x6] ss:$9 sm:$0xff] %v1329_v33  ;;  %v1332_v33 = vperm.slane %v5052_v46, 1  ;;  %v5123_v3 = vpop.xlane.xlu0 %3058 }
 0x1ae   :  { %1855 = vst [vmem:[#allocation1 + $0x7] ss:$9 sm:$0xff] %v1330_v48  ;;  %v1338_v48 = vperm.slane %v5052_v46, 7  ;;  %v5137_v36 = vpop.f32.mrf.mxu0  ;;  %v1339_v46 = vperm.slane %v5110_v23, 0 }
 0x1af   :  { %6839 = vst [vmem:[#allocation57_spill] sm:$0xff] %v5123_v3 }
 0x1b0   :  { %6840 = vst [vmem:[#allocation58_spill] sm:$0xff] %v5125_v21  ;;  %v5141_v21 = vpop.xlane.xlu1 %700 }
 0x1b1   :  { %vm820_vm12 = vcmp.eq.s32.totalorder %v4898_v30, %v5141_v21 }
 0x1b2   :  { %3032 = vmin.xlane.f32.xlu2 %v639_v61  ;;  %v513_v22 = vpop.f32.mrf.mxu2  ;;  %v1340_v61 = vperm.slane %v5110_v23, 1 }
 0x1b3   :  { %v601_v3 = vmul.f32 2.0, %v513_v22 }
 0x1b5   :  { %v5128_v62 = vld [vmem:[#allocation1] sm:$0xff] }
 0x1b6   :  { %6841 = vst [vmem:[#allocation59_spill] sm:$0xff] %v5128_v62  ;;  %v5135_v62 = vpop.xlane.xlu2 %3002  ;;  %v5171_v6 = vpop.f32.mrf.mxu0 }
 0x1b7   :  { %1857 = vst [vmem:[#allocation1] ss:$9 sm:$0xff] %v1331_v16  ;;  %v5139_v16 = vpop.xlane.xlu0 %698 }
 0x1b8   :  { %1858 = vst [vmem:[#allocation1 + $0x1] ss:$9 sm:$0xff] %v1332_v33  ;;  %v600_v33 = vmul.f32 2.0, %v510_v0  ;;  %vm819_vm11 = vcmp.eq.s32.totalorder %v4898_v30, %v5139_v16 }
 0x1b9   :  { %1859 = vst [vmem:[#allocation1 + $0x2] ss:$9 sm:$0xff] %v1333_v8  ;;  %3881 = vmatmul.msk.f32.gmra.mxu1 %vm819_vm11, %v6816_v55  ;;  %v1341_v8 = vperm.slane %v5110_v23, 2  ;;  %vm6784_vm11 = vcmask 7168  }
 0x1ba   :  { %1860 = vst [vmem:[#allocation1 + $0x3] ss:$9 sm:$0xff] %v1334_v45  ;;  %v5152_v45 = vld [vmem:[%s6725_s2] ss:$0 sm:$0xff] }
 0x1bb   :  { %1861 = vst [vmem:[#allocation1 + $0x4] ss:$9 sm:$0xff] %v1335_v17  ;;  %v5155_v17 = vsub.f32 %v5152_v45, %v600_v33  ;;  %v5158_v22 = vsub.f32 %v5152_v45, %v601_v3  ;;  %v1344_v33 = vperm.slane %v5110_v23, 5  ;;  %v574_v3 = vmul.f32 2.0, %v5101_v4 }
 0x1bc   :  { %1862 = vst [vmem:[#allocation1 + $0x5] ss:$9 sm:$0xff] %v1336_v43  ;;  %v1342_v43 = vperm.slane %v5110_v23, 3  ;;  %v640_v4 = vsub.f32 %v5152_v45, %v573_v35 }
 0x1bd   :  { %1863 = vst [vmem:[#allocation1 + $0x6] ss:$9 sm:$0xff] %v1337_v20  ;;  %v1343_v20 = vperm.slane %v5110_v23, 4  ;;  %782 = vmin.index.xlane.f32.xlu0 %v5155_v17  ;;  %784 = vmin.index.xlane.f32.xlu1 %v5158_v22 }
 0x1be   :  { %1864 = vst [vmem:[#allocation1 + $0x7] ss:$9 sm:$0xff] %v1338_v48  ;;  %v516_v48 = vpop.f32.mrf.mxu2  ;;  %v5169_v39 = vpop.xlane.xlu2 %756 }
 0x1bf   :  { %6842 = vst [vmem:[#allocation60_spill] sm:$0xff] %v5155_v17  ;;  %v5176_v17 = vpop.xlane.xlu1 %3006  ;;  %vm848_vm13 = vcmp.eq.s32.totalorder %v4898_v30, %v5169_v39 }
 0x1c0   :  { %6843 = vst [vmem:[#allocation61_spill] sm:$0xff] %v5158_v22  ;;  %v1346_v22 = vperm.slane %v5110_v23, 7  ;;  %3910 = vmatmul.msk.f32.gmra.mxu3 %vm848_vm13, %v6816_v55  ;;  %v641_v23 = vsub.f32 %v5152_v45, %v574_v3  ;;  %v1350_v3 = vperm.slane %v5139_v16, 3 }
 0x1c1   :  { %6845 = vst [vmem:[#allocation63_spill] sm:$0xff] %v5169_v39  ;;  %3882 = vmatmul.msk.f32.gmra.mxu1 %vm820_vm12, %v6816_v55  ;;  %v1352_v39 = vperm.slane %v5139_v16, 5 }
 0x1c5   :  { %v5160_v0 = vld [vmem:[#allocation1] sm:$0xff]  ;;  %728 = vmin.index.xlane.f32.xlu0 %v640_v4  ;;  %730 = vmin.index.xlane.f32.xlu1 %v641_v23 }
 0x1c6   :  { %6844 = vst [vmem:[#allocation62_spill] sm:$0xff] %v5160_v0  ;;  %v602_v0 = vmul.f32 2.0, %v516_v48  ;;  %v5198_v35 = vpop.xlane.xlu2 %3062  ;;  %v1349_v48 = vperm.slane %v5139_v16, 2 }
 0x1c7   :  { %1866 = vst [vmem:[#allocation1] ss:$9 sm:$0xff] %v1339_v46  ;;  %v5174_v46 = vpop.xlane.xlu0 %3004 }
 0x1c8   :  { %1867 = vst [vmem:[#allocation1 + $0x1] ss:$9 sm:$0xff] %v1340_v61  ;;  %v5185_v56 = vsub.f32 %v5152_v45, %v602_v0  ;;  %v519_v61 = vpop.f32.mrf.mxu2  ;;  %v5195_v0 = vpop.xlane.xlu1 %3064 }
 0x1c9   :  { %1868 = vst [vmem:[#allocation1 + $0x2] ss:$9 sm:$0xff] %v1341_v8  ;;  %v1019_v8 = vpop.f32.mrf.mxu0 }
 0x1ca   :  { %1869 = vst [vmem:[#allocation1 + $0x3] ss:$9 sm:$0xff] %v1342_v43  ;;  %786 = vmin.index.xlane.f32.xlu2 %v5185_v56  ;;  %v1347_v43 = vperm.slane %v5139_v16, 0 }
 0x1cb   :  { %1870 = vst [vmem:[#allocation1 + $0x4] ss:$9 sm:$0xff] %v1343_v20  ;;  %v1348_v20 = vperm.slane %v5139_v16, 1 }
 0x1cc   :  { %6846 = vst [vmem:[#allocation64_spill] sm:$0xff] %v5185_v56 }
 0x1cd   :  { %1871 = vst [vmem:[#allocation1 + $0x5] ss:$9 sm:$0xff] %v1344_v33  ;;  %3034 = vmin.xlane.f32.xlu0 %v640_v4  ;;  %3036 = vmin.xlane.f32.xlu1 %v641_v23  ;;  %v1356_v23 = vperm.slane %v5141_v21, 1 }
 0x1ce   :  { %1872 = vst [vmem:[#allocation1 + $0x6] ss:$9 sm:$0xff] %v1345_v10  ;;  %v575_v10 = vmul.f32 2.0, %v5120_v1 }
 0x1cf   :  { %1873 = vst [vmem:[#allocation1 + $0x7] ss:$9 sm:$0xff] %v1346_v22  ;;  %v5202_v22 = vpop.xlane.xlu0 %758 }
 0x1d0   :  { %1211 = vst.msk [vmem:[%s6726_s3] sm:$0xff] %vm99_vm0, %v1019_v8  ;;  %v1351_v8 = vperm.slane %v5139_v16, 4  ;;  %vm849_vm14 = vcmp.eq.s32.totalorder %v4898_v30, %v5202_v22  ;;  %v642_v1 = vsub.f32 %v5152_v45, %v575_v10  ;;  %v5216_v56 = vpop.xlane.xlu1 %760  ;;  %v1358_v10 = vperm.slane %v5141_v21, 3 }
 0x1d1   :  { %6847 = vst [vmem:[#allocation65_spill] sm:$0xff] %v5195_v0  ;;  %3911 = vmatmul.msk.f32.gmra.mxu3 %vm849_vm14, %v6816_v55  ;;  %v1353_v0 = vperm.slane %v5139_v16, 6  ;;  %vm850_vm1 = vcmp.eq.s32.totalorder %v4898_v30, %v5216_v56 }
 0x1d2   :  { %6848 = vst [vmem:[#allocation66_spill] sm:$0xff] %v5198_v35  ;;  %v603_v35 = vmul.f32 2.0, %v519_v61  ;;  %732 = vmin.index.xlane.f32.xlu2 %v642_v1 }
 0x1d3   :  { %6849 = vst [vmem:[#allocation67_spill] sm:$0xff] %v5202_v22 }
 0x1d4   :  { %6851 = vst [vmem:[#allocation69_spill] sm:$0xff] %v5216_v56  ;;  %v5222_v4 = vsub.f32 %v5152_v45, %v603_v35  ;;  %v576_v56 = vmul.f32 2.0, %v5137_v36 }
 0x1d6   :  { %v5205_v33 = vld [vmem:[#allocation1] sm:$0xff]  ;;  %788 = vmin.index.xlane.f32.xlu0 %v5222_v4 }
 0x1d7   :  { %6850 = vst [vmem:[#allocation68_spill] sm:$0xff] %v5205_v33  ;;  %v1354_v33 = vperm.slane %v5139_v16, 7  ;;  %v5233_v61 = vpop.xlane.xlu0 %3066 }
 0x1d8   :  { %1875 = vst [vmem:[#allocation1] ss:$9 sm:$0xff] %v1347_v43  ;;  %v522_v43 = vpop.f32.mrf.mxu2 }
 0x1d9   :  { %1876 = vst [vmem:[#allocation1 + $0x1] ss:$9 sm:$0xff] %v1348_v20  ;;  %v604_v22 = vmul.f32 2.0, %v522_v43  ;;  %v703_v20 = vpop.xlane.xlu2 %702  ;;  %3912 = vmatmul.msk.f32.gmra.mxu3 %vm850_vm1, %v6816_v55 }
 0x1da   :  { %1877 = vst [vmem:[#allocation1 + $0x2] ss:$9 sm:$0xff] %v1349_v48  ;;  %vm821_vm15 = vcmp.eq.s32.totalorder %v4898_v30, %v703_v20  ;;  %3038 = vmin.xlane.f32.xlu2 %v642_v1  ;;  %v1360_v48 = vperm.slane %v5141_v21, 5 }
 0x1db   :  { %1878 = vst [vmem:[#allocation1 + $0x3] ss:$9 sm:$0xff] %v1350_v3  ;;  %3883 = vmatmul.msk.f32.gmra.mxu1 %vm821_vm15, %v6816_v55  ;;  %v5226_v16 = vsub.f32 %v5152_v45, %v604_v22  ;;  %v1359_v22 = vperm.slane %v5141_v21, 4  ;;  %v1362_v3 = vperm.slane %v5141_v21, 7 }
 0x1dc   :  { %1879 = vst [vmem:[#allocation1 + $0x4] ss:$9 sm:$0xff] %v1351_v8 }
 0x1dd   :  { %1880 = vst [vmem:[#allocation1 + $0x5] ss:$9 sm:$0xff] %v1352_v39  ;;  %790 = vmin.index.xlane.f32.xlu1 %v5226_v16  ;;  %v1355_v39 = vperm.slane %v5141_v21, 0 }
 0x1de   :  { %1881 = vst [vmem:[#allocation1 + $0x6] ss:$9 sm:$0xff] %v1353_v0  ;;  %v1357_v0 = vperm.slane %v5141_v21, 2 }
 0x1df   :  { %1882 = vst [vmem:[#allocation1 + $0x7] ss:$9 sm:$0xff] %v1354_v33  ;;  %v1361_v33 = vperm.slane %v5141_v21, 6  ;;  %v5243_v43 = vpop.xlane.xlu0 %704  ;;  %v1363_v21 = vperm.slane %v703_v20, 0 }
 0x1e0   :  { %6852 = vst [vmem:[#allocation70_spill] sm:$0xff] %v5233_v61  ;;  %v525_v8 = vpop.f32.mrf.mxu2  ;;  %vm822_vm2 = vcmp.eq.s32.totalorder %v4898_v30, %v5243_v43 }
 0x1e1   :  { %v605_v1 = vmul.f32 2.0, %v525_v8  ;;  %v1368_v8 = vperm.slane %v703_v20, 5 }
 0x1e3   :  { %3884 = vmatmul.msk.f32.gmra.mxu1 %vm822_vm2, %v6816_v55 }
 0x1e6   :  { %v5236_v35 = vld [vmem:[#allocation1] sm:$0xff] }
 0x1e7   :  { %6853 = vst [vmem:[#allocation71_spill] sm:$0xff] %v5236_v35  ;;  %v1370_v35 = vperm.slane %v703_v20, 7 }
 0x1e8   :  { %1884 = vst [vmem:[#allocation1] ss:$9 sm:$0xff] %v1355_v39  ;;  %v577_v39 = vmul.f32 2.0, %v5171_v6  ;;  %v528_v61 = vpop.f32.mrf.mxu2 }
 0x1e9   :  { %1885 = vst [vmem:[#allocation1 + $0x1] ss:$9 sm:$0xff] %v1356_v23  ;;  %v5250_v23 = vsub.f32 %v5152_v45, %v605_v1  ;;  %v1369_v1 = vperm.slane %v703_v20, 6 }
 0x1ea   :  { %1886 = vst [vmem:[#allocation1 + $0x2] ss:$9 sm:$0xff] %v1357_v0  ;;  %v1364_v0 = vperm.slane %v703_v20, 1  ;;  %v644_v36 = vsub.f32 %v5152_v45, %v577_v39  ;;  %v1022_v39 = vpop.f32.mrf.mxu0 }
 0x1eb   :  { %1887 = vst [vmem:[#allocation1 + $0x3] ss:$9 sm:$0xff] %v1358_v10  ;;  %792 = vmin.index.xlane.f32.xlu2 %v5250_v23  ;;  %v1365_v10 = vperm.slane %v703_v20, 2 }
 0x1ec   :  { %1888 = vst [vmem:[#allocation1 + $0x4] ss:$9 sm:$0xff] %v1359_v22  ;;  %v5254_v22 = vpop.xlane.xlu2 %3008  ;;  %736 = vmin.index.xlane.f32.xlu1 %v644_v36 }
 0x1ed   :  { %1889 = vst [vmem:[#allocation1 + $0x5] ss:$9 sm:$0xff] %v1360_v48  ;;  %v643_v48 = vsub.f32 %v5152_v45, %v576_v56 }
 0x1ee   :  { %1890 = vst [vmem:[#allocation1 + $0x6] ss:$9 sm:$0xff] %v1361_v33  ;;  %v1366_v33 = vperm.slane %v703_v20, 3 }
 0x1ef   :  { %1891 = vst [vmem:[#allocation1 + $0x7] ss:$9 sm:$0xff] %v1362_v3  ;;  %v1367_v3 = vperm.slane %v703_v20, 4  ;;  %734 = vmin.index.xlane.f32.xlu0 %v643_v48  ;;  %v5269_v20 = vpop.xlane.xlu0 %3010 }
 0x1f0   :  { %1212 = vst.msk [vmem:[%s6726_s3 + $0x8] sm:$0xff] %vm99_vm0, %v1022_v39  ;;  %v1377_v39 = vperm.slane %v5243_v43, 6 }
 0x1f3   :  { %3068 = vmin.xlane.f32.xlu2 %v4934_v29  ;;  %v1371_v29 = vperm.slane %v5243_v43, 0 }
 0x1f4   :  { %v5261_v56 = vpop.xlane.xlu2 %762  ;;  %3042 = vmin.xlane.f32.xlu1 %v644_v36  ;;  %v1375_v36 = vperm.slane %v5243_v43, 4 }
 0x1f5   :  { %6855 = vst [vmem:[#allocation73_spill] sm:$0xff] %v5261_v56  ;;  %vm851_vm4 = vcmp.eq.s32.totalorder %v4898_v30, %v5261_v56  ;;  %v606_v56 = vmul.f32 2.0, %v528_v61 }
 0x1f6   :  { %v5258_v6 = vld [vmem:[#allocation1] sm:$0xff]  ;;  %3913 = vmatmul.msk.f32.gmra.mxu3 %vm851_vm4, %v6816_v55 }
 0x1f7   :  { %6854 = vst [vmem:[#allocation72_spill] sm:$0xff] %v5258_v6  ;;  %3040 = vmin.xlane.f32.xlu0 %v643_v48  ;;  %v1374_v48 = vperm.slane %v5243_v43, 3  ;;  %v1378_v6 = vperm.slane %v5243_v43, 7  ;;  %v5303_v61 = vsub.f32 %v5152_v45, %v606_v56 }
 0x1f8   :  { %1893 = vst [vmem:[#allocation1] ss:$9 sm:$0xff] %v1363_v21  ;;  %v5263_v21 = vpop.xlane.xlu1 %706 }
 0x1f9   :  { %1894 = vst [vmem:[#allocation1 + $0x1] ss:$9 sm:$0xff] %v1364_v0  ;;  %vm823_vm3 = vcmp.eq.s32.totalorder %v4898_v30, %v5263_v21  ;;  %v1373_v0 = vperm.slane %v5243_v43, 2 }
 0x1fa   :  { %1895 = vst [vmem:[#allocation1 + $0x2] ss:$9 sm:$0xff] %v1365_v10  ;;  %3885 = vmatmul.msk.f32.gmra.mxu1 %vm823_vm3, %v6816_v55 }
 0x1fb   :  { %1896 = vst [vmem:[#allocation1 + $0x3] ss:$9 sm:$0xff] %v1366_v33  ;;  %v531_v33 = vpop.f32.mrf.mxu2 }
 0x1fc   :  { %1897 = vst [vmem:[#allocation1 + $0x4] ss:$9 sm:$0xff] %v1367_v3  ;;  %v1376_v3 = vperm.slane %v5243_v43, 5  ;;  %3070 = vmin.xlane.f32.xlu1 %v4973_v25 }
 0x1fd   :  { %1898 = vst [vmem:[#allocation1 + $0x5] ss:$9 sm:$0xff] %v1368_v8  ;;  %v4010_v8 = vld [vmem:[%s6723_s0 + $0x158] sm:$0xff] }
 0x1fe   :  { %1899 = vst [vmem:[#allocation1 + $0x6] ss:$9 sm:$0xff] %v1369_v1  ;;  %v2773_v1 = vmul.f32 %v4010_v8, %v4010_v8  ;;  %v1381_v8 = vperm.slane %v5263_v21, 2 }
 0x1ff   :  { %1900 = vst [vmem:[#allocation1 + $0x7] ss:$9 sm:$0xff] %v1370_v35  ;;  %v1372_v35 = vperm.slane %v5243_v43, 1  ;;  %794 = vmin.index.xlane.f32.xlu0 %v5303_v61 }
 0x200   :  { %v2923_v25 = vsel %vm99_vm0, %v2773_v1, 0.0 }
 0x201   :  { %2924 = vadd.xlane.f32.xlu2 %v2923_v25  ;;  %v1383_v25 = vperm.slane %v5263_v21, 4 }
 0x203   :  { %v534_v43 = vpop.f32.mrf.mxu2 }
 0x206   :  { %v5280_v10 = vld [vmem:[#allocation1] sm:$0xff] }
 0x207   :  { %6856 = vst [vmem:[#allocation74_spill] sm:$0xff] %v5280_v10  ;;  %v5290_v10 = vpop.xlane.xlu0 %764 }
 0x208   :  { %1902 = vst [vmem:[#allocation1] ss:$9 sm:$0xff] %v1371_v29  ;;  %v5293_v29 = vpop.xlane.xlu2 %708  ;;  %vm852_vm6 = vcmp.eq.s32.totalorder %v4898_v30, %v5290_v10 }
 0x209   :  { %1903 = vst [vmem:[#allocation1 + $0x1] ss:$9 sm:$0xff] %v1372_v35  ;;  %v1025_v35 = vpop.f32.mrf.mxu1  ;;  %vm824_vm5 = vcmp.eq.s32.totalorder %v4898_v30, %v5293_v29  ;;  %3914 = vmatmul.msk.f32.gmra.mxu3 %vm852_vm6, %v6816_v55 }
 0x20a   :  { %1904 = vst [vmem:[#allocation1 + $0x2] ss:$9 sm:$0xff] %v1373_v0  ;;  %3886 = vmatmul.msk.f32.gmra.mxu1 %vm824_vm5, %v6816_v55  ;;  %v608_v0 = vmul.f32 2.0, %v534_v43  ;;  %v1385_v43 = vperm.slane %v5263_v21, 6 }
 0x20b   :  { %6857 = vst [vmem:[#allocation75_spill] sm:$0xff] %v5290_v10  ;;  %v1394_v10 = vperm.slane %v5293_v29, 7 }
 0x20c   :  { %1905 = vst [vmem:[#allocation1 + $0x3] ss:$9 sm:$0xff] %v1374_v48  ;;  %v1379_v48 = vperm.slane %v5263_v21, 0 }
 0x20d   :  { %1906 = vst [vmem:[#allocation1 + $0x4] ss:$9 sm:$0xff] %v1375_v36  ;;  %v607_v36 = vmul.f32 2.0, %v531_v33  ;;  %v1384_v33 = vperm.slane %v5263_v21, 5 }
 0x20e   :  { %1907 = vst [vmem:[#allocation1 + $0x5] ss:$9 sm:$0xff] %v1376_v3  ;;  %v1380_v3 = vperm.slane %v5263_v21, 1 }
 0x20f   :  { %1908 = vst [vmem:[#allocation1 + $0x6] ss:$9 sm:$0xff] %v1377_v39  ;;  %v5314_v56 = vsub.f32 %v5152_v45, %v607_v36  ;;  %v1382_v39 = vperm.slane %v5263_v21, 3 }
 0x210   :  { %1909 = vst [vmem:[#allocation1 + $0x7] ss:$9 sm:$0xff] %v1378_v6  ;;  %v5317_v6 = vsub.f32 %v5152_v45, %v608_v0  ;;  %v1386_v45 = vperm.slane %v5263_v21, 7  ;;  %v5330_v0 = vpop.xlane.xlu0 %710  ;;  %v1387_v21 = vperm.slane %v5293_v29, 0 }
 0x211   :  { %1213 = vst.msk [vmem:[%s6726_s3 + $0x10] sm:$0xff] %vm99_vm0, %v1025_v35  ;;  %v5322_v35 = vpop.xlane.xlu1 %3012  ;;  %796 = vmin.index.xlane.f32.xlu1 %v5314_v56  ;;  %vm825_vm7 = vcmp.eq.s32.totalorder %v4898_v30, %v5330_v0 }
 0x212   :  { %798 = vmin.index.xlane.f32.xlu2 %v5317_v6  ;;  %3887 = vmatmul.msk.f32.gmra.mxu1 %vm825_vm7, %v6816_v55 }
 0x217   :  { %v5319_v1 = vld [vmem:[#allocation1] sm:$0xff] }
 0x218   :  { %1911 = vst [vmem:[#allocation1] ss:$9 sm:$0xff] %v1379_v48  ;;  %v4011_v48 = vld [vmem:[%s6723_s0 + $0x150] sm:$0xff] }
 0x219   :  { %1912 = vst [vmem:[#allocation1 + $0x1] ss:$9 sm:$0xff] %v1380_v3  ;;  %v2772_v36 = vmul.f32 %v4011_v48, %v4011_v48  ;;  %v5336_v3 = vpop.xlane.xlu1 %766  ;;  %v1392_v48 = vperm.slane %v5293_v29, 5 }
 0x21a   :  { %1913 = vst [vmem:[#allocation1 + $0x2] ss:$9 sm:$0xff] %v1381_v8  ;;  %3074 = vmin.xlane.f32.xlu2 %v4991_v28  ;;  %vm853_vm8 = vcmp.eq.s32.totalorder %v4898_v30, %v5336_v3  ;;  %v1388_v28 = vperm.slane %v5293_v29, 1  ;;  %v1389_v8 = vperm.slane %v5293_v29, 2 }
 0x21b   :  { %1914 = vst [vmem:[#allocation1 + $0x3] ss:$9 sm:$0xff] %v1382_v39  ;;  %3915 = vmatmul.msk.f32.gmra.mxu3 %vm853_vm8, %v6816_v55  ;;  %v5347_v39 = vpop.xlane.xlu2 %3014 }
 0x21c   :  { %1915 = vst [vmem:[#allocation1 + $0x4] ss:$9 sm:$0xff] %v1383_v25  ;;  %v2920_v25 = vsel %vm99_vm0, %v2772_v36, 0.0 }
 0x21d   :  { %1916 = vst [vmem:[#allocation1 + $0x5] ss:$9 sm:$0xff] %v1384_v33  ;;  %2921 = vadd.xlane.f32.xlu0 %v2920_v25  ;;  %v1028_v25 = vpop.f32.mrf.mxu1 }
 0x21e   :  { %1917 = vst [vmem:[#allocation1 + $0x6] ss:$9 sm:$0xff] %v1385_v43  ;;  %v1390_v43 = vperm.slane %v5293_v29, 3 }
 0x21f   :  { %1918 = vst [vmem:[#allocation1 + $0x7] ss:$9 sm:$0xff] %v1386_v45  ;;  %v1391_v45 = vperm.slane %v5293_v29, 4 }
 0x220   :  { %6858 = vst [vmem:[#allocation76_spill] sm:$0xff] %v5336_v3  ;;  %v1393_v3 = vperm.slane %v5293_v29, 6  ;;  %v5369_v29 = vpop.xlane.xlu0 %3016 }
 0x221   :  { %1214 = vst.msk [vmem:[%s6726_s3 + $0x18] sm:$0xff] %vm99_vm0, %v1028_v25  ;;  %v1398_v25 = vperm.slane %v5330_v0, 3 }
 0x223   :  { %v5358_v36 = vpop.xlane.xlu2 %768 }
 0x224   :  { %6860 = vst [vmem:[#allocation78_spill] sm:$0xff] %v5358_v36  ;;  %vm854_vm10 = vcmp.eq.s32.totalorder %v4898_v30, %v5358_v36 }
 0x225   :  { %3072 = vmin.xlane.f32.xlu0 %v4976_v32  ;;  %v3437_v32 = vadd.f32 %v4907_v52, %v4668_v37  ;;  %3916 = vmatmul.msk.f32.gmra.mxu3 %vm854_vm10, %v6816_v55  ;;  %v1396_v37 = vperm.slane %v5330_v0, 1 }
 0x226   :  { %v5350_v33 = vld [vmem:[#allocation1] sm:$0xff] }
 0x227   :  { %6859 = vst [vmem:[#allocation77_spill] sm:$0xff] %v5350_v33  ;;  %v5363_v33 = vpop.xlane.xlu1 %712  ;;  %v3566_v52 = vsel %vm6784_vm11, %v3437_v32, 0.0  ;;  %v4014_v32 = vld [vmem:[%s6723_s0 + $0x170] sm:$0xff] }
 0x228   :  { %1920 = vst [vmem:[#allocation1] ss:$9 sm:$0xff] %v1387_v21  ;;  %v4012_v21 = vld [vmem:[%s6723_s0 + $0x160] sm:$0xff]  ;;  %vm826_vm9 = vcmp.eq.s32.totalorder %v4898_v30, %v5363_v33 }
 0x229   :  { %1921 = vst [vmem:[#allocation1 + $0x1] ss:$9 sm:$0xff] %v1388_v28  ;;  %v2774_v28 = vmul.f32 %v4012_v21, %v4012_v21  ;;  %3888 = vmatmul.msk.f32.gmra.mxu1 %vm826_vm9, %v6816_v55  ;;  %v3441_v21 = vadd.f32 %v5008_v9, %v4693_v44  ;;  %v3442_v9 = vadd.f32 %v5045_v40, %v4691_v59 }
 0x22a   :  { %1922 = vst [vmem:[#allocation1 + $0x2] ss:$9 sm:$0xff] %v1389_v8  ;;  %v3439_v8 = vadd.f32 %v4931_v15, %v4683_v41  ;;  %v1399_v41 = vperm.slane %v5330_v0, 4 }
 0x22b   :  { %1923 = vst [vmem:[#allocation1 + $0x3] ss:$9 sm:$0xff] %v1390_v43  ;;  %v5412_v36 = vpop.xlane.xlu2 %714 }
 0x22c   :  { %1924 = vst [vmem:[#allocation1 + $0x4] ss:$9 sm:$0xff] %v1391_v45  ;;  %v3440_v45 = vadd.f32 %v4993_v24, %v4677_v14  ;;  %v3569_v15 = vsel %vm6784_vm11, %v3439_v8, 0.0  ;;  %v4013_v14 = vld [vmem:[%s6723_s0 + $0x168] sm:$0xff]  ;;  %v5406_v8 = vpop.xlane.xlu0 %770  ;;  %vm827_vm12 = vcmp.eq.s32.totalorder %v4898_v30, %v5412_v36 }
 0x22d   :  { %1925 = vst [vmem:[#allocation1 + $0x5] ss:$9 sm:$0xff] %v1392_v48  ;;  %v2775_v24 = vmul.f32 %v4013_v14, %v4013_v14  ;;  %vm855_vm13 = vcmp.eq.s32.totalorder %v4898_v30, %v5406_v8 }
 0x22e   :  { %1926 = vst [vmem:[#allocation1 + $0x6] ss:$9 sm:$0xff] %v1393_v3  ;;  %v1395_v3 = vperm.slane %v5330_v0, 0  ;;  %v3571_v44 = vsel %vm6784_vm11, %v3440_v45, 0.0  ;;  %3917 = vmatmul.msk.f32.gmra.mxu3 %vm855_vm13, %v6816_v55  ;;  %v1031_v45 = vpop.f32.mrf.mxu1 }
 0x22f   :  { %1927 = vst [vmem:[#allocation1 + $0x7] ss:$9 sm:$0xff] %v1394_v10  ;;  %v3438_v10 = vadd.f32 %v4909_v5, %v4681_v47  ;;  %v1397_v47 = vperm.slane %v5330_v0, 2  ;;  %v2926_v5 = vsel %vm99_vm0, %v2774_v28, 0.0  ;;  %v1400_v28 = vperm.slane %v5330_v0, 5 }
 0x230   :  { %2927 = vadd.xlane.f32.xlu1 %v2926_v5  ;;  %1215 = vst.msk [vmem:[%s6726_s3 + $0x20] sm:$0xff] %vm99_vm0, %v1031_v45  ;;  %v1412_v45 = vperm.slane %v5412_v36, 1 }
 0x231   :  { %v3567_v43 = vsel %vm6784_vm11, %v3438_v10, 0.0  ;;  %v2776_v10 = vmul.f32 %v4014_v32, %v4014_v32  ;;  %v3573_v32 = vsel %vm6784_vm11, %v3441_v21, 0.0  ;;  %3889 = vmatmul.msk.f32.gmra.mxu1 %vm827_vm12, %v6816_v55  ;;  %v1403_v21 = vperm.slane %v5363_v33, 0 }
 0x232   :  { %v3568_v5 = vadd.f32 %v3567_v43, %v3566_v52  ;;  %v3443_v52 = vadd.f32 %v5078_v11, %v4703_v49  ;;  %v5428_v43 = vpop.xlane.xlu1 %3018 }
 0x233   :  { %v2932_v40 = vsel %vm99_vm0, %v2776_v10, 0.0  ;;  %v1405_v10 = vperm.slane %v5363_v33, 2 }
 0x234   :  { %v3570_v14 = vadd.f32 %v3569_v15, %v3568_v5  ;;  %2933 = vadd.xlane.f32.xlu2 %v2932_v40  ;;  %v3577_v11 = vsel %vm6784_vm11, %v3443_v52, 0.0  ;;  %v3445_v15 = vadd.f32 %v5135_v62, %v4709_v54  ;;  %v1407_v54 = vperm.slane %v5363_v33, 4  ;;  %v5463_v40 = vpop.xlane.xlu0 %716 }
 0x235   :  { %vm828_vm14 = vcmp.eq.s32.totalorder %v4898_v30, %v5463_v40 }
 0x236   :  { %v5391_v48 = vld [vmem:[#allocation1] sm:$0xff]  ;;  %v3572_v59 = vadd.f32 %v3571_v44, %v3570_v14  ;;  %v1410_v14 = vperm.slane %v5363_v33, 7 }
 0x237   :  { %1929 = vst [vmem:[#allocation1] ss:$9 sm:$0xff] %v1395_v3  ;;  %v1401_v3 = vperm.slane %v5330_v0, 6 }
 0x238   :  { %1930 = vst [vmem:[#allocation1 + $0x1] ss:$9 sm:$0xff] %v1396_v37  ;;  %v1402_v37 = vperm.slane %v5330_v0, 7  ;;  %v2929_v0 = vsel %vm99_vm0, %v2775_v24, 0.0  ;;  %v3574_v49 = vadd.f32 %v3573_v32, %v3572_v59  ;;  %3076 = vmin.xlane.f32.xlu1 %v5019_v12  ;;  %v3446_v24 = vadd.f32 %v5174_v46, %v4718_v2 }
 0x239   :  { %1931 = vst [vmem:[#allocation1 + $0x2] ss:$9 sm:$0xff] %v1397_v47  ;;  %v3575_v47 = vsel %vm6784_vm11, %v3442_v9, 0.0  ;;  %2930 = vadd.xlane.f32.xlu0 %v2929_v0  ;;  %v1408_v2 = vperm.slane %v5363_v33, 5  ;;  %v1409_v9 = vperm.slane %v5363_v33, 6  ;;  %v3447_v32 = vadd.f32 %v5176_v17, %v4731_v7  ;;  %3890 = vmatmul.msk.f32.gmra.mxu1 %vm828_vm14, %v6816_v55 }
 0x23a   :  { %1932 = vst [vmem:[#allocation1 + $0x3] ss:$9 sm:$0xff] %v1398_v25  ;;  %v3576_v25 = vadd.f32 %v3575_v47, %v3574_v49  ;;  %v3583_v46 = vsel %vm6784_vm11, %v3446_v24, 0.0  ;;  %v3449_v59 = vadd.f32 %v5269_v20, %v4739_v18  ;;  %v1411_v20 = vperm.slane %v5412_v36, 0 }
 0x23b   :  { %1933 = vst [vmem:[#allocation1 + $0x4] ss:$9 sm:$0xff] %v1399_v41  ;;  %v3444_v41 = vadd.f32 %v5080_v63, %v4714_v60  ;;  %v3581_v60 = vsel %vm6784_vm11, %v3445_v15, 0.0  ;;  %v3021_v63 = vpop.xlane.xlu2 %3020  ;;  %v3450_v49 = vadd.f32 %v5322_v35, %v4752_v27  ;;  %v1415_v27 = vperm.slane %v5412_v36, 4 }
 0x23c   :  { %1934 = vst [vmem:[#allocation1 + $0x5] ss:$9 sm:$0xff] %v1400_v28  ;;  %v3578_v12 = vadd.f32 %v3577_v11, %v3576_v25  ;;  %v1404_v28 = vperm.slane %v5363_v33, 1  ;;  %3080 = vmin.xlane.f32.xlu2 %v5036_v50  ;;  %v3448_v50 = vadd.f32 %v5254_v22, %v4726_v19  ;;  %v4015_v19 = vld [vmem:[%s6723_s0 + $0x178] sm:$0xff]  ;;  %v3589_v22 = vsel %vm6784_vm11, %v3449_v59, 0.0 }
 0x23d   :  { %1935 = vst [vmem:[#allocation1 + $0x6] ss:$9 sm:$0xff] %v1401_v3  ;;  %v1406_v3 = vperm.slane %v5363_v33, 3  ;;  %v3579_v44 = vsel %vm6784_vm11, %v3444_v41, 0.0  ;;  %v3585_v33 = vsel %vm6784_vm11, %v3447_v32, 0.0  ;;  %v2777_v7 = vmul.f32 %v4015_v19, %v4015_v19 }
 0x23e   :  { %1936 = vst [vmem:[#allocation1 + $0x7] ss:$9 sm:$0xff] %v1402_v37  ;;  %v3580_v62 = vadd.f32 %v3579_v44, %v3578_v12  ;;  %v3587_v0 = vsel %vm6784_vm11, %v3448_v50, 0.0  ;;  %v3451_v11 = vadd.f32 %v5347_v39, %v4748_v26  ;;  %v1413_v41 = vperm.slane %v5412_v36, 2 }
 0x23f   :  { %v2935_v15 = vsel %vm99_vm0, %v2777_v7, 0.0  ;;  %v1414_v12 = vperm.slane %v5412_v36, 3  ;;  %v3591_v26 = vsel %vm6784_vm11, %v3450_v49, 0.0  ;;  %v1416_v39 = vperm.slane %v5412_v36, 5 }
 0x240   :  { %v3582_v37 = vadd.f32 %v3581_v60, %v3580_v62  ;;  %2936 = vadd.xlane.f32.xlu1 %v2935_v15  ;;  %v3593_v35 = vsel %vm6784_vm11, %v3451_v11, 0.0  ;;  %v1418_v44 = vperm.slane %v5412_v36, 7  ;;  %v3453_v60 = vadd.f32 %v5428_v43, %v4770_v42  ;;  %v4018_v15 = vld [vmem:[%s6723_s0 + $0x190] sm:$0xff] }
 0x241   :  { %3078 = vmin.xlane.f32.xlu0 %v5022_v51  ;;  %v5459_v51 = vpop.xlane.xlu1 %772  ;;  %v1419_v50 = vperm.slane %v5463_v40, 0  ;;  %v1424_v11 = vperm.slane %v5463_v40, 5 }
 0x242   :  { %v3584_v52 = vadd.f32 %v3583_v46, %v3582_v37  ;;  %vm856_vm15 = vcmp.eq.s32.totalorder %v4898_v30, %v5459_v51  ;;  %v1034_v46 = vpop.f32.mrf.mxu1  ;;  %v4017_v37 = vld [vmem:[%s6723_s0 + $0x188] sm:$0xff] }
 0x243   :  { %v5471_v47 = vpop.xlane.xlu2 %774  ;;  %3918 = vmatmul.msk.f32.gmra.mxu3 %vm856_vm15, %v6816_v55  ;;  %v2779_v42 = vmul.f32 %v4017_v37, %v4017_v37  ;;  %1216 = vst.msk [vmem:[%s6726_s3 + $0x28] sm:$0xff] %vm99_vm0, %v1034_v46 }
 0x244   :  { %v3586_v17 = vadd.f32 %v3585_v33, %v3584_v52  ;;  %vm857_vm2 = vcmp.eq.s32.totalorder %v4898_v30, %v5471_v47  ;;  %v1420_v33 = vperm.slane %v5463_v40, 1 }
 0x245   :  { %v5443_v5 = vld [vmem:[#allocation1] sm:$0xff]  ;;  %v2941_v19 = vsel %vm99_vm0, %v2779_v42, 0.0  ;;  %v4019_v42 = vld [vmem:[%s6723_s0 + $0x198] sm:$0xff] }
 0x246   :  { %1938 = vst [vmem:[#allocation1] ss:$9 sm:$0xff] %v1403_v21  ;;  %v3588_v18 = vadd.f32 %v3587_v0, %v3586_v17  ;;  %v1421_v0 = vperm.slane %v5463_v40, 2  ;;  %2942 = vadd.xlane.f32.xlu2 %v2941_v19 }
 0x247   :  { %1939 = vst [vmem:[#allocation1 + $0x1] ss:$9 sm:$0xff] %v1404_v28  ;;  %v3452_v28 = vadd.f32 %v5369_v29, %v4754_v31 }
 0x248   :  { %1940 = vst [vmem:[#allocation1 + $0x2] ss:$9 sm:$0xff] %v1405_v10  ;;  %v3590_v25 = vadd.f32 %v3589_v22, %v3588_v18  ;;  %3082 = vmin.xlane.f32.xlu1 %v5071_v34  ;;  %v3023_v34 = vpop.xlane.xlu0 %3022  ;;  %v1422_v22 = vperm.slane %v5463_v40, 3  ;;  %v1423_v18 = vperm.slane %v5463_v40, 4 }
 0x249   :  { %1941 = vst [vmem:[#allocation1 + $0x3] ss:$9 sm:$0xff] %v1406_v3  ;;  %v5492_v24 = vpop.xlane.xlu1 %718  ;;  %v1417_v3 = vperm.slane %v5412_v36, 6  ;;  %v3595_v31 = vsel %vm6784_vm11, %v3452_v28, 0.0  ;;  %v4016_v36 = vld [vmem:[%s6723_s0 + $0x180] sm:$0xff]  ;;  %v3455_v32 = vadd.f32 %v3023_v34, %v4776_v58  ;;  %v1425_v28 = vperm.slane %v5463_v40, 6 }
 0x24a   :  { %1942 = vst [vmem:[#allocation1 + $0x4] ss:$9 sm:$0xff] %v1407_v54  ;;  %v3592_v10 = vadd.f32 %v3591_v26, %v3590_v25  ;;  %v3454_v54 = vadd.f32 %v3021_v63, %v4768_v38  ;;  %v3597_v38 = vsel %vm6784_vm11, %v3453_v60, 0.0  ;;  %vm829_vm1 = vcmp.eq.s32.totalorder %v4898_v30, %v5492_v24 }
 0x24b   :  { %1943 = vst [vmem:[#allocation1 + $0x5] ss:$9 sm:$0xff] %v1408_v2  ;;  %v5504_v62 = vpop.xlane.xlu2 %720  ;;  %3891 = vmatmul.msk.f32.gmra.mxu1 %vm829_vm1, %v6816_v55  ;;  %3919 = vmatmul.msk.f32.gmra.mxu3 %vm857_vm2, %v6816_v55  ;;  %v3601_v58 = vsel %vm6784_vm11, %v3455_v32, 0.0  ;;  %v1426_v26 = vperm.slane %v5463_v40, 7  ;;  %v6861_v40 = vld [vmem:[#allocation52_spill] sm:$0xff]  ;;  %v1431_v60 = vperm.slane %v5492_v24, 4 }
 0x24c   :  { %1944 = vst [vmem:[#allocation1 + $0x6] ss:$9 sm:$0xff] %v1409_v9  ;;  %v3594_v29 = vadd.f32 %v3593_v35, %v3592_v10  ;;  %v2778_v9 = vmul.f32 %v4016_v36, %v4016_v36  ;;  %v3599_v43 = vsel %vm6784_vm11, %v3454_v54, 0.0  ;;  %vm830_vm3 = vcmp.eq.s32.totalorder %v4898_v30, %v5504_v62 }
 0x24d   :  { %1945 = vst [vmem:[#allocation1 + $0x7] ss:$9 sm:$0xff] %v1410_v14  ;;  %v1432_v54 = vperm.slane %v5492_v24, 5  ;;  %v1433_v46 = vperm.slane %v5492_v24, 6  ;;  %v1434_v36 = vperm.slane %v5492_v24, 7  ;;  %v1437_v32 = vperm.slane %v5504_v62, 2 }
 0x24e   :  { %v3596_v2 = vadd.f32 %v3595_v31, %v3594_v29  ;;  %v2938_v7 = vsel %vm99_vm0, %v2778_v9, 0.0  ;;  %3086 = vmin.xlane.f32.xlu2 %v5096_v13  ;;  %v1429_v13 = vperm.slane %v5492_v24, 2  ;;  %v1430_v29 = vperm.slane %v5492_v24, 3 }
 0x24f   :  { %2939 = vadd.xlane.f32.xlu0 %v2938_v7  ;;  %v1440_v19 = vperm.slane %v5504_v62, 5  ;;  %v1441_v7 = vperm.slane %v5504_v62, 6 }
 0x250   :  { %v3598_v14 = vadd.f32 %v3597_v38, %v3596_v2  ;;  %v6862_v2 = vld [vmem:[#allocation60_spill] sm:$0xff]  ;;  %v2781_v38 = vmul.f32 %v4019_v42, %v4019_v42 }
 0x251   :  { %v3025_v63 = vpop.xlane.xlu1 %3024 }
 0x252   :  { %v3456_v52 = vadd.f32 %v3025_v63, %v4786_v57  ;;  %v3600_v59 = vadd.f32 %v3599_v43, %v3598_v14  ;;  %v4020_v43 = vld [vmem:[%s6723_s0 + $0x1a0] sm:$0xff]  ;;  %v1435_v63 = vperm.slane %v5504_v62, 0  ;;  %v1436_v14 = vperm.slane %v5504_v62, 1 }
 0x253   :  { %v3027_v49 = vpop.xlane.xlu2 %3026  ;;  %3892 = vmatmul.msk.f32.gmra.mxu1 %vm830_vm3, %v6816_v55  ;;  %v2782_v34 = vmul.f32 %v4020_v43, %v4020_v43  ;;  %v4022_v43 = vld [vmem:[%s6723_s0 + $0x1b8] sm:$0xff] }
 0x254   :  { %v5487_v21 = vld [vmem:[#allocation1] sm:$0xff]  ;;  %v3602_v57 = vadd.f32 %v3601_v58, %v3600_v59  ;;  %v3457_v25 = vadd.f32 %v3027_v49, %v4781_v53  ;;  %v1439_v58 = vperm.slane %v5504_v62, 4 }
 0x255   :  { %1947 = vst [vmem:[#allocation1] ss:$9 sm:$0xff] %v1411_v20  ;;  %v3603_v20 = vsel %vm6784_vm11, %v3456_v52, 0.0  ;;  %v2947_v52 = vsel %vm99_vm0, %v2781_v38, 0.0 }
 0x256   :  { %1948 = vst [vmem:[#allocation1 + $0x1] ss:$9 sm:$0xff] %v1412_v45  ;;  %v3604_v45 = vadd.f32 %v3603_v20, %v3602_v57  ;;  %v3605_v35 = vsel %vm6784_vm11, %v3457_v25, 0.0  ;;  %v6864_v20 = vld [vmem:[#allocation61_spill] sm:$0xff] }
 0x257   :  { %1949 = vst [vmem:[#allocation1 + $0x2] ss:$9 sm:$0xff] %v1413_v41  ;;  %v1037_v41 = vpop.f32.mrf.mxu1  ;;  %3084 = vmin.xlane.f32.xlu0 %v6861_v40 }
 0x258   :  { %1950 = vst [vmem:[#allocation1 + $0x3] ss:$9 sm:$0xff] %v1414_v12  ;;  %v2780_v12 = vmul.f32 %v4018_v15, %v4018_v15 }
 0x259   :  { %1951 = vst [vmem:[#allocation1 + $0x4] ss:$9 sm:$0xff] %v1415_v27  ;;  %v5544_v27 = vpop.xlane.xlu0 %776  ;;  %v5578_v9 = vpop.xlane.xlu1 %778 }
 0x25a   :  { %1952 = vst [vmem:[#allocation1 + $0x5] ss:$9 sm:$0xff] %v1416_v39  ;;  %v5548_v39 = vadd.f32 %v3605_v35, %v3604_v45  ;;  %vm858_vm4 = vcmp.eq.s32.totalorder %v4898_v30, %v5544_v27  ;;  %v2944_v53 = vsel %vm99_vm0, %v2780_v12, 0.0  ;;  %vm859_vm6 = vcmp.eq.s32.totalorder %v4898_v30, %v5578_v9  ;;  %v6865_v45 = vld [vmem:[#allocation8_spill] sm:$0xff] }
 0x25b   :  { %1953 = vst [vmem:[#allocation1 + $0x6] ss:$9 sm:$0xff] %v1417_v3  ;;  %3920 = vmatmul.msk.f32.gmra.mxu3 %vm858_vm4, %v6816_v55  ;;  %2945 = vadd.xlane.f32.xlu1 %v2944_v53  ;;  %v1427_v3 = vperm.slane %v5492_v24, 0  ;;  %v4021_v35 = vld [vmem:[%s6723_s0 + $0x1a8] sm:$0xff] }
 0x25c   :  { %1954 = vst [vmem:[#allocation1 + $0x7] ss:$9 sm:$0xff] %v1418_v44  ;;  %v1428_v44 = vperm.slane %v5492_v24, 1  ;;  %v5588_v24 = vpop.xlane.xlu2 %780  ;;  %v2783_v53 = vmul.f32 %v4021_v35, %v4021_v35 }
 0x25d   :  { %1217 = vst.msk [vmem:[%s6726_s3 + $0x30] sm:$0xff] %vm99_vm0, %v1037_v41  ;;  %vm860_vm8 = vcmp.eq.s32.totalorder %v4898_v30, %v5588_v24  ;;  %v6866_v41 = vld [vmem:[#allocation11_spill] sm:$0xff] }
 0x25f   :  { %v1040_v10 = vpop.f32.mrf.mxu1  ;;  %2948 = vadd.xlane.f32.xlu0 %v2947_v52 }
 0x260   :  { %1218 = vst.msk [vmem:[%s6726_s3 + $0x38] sm:$0xff] %vm99_vm0, %v1040_v10 }
 0x261   :  { %v5580_v37 = vpop.xlane.xlu0 %722 }
 0x262   :  { %vm831_vm5 = vcmp.eq.s32.totalorder %v4898_v30, %v5580_v37  ;;  %v1444_v12 = vperm.slane %v5580_v37, 1  ;;  %v1446_v10 = vperm.slane %v5580_v37, 3  ;;  %v1449_v38 = vperm.slane %v5580_v37, 6 }
 0x263   :  { %v5533_v17 = vld [vmem:[#allocation1] sm:$0xff]  ;;  %3088 = vmin.xlane.f32.xlu1 %v6862_v2  ;;  %3893 = vmatmul.msk.f32.gmra.mxu1 %vm831_vm5, %v6816_v55 }
 0x264   :  { %1956 = vst [vmem:[#allocation1] ss:$9 sm:$0xff] %v1419_v50  ;;  %3921 = vmatmul.msk.f32.gmra.mxu3 %vm859_vm6, %v6816_v55  ;;  %v2950_v50 = vsel %vm99_vm0, %v2782_v34, 0.0  ;;  %v5610_v57 = vpop.xlane.xlu2 %726  ;;  %v2785_v34 = vmul.f32 %v4022_v43, %v4022_v43 }
 0x265   :  { %1957 = vst [vmem:[#allocation1 + $0x1] ss:$9 sm:$0xff] %v1420_v33  ;;  %v1438_v33 = vperm.slane %v5504_v62, 3  ;;  %2951 = vadd.xlane.f32.xlu2 %v2950_v50  ;;  %vm833_vm9 = vcmp.eq.s32.totalorder %v4898_v30, %v5610_v57  ;;  %v4023_v50 = vld [vmem:[%s6723_s0 + $0x1b0] sm:$0xff]  ;;  %v1462_v35 = vperm.slane %v5610_v57, 3 }
 0x266   :  { %1958 = vst [vmem:[#allocation1 + $0x2] ss:$9 sm:$0xff] %v1421_v0  ;;  %v5604_v0 = vpop.xlane.xlu1 %724  ;;  %v2784_v52 = vmul.f32 %v4023_v50, %v4023_v50 }
 0x267   :  { %1959 = vst [vmem:[#allocation1 + $0x3] ss:$9 sm:$0xff] %v1422_v22  ;;  %v1442_v22 = vperm.slane %v5504_v62, 7  ;;  %3090 = vmin.xlane.f32.xlu0 %v6864_v20  ;;  %vm832_vm7 = vcmp.eq.s32.totalorder %v4898_v30, %v5604_v0  ;;  %v1443_v62 = vperm.slane %v5580_v37, 0  ;;  %v1043_v42 = vpop.f32.mrf.mxu1 }
 0x268   :  { %1960 = vst [vmem:[#allocation1 + $0x4] ss:$9 sm:$0xff] %v1423_v18  ;;  %v6863_v18 = vld [vmem:[#allocation64_spill] sm:$0xff] }
 0x269   :  { %1961 = vst [vmem:[#allocation1 + $0x5] ss:$9 sm:$0xff] %v1424_v11  ;;  %v3029_v49 = vpop.xlane.xlu0 %3028 }
 0x26a   :  { %1962 = vst [vmem:[#allocation1 + $0x6] ss:$9 sm:$0xff] %v1425_v28  ;;  %v3458_v25 = vadd.f32 %v3029_v49, %v6865_v45  ;;  %v1445_v28 = vperm.slane %v5580_v37, 2  ;;  %v1454_v49 = vperm.slane %v5604_v0, 3  ;;  %v1457_v45 = vperm.slane %v5604_v0, 6 }
 0x26b   :  { %1963 = vst [vmem:[#allocation1 + $0x7] ss:$9 sm:$0xff] %v1426_v26  ;;  %3894 = vmatmul.msk.f32.gmra.mxu1 %vm832_vm7, %v6816_v55 }
 0x26c   :  { %3922 = vmatmul.msk.f32.gmra.mxu3 %vm860_vm8, %v6816_v55  ;;  %v3607_v26 = vsel %vm6784_vm11, %v3458_v25, 0.0  ;;  %1219 = vst.msk [vmem:[%s6726_s3 + $0x40] sm:$0xff] %vm99_vm0, %v1043_v42  ;;  %v1458_v25 = vperm.slane %v5604_v0, 7  ;;  %v6871_v42 = vld [vmem:[#allocation12_spill] sm:$0xff] }
 0x26d   :  { %3092 = vmin.xlane.f32.xlu2 %v6863_v18  ;;  %v1453_v18 = vperm.slane %v5604_v0, 2 }
 0x26e   :  { %v3031_v11 = vpop.xlane.xlu1 %3030 }
 0x26f   :  { %v3459_v15 = vadd.f32 %v3031_v11, %v6866_v41  ;;  %v1455_v11 = vperm.slane %v5604_v0, 4 }
 0x272   :  { %v5570_v31 = vld [vmem:[#allocation1] sm:$0xff] }
 0x273   :  { %1965 = vst [vmem:[#allocation1] ss:$9 sm:$0xff] %v1427_v3  ;;  %v3608_v3 = vadd.f32 %v3607_v26, %v5548_v39  ;;  %v5639_v39 = vpop.xlane.xlu0 %782  ;;  %3895 = vmatmul.msk.f32.gmra.mxu1 %vm833_vm9, %v6816_v55 }
 0x274   :  { %1966 = vst [vmem:[#allocation1 + $0x1] ss:$9 sm:$0xff] %v1428_v44  ;;  %v1447_v44 = vperm.slane %v5580_v37, 4  ;;  %vm861_vm10 = vcmp.eq.s32.totalorder %v4898_v30, %v5639_v39 }
 0x275   :  { %1967 = vst [vmem:[#allocation1 + $0x2] ss:$9 sm:$0xff] %v1429_v13  ;;  %v3609_v13 = vsel %vm6784_vm11, %v3459_v15, 0.0  ;;  %3923 = vmatmul.msk.f32.gmra.mxu3 %vm861_vm10, %v6816_v55  ;;  %v1461_v15 = vperm.slane %v5610_v57, 2 }
 0x276   :  { %1968 = vst [vmem:[#allocation1 + $0x3] ss:$9 sm:$0xff] %v1430_v29  ;;  %v2953_v29 = vsel %vm99_vm0, %v2783_v53, 0.0  ;;  %v3610_v2 = vadd.f32 %v3609_v13, %v3608_v3  ;;  %v1465_v13 = vperm.slane %v5610_v57, 6 }
 0x277   :  { %1969 = vst [vmem:[#allocation1 + $0x4] ss:$9 sm:$0xff] %v1431_v60  ;;  %v3033_v60 = vpop.xlane.xlu2 %3032  ;;  %2954 = vadd.xlane.f32.xlu1 %v2953_v29  ;;  %v1466_v29 = vperm.slane %v5610_v57, 7 }
 0x278   :  { %1970 = vst [vmem:[#allocation1 + $0x5] ss:$9 sm:$0xff] %v1432_v54  ;;  %v1448_v54 = vperm.slane %v5580_v37, 5 }
 0x279   :  { %1971 = vst [vmem:[#allocation1 + $0x6] ss:$9 sm:$0xff] %v1433_v46  ;;  %v6867_v46 = vld [vmem:[#allocation9_spill] sm:$0xff] }
 0x27a   :  { %1972 = vst [vmem:[#allocation1 + $0x7] ss:$9 sm:$0xff] %v1434_v36  ;;  %v3460_v36 = vadd.f32 %v3033_v60, %v6867_v46 }
 0x27b   :  { %6868 = vst [vmem:[#allocation52_spill] sm:$0xff] %v5639_v39  ;;  %v5686_v41 = vpop.xlane.xlu0 %728 }
 0x27c   :  { %vm834_vm12 = vcmp.eq.s32.totalorder %v4898_v30, %v5686_v41  ;;  %v1467_v43 = vperm.slane %v5686_v41, 0 }
 0x27d   :  { %3896 = vmatmul.msk.f32.gmra.mxu1 %vm834_vm12, %v6816_v55 }
 0x27f   :  { %3094 = vmin.xlane.f32.xlu1 %v5222_v4  ;;  %v1456_v4 = vperm.slane %v5604_v0, 5 }
 0x281   :  { %v5601_v59 = vld [vmem:[#allocation1] sm:$0xff] }
 0x282   :  { %1974 = vst [vmem:[#allocation1] ss:$9 sm:$0xff] %v1435_v63  ;;  %v1450_v63 = vperm.slane %v5580_v37, 7  ;;  %v2959_v37 = vsel %vm99_vm0, %v2785_v34, 0.0  ;;  %v6872_v34 = vld [vmem:[#allocation14_spill] sm:$0xff] }
 0x283   :  { %1975 = vst [vmem:[#allocation1 + $0x1] ss:$9 sm:$0xff] %v1436_v14  ;;  %v3611_v14 = vsel %vm6784_vm11, %v3460_v36, 0.0  ;;  %2960 = vadd.xlane.f32.xlu2 %v2959_v37  ;;  %v4025_v36 = vld [vmem:[%s6723_s0 + $0x1d0] sm:$0xff] }
 0x284   :  { %1976 = vst [vmem:[#allocation1 + $0x2] ss:$9 sm:$0xff] %v1437_v32  ;;  %v5646_v32 = vadd.f32 %v3611_v14, %v3610_v2  ;;  %v3035_v2 = vpop.xlane.xlu0 %3034  ;;  %v1468_v14 = vperm.slane %v5686_v41, 1 }
 0x285   :  { %1977 = vst [vmem:[#allocation1 + $0x3] ss:$9 sm:$0xff] %v1438_v33  ;;  %v1130_v33 = vpop.f32.mrf.mxu3 }
 0x286   :  { %1978 = vst [vmem:[#allocation1 + $0x4] ss:$9 sm:$0xff] %v1439_v58  ;;  %v2956_v58 = vsel %vm99_vm0, %v2784_v52, 0.0  ;;  %v4026_v52 = vld [vmem:[%s6723_s0 + $0x1c8] sm:$0xff] }
 0x287   :  { %1979 = vst [vmem:[#allocation1 + $0x5] ss:$9 sm:$0xff] %v1440_v19  ;;  %2957 = vadd.xlane.f32.xlu0 %v2956_v58  ;;  %v1046_v19 = vpop.f32.mrf.mxu1 }
 0x288   :  { %1980 = vst [vmem:[#allocation1 + $0x6] ss:$9 sm:$0xff] %v1441_v7  ;;  %v1451_v7 = vperm.slane %v5604_v0, 0 }
 0x289   :  { %1981 = vst [vmem:[#allocation1 + $0x7] ss:$9 sm:$0xff] %v1442_v22  ;;  %v1452_v22 = vperm.slane %v5604_v0, 1  ;;  %v1460_v0 = vperm.slane %v5610_v57, 1 }
 0x28a   :  { %1248 = vst.msk [vmem:[%s6726_s3 + $0x128] sm:$0xff] %vm99_vm0, %v1130_v33  ;;  %v2787_v33 = vmul.f32 %v4026_v52, %v4026_v52 }
 0x28b   :  { %1220 = vst.msk [vmem:[%s6726_s3 + $0x48] sm:$0xff] %vm99_vm0, %v1046_v19  ;;  %3098 = vmin.xlane.f32.xlu2 %v5250_v23  ;;  %v5688_v23 = vpop.xlane.xlu2 %786  ;;  %v1470_v19 = vperm.slane %v5686_v41, 3 }
 0x28c   :  { %6870 = vst [vmem:[#allocation64_spill] sm:$0xff] %v5688_v23  ;;  %vm863_vm15 = vcmp.eq.s32.totalorder %v4898_v30, %v5688_v23 }
 0x28f   :  { %3096 = vmin.xlane.f32.xlu0 %v5226_v16  ;;  %v1459_v16 = vperm.slane %v5610_v57, 0 }
 0x290   :  { %v5629_v40 = vld [vmem:[#allocation1] sm:$0xff] }
 0x291   :  { %1983 = vst [vmem:[#allocation1] ss:$9 sm:$0xff] %v1443_v62  ;;  %v5684_v62 = vpop.xlane.xlu1 %784 }
 0x292   :  { %1984 = vst [vmem:[#allocation1 + $0x1] ss:$9 sm:$0xff] %v1444_v12  ;;  %vm862_vm13 = vcmp.eq.s32.totalorder %v4898_v30, %v5684_v62  ;;  %v4024_v12 = vld [vmem:[%s6723_s0 + $0x1c0] sm:$0xff] }
 0x293   :  { %1985 = vst [vmem:[#allocation1 + $0x2] ss:$9 sm:$0xff] %v1445_v28  ;;  %3924 = vmatmul.msk.f32.gmra.mxu3 %vm862_vm13, %v6816_v55  ;;  %v2786_v28 = vmul.f32 %v4024_v12, %v4024_v12  ;;  %v5712_v60 = vpop.xlane.xlu2 %732  ;;  %v1474_v12 = vperm.slane %v5686_v41, 7 }
 0x294   :  { %1986 = vst [vmem:[#allocation1 + $0x3] ss:$9 sm:$0xff] %v1446_v10  ;;  %v1463_v10 = vperm.slane %v5610_v57, 4  ;;  %vm836_vm1 = vcmp.eq.s32.totalorder %v4898_v30, %v5712_v60  ;;  %v1490_v52 = vperm.slane %v5712_v60, 7 }
 0x295   :  { %1987 = vst [vmem:[#allocation1 + $0x4] ss:$9 sm:$0xff] %v1447_v44  ;;  %v2962_v3 = vsel %vm99_vm0, %v2786_v28, 0.0  ;;  %v1464_v44 = vperm.slane %v5610_v57, 5  ;;  %v2788_v57 = vmul.f32 %v4025_v36, %v4025_v36 }
 0x296   :  { %1988 = vst [vmem:[#allocation1 + $0x5] ss:$9 sm:$0xff] %v1448_v54  ;;  %2963 = vadd.xlane.f32.xlu1 %v2962_v3  ;;  %v1049_v54 = vpop.f32.mrf.mxu1 }
 0x297   :  { %1989 = vst [vmem:[#allocation1 + $0x6] ss:$9 sm:$0xff] %v1449_v38  ;;  %v3461_v38 = vadd.f32 %v3035_v2, %v6871_v42  ;;  %v2968_v50 = vsel %vm99_vm0, %v2788_v57, 0.0  ;;  %v6875_v42 = vld [vmem:[#allocation5_spill] sm:$0xff] }
 0x298   :  { %1990 = vst [vmem:[#allocation1 + $0x7] ss:$9 sm:$0xff] %v1450_v63  ;;  %2969 = vadd.xlane.f32.xlu2 %v2968_v50  ;;  %v1489_v50 = vperm.slane %v5712_v60, 6 }
 0x299   :  { %6869 = vst [vmem:[#allocation60_spill] sm:$0xff] %v5684_v62  ;;  %v5705_v53 = vpop.xlane.xlu1 %730  ;;  %v3613_v37 = vsel %vm6784_vm11, %v3461_v38, 0.0  ;;  %v4059_v62 = vmov 0  }
 0x29a   :  { %1221 = vst.msk [vmem:[%s6726_s3 + $0x50] sm:$0xff] %vm99_vm0, %v1049_v54  ;;  %vm835_vm14 = vcmp.eq.s32.totalorder %v4898_v30, %v5705_v53  ;;  %v1477_v54 = vperm.slane %v5705_v53, 2  ;;  %v1479_v36 = vperm.slane %v5705_v53, 4  ;;  %v1481_v57 = vperm.slane %v5705_v53, 6  ;;  %4005 = vset.pattern.permute.xlu0 %v4059_v62  ;;  %4007 = vset.pattern.permute.xlu2 %v4059_v62 }
 0x29b   :  { %3897 = vmatmul.msk.f32.gmra.mxu1 %vm835_vm14, %v6816_v55  ;;  %3925 = vmatmul.msk.f32.gmra.mxu3 %vm863_vm15, %v6816_v55  ;;  %v1482_v38 = vperm.slane %v5705_v53, 7 }
 0x29c   :  { %4006 = vset.pattern.permute.xlu1 %v4059_v62 }
 0x29e   :  { %3100 = vmin.xlane.f32.xlu1 %v5303_v61  ;;  %v1469_v61 = vperm.slane %v5686_v41, 2 }
 0x29f   :  { %v5675_v20 = vld [vmem:[#allocation1] sm:$0xff] }
 0x2a0   :  { %1992 = vst [vmem:[#allocation1] ss:$9 sm:$0xff] %v1451_v7  ;;  %v3614_v7 = vadd.f32 %v3613_v37, %v5646_v32  ;;  %v5748_v32 = vpop.xlane.xlu0 %788  ;;  %3104 = vmin.xlane.f32.xlu2 %v5317_v6  ;;  %v1475_v6 = vperm.slane %v5705_v53, 0  ;;  %v1487_v37 = vperm.slane %v5712_v60, 4 }
 0x2a1   :  { %1993 = vst [vmem:[#allocation1 + $0x1] ss:$9 sm:$0xff] %v1452_v22  ;;  %v3037_v46 = vpop.xlane.xlu1 %3036  ;;  %v1133_v22 = vpop.f32.mrf.mxu3  ;;  %vm864_vm2 = vcmp.eq.s32.totalorder %v4898_v30, %v5748_v32 }
 0x2a2   :  { %1994 = vst [vmem:[#allocation1 + $0x2] ss:$9 sm:$0xff] %v1453_v18  ;;  %v3462_v63 = vadd.f32 %v3037_v46, %v6872_v34  ;;  %v1471_v18 = vperm.slane %v5686_v41, 4  ;;  %v1478_v46 = vperm.slane %v5705_v53, 3  ;;  %v1484_v34 = vperm.slane %v5712_v60, 1 }
 0x2a3   :  { %1995 = vst [vmem:[#allocation1 + $0x3] ss:$9 sm:$0xff] %v1454_v49  ;;  %3898 = vmatmul.msk.f32.gmra.mxu1 %vm836_vm1, %v6816_v55  ;;  %3926 = vmatmul.msk.f32.gmra.mxu3 %vm864_vm2, %v6816_v55 }
 0x2a4   :  { %1996 = vst [vmem:[#allocation1 + $0x4] ss:$9 sm:$0xff] %v1455_v11  ;;  %v3615_v49 = vsel %vm6784_vm11, %v3462_v63, 0.0  ;;  %v2965_v11 = vsel %vm99_vm0, %v2787_v33, 0.0  ;;  %v1485_v63 = vperm.slane %v5712_v60, 2 }
 0x2a5   :  { %1997 = vst [vmem:[#allocation1 + $0x5] ss:$9 sm:$0xff] %v1456_v4  ;;  %v3039_v4 = vpop.xlane.xlu2 %3038  ;;  %2966 = vadd.xlane.f32.xlu0 %v2965_v11 }
 0x2a6   :  { %1998 = vst [vmem:[#allocation1 + $0x6] ss:$9 sm:$0xff] %v1457_v45  ;;  %v1472_v45 = vperm.slane %v5686_v41, 5 }
 0x2a7   :  { %1999 = vst [vmem:[#allocation1 + $0x7] ss:$9 sm:$0xff] %v1458_v25  ;;  %v3616_v25 = vadd.f32 %v3615_v49, %v3614_v7 }
 0x2a8   :  { %6874 = vst [vmem:[#allocation61_spill] sm:$0xff] %v5748_v32  ;;  %v5799_v33 = vpop.xlane.xlu0 %734 }
 0x2a9   :  { %v1136_v3 = vpop.f32.mrf.mxu3  ;;  %1249 = vst.msk [vmem:[%s6726_s3 + $0x130] sm:$0xff] %vm99_vm0, %v1133_v22  ;;  %v1492_v7 = vperm.slane %v5799_v33, 1  ;;  %v1493_v22 = vperm.slane %v5799_v33, 2  ;;  %v1494_v49 = vperm.slane %v5799_v33, 3  ;;  %v5807_v11 = vpop.xlane.xlu1 %790  ;;  %vm837_vm3 = vcmp.eq.s32.totalorder %v4898_v30, %v5799_v33 }
 0x2aa   :  { %1250 = vst.msk [vmem:[%s6726_s3 + $0x138] sm:$0xff] %vm99_vm0, %v1136_v3  ;;  %vm865_vm4 = vcmp.eq.s32.totalorder %v4898_v30, %v5807_v11 }
 0x2ab   :  { %6876 = vst [vmem:[#allocation8_spill] sm:$0xff] %v5807_v11  ;;  %3899 = vmatmul.msk.f32.gmra.mxu1 %vm837_vm3, %v6816_v55  ;;  %3927 = vmatmul.msk.f32.gmra.mxu3 %vm865_vm4, %v6816_v55  ;;  %v6914_v11 = vld [vmem:[#allocation70_spill] sm:$0xff] }
 0x2ad   :  { %3102 = vmin.xlane.f32.xlu0 %v5314_v56  ;;  %v1480_v56 = vperm.slane %v5705_v53, 5 }
 0x2ae   :  { %v5702_v26 = vld [vmem:[#allocation1] sm:$0xff] }
 0x2af   :  { %2001 = vst [vmem:[#allocation1] ss:$9 sm:$0xff] %v1459_v16  ;;  %v6873_v16 = vld [vmem:[#allocation13_spill] sm:$0xff] }
 0x2b0   :  { %2002 = vst [vmem:[#allocation1 + $0x1] ss:$9 sm:$0xff] %v1460_v0  ;;  %v3463_v0 = vadd.f32 %v3039_v4, %v6873_v16  ;;  %v1496_v4 = vperm.slane %v5799_v33, 5 }
 0x2b1   :  { %2003 = vst [vmem:[#allocation1 + $0x2] ss:$9 sm:$0xff] %v1461_v15  ;;  %v1473_v15 = vperm.slane %v5686_v41, 6  ;;  %v4027_v41 = vld [vmem:[%s6723_s0 + $0x1d8] sm:$0xff]  ;;  %v5813_v16 = vpop.xlane.xlu1 %736 }
 0x2b2   :  { %2004 = vst [vmem:[#allocation1 + $0x3] ss:$9 sm:$0xff] %v1462_v35  ;;  %v3617_v28 = vsel %vm6784_vm11, %v3463_v0, 0.0  ;;  %v1499_v0 = vperm.slane %v5813_v16, 0  ;;  %v1504_v3 = vperm.slane %v5813_v16, 5  ;;  %vm838_vm5 = vcmp.eq.s32.totalorder %v4898_v30, %v5813_v16 }
 0x2b3   :  { %2005 = vst [vmem:[#allocation1 + $0x4] ss:$9 sm:$0xff] %v1463_v10  ;;  %v5752_v35 = vadd.f32 %v3617_v28, %v3616_v25  ;;  %v2789_v10 = vmul.f32 %v4027_v41, %v4027_v41  ;;  %v1498_v25 = vperm.slane %v5799_v33, 7  ;;  %v1502_v41 = vperm.slane %v5813_v16, 3  ;;  %3900 = vmatmul.msk.f32.gmra.mxu1 %vm838_vm5, %v6816_v55 }
 0x2b4   :  { %2006 = vst [vmem:[#allocation1 + $0x5] ss:$9 sm:$0xff] %v1464_v44 }
 0x2b5   :  { %2007 = vst [vmem:[#allocation1 + $0x6] ss:$9 sm:$0xff] %v1465_v13  ;;  %v2971_v44 = vsel %vm99_vm0, %v2789_v10, 0.0  ;;  %v1052_v13 = vpop.f32.mrf.mxu1  ;;  %v1503_v10 = vperm.slane %v5813_v16, 4 }
 0x2b6   :  { %2008 = vst [vmem:[#allocation1 + $0x7] ss:$9 sm:$0xff] %v1466_v29  ;;  %2972 = vadd.xlane.f32.xlu1 %v2971_v44  ;;  %v1476_v29 = vperm.slane %v5705_v53, 1  ;;  %v1488_v53 = vperm.slane %v5712_v60, 5  ;;  %v1505_v44 = vperm.slane %v5813_v16, 6 }
 0x2b7   :  { %1222 = vst.msk [vmem:[%s6726_s3 + $0x58] sm:$0xff] %vm99_vm0, %v1052_v13  ;;  %v1506_v13 = vperm.slane %v5813_v16, 7 }
 0x2bd   :  { %v5738_v58 = vld [vmem:[#allocation1] sm:$0xff] }
 0x2be   :  { %2010 = vst [vmem:[#allocation1] ss:$9 sm:$0xff] %v1467_v43  ;;  %3106 = vmin.xlane.f32.xlu1 %v6875_v42  ;;  %v1483_v43 = vperm.slane %v5712_v60, 0 }
 0x2bf   :  { %2011 = vst [vmem:[#allocation1 + $0x1] ss:$9 sm:$0xff] %v1468_v14 }
 0x2c0   :  { %2012 = vst [vmem:[#allocation1 + $0x2] ss:$9 sm:$0xff] %v1469_v61  ;;  %v1486_v61 = vperm.slane %v5712_v60, 3  ;;  %v1495_v60 = vperm.slane %v5799_v33, 4 }
 0x2c1   :  { %2013 = vst [vmem:[#allocation1 + $0x3] ss:$9 sm:$0xff] %v1470_v19  ;;  %v1491_v19 = vperm.slane %v5799_v33, 0 }
 0x2c2   :  { %2014 = vst [vmem:[#allocation1 + $0x4] ss:$9 sm:$0xff] %v1471_v18 }
 0x2c3   :  { %2015 = vst [vmem:[#allocation1 + $0x5] ss:$9 sm:$0xff] %v1472_v45  ;;  %v1497_v45 = vperm.slane %v5799_v33, 6 }
 0x2c4   :  { %2016 = vst [vmem:[#allocation1 + $0x6] ss:$9 sm:$0xff] %v1473_v15  ;;  %v1500_v15 = vperm.slane %v5813_v16, 1 }
 0x2c5   :  { %2017 = vst [vmem:[#allocation1 + $0x7] ss:$9 sm:$0xff] %v1474_v12  ;;  %v1501_v12 = vperm.slane %v5813_v16, 2 }
 0x2cc   :  { %v5781_v2 = vld [vmem:[#allocation1] sm:$0xff] }
 0x2cd   :  { %2019 = vst [vmem:[#allocation1] ss:$9 sm:$0xff] %v1475_v6  ;;  %v6877_v6 = vld [vmem:[#allocation30_spill] sm:$0xff] }
 0x2ce   :  { %2020 = vst [vmem:[#allocation1 + $0x1] ss:$9 sm:$0xff] %v1476_v29  ;;  %v1507_v29 = vperm.slane %v6877_v6, 0  ;;  %v1512_v42 = vperm.slane %v6877_v6, 5  ;;  %vm839_vm7 = vcmp.eq.s32.totalorder %v4898_v30, %v6877_v6 }
 0x2cf   :  { %2021 = vst [vmem:[#allocation1 + $0x2] ss:$9 sm:$0xff] %v1477_v54  ;;  %v1508_v54 = vperm.slane %v6877_v6, 1  ;;  %3901 = vmatmul.msk.f32.gmra.mxu1 %vm839_vm7, %v6816_v55 }
 0x2d0   :  { %2022 = vst [vmem:[#allocation1 + $0x3] ss:$9 sm:$0xff] %v1478_v46 }
 0x2d1   :  { %2023 = vst [vmem:[#allocation1 + $0x4] ss:$9 sm:$0xff] %v1479_v36  ;;  %v1509_v36 = vperm.slane %v6877_v6, 2 }
 0x2d2   :  { %2024 = vst [vmem:[#allocation1 + $0x5] ss:$9 sm:$0xff] %v1480_v56  ;;  %v1510_v56 = vperm.slane %v6877_v6, 3 }
 0x2d3   :  { %2025 = vst [vmem:[#allocation1 + $0x6] ss:$9 sm:$0xff] %v1481_v57  ;;  %v1511_v57 = vperm.slane %v6877_v6, 4 }
 0x2d4   :  { %2026 = vst [vmem:[#allocation1 + $0x7] ss:$9 sm:$0xff] %v1482_v38  ;;  %v1513_v38 = vperm.slane %v6877_v6, 6 }
 0x2db   :  { %v5792_v14 = vld [vmem:[#allocation1] sm:$0xff] }
 0x2dc   :  { %2028 = vst [vmem:[#allocation1] ss:$9 sm:$0xff] %v1483_v43  ;;  %v1514_v43 = vperm.slane %v6877_v6, 7  ;;  %v6899_v6 = vld [vmem:[#allocation23_spill] sm:$0xff] }
 0x2dd   :  { %2029 = vst [vmem:[#allocation1 + $0x1] ss:$9 sm:$0xff] %v1484_v34  ;;  %v6878_v34 = vld [vmem:[#allocation36_spill] sm:$0xff] }
 0x2de   :  { %2030 = vst [vmem:[#allocation1 + $0x2] ss:$9 sm:$0xff] %v1485_v63  ;;  %v1515_v63 = vperm.slane %v6878_v34, 0  ;;  %vm840_vm9 = vcmp.eq.s32.totalorder %v4898_v30, %v6878_v34 }
 0x2df   :  { %2031 = vst [vmem:[#allocation1 + $0x3] ss:$9 sm:$0xff] %v1486_v61  ;;  %v1516_v61 = vperm.slane %v6878_v34, 1  ;;  %3902 = vmatmul.msk.f32.gmra.mxu1 %vm840_vm9, %v6816_v55  ;;  %vm2569_vm9 = vcmask 195712  }
 0x2e0   :  { %2032 = vst [vmem:[#allocation1 + $0x4] ss:$9 sm:$0xff] %v1487_v37 }
 0x2e1   :  { %2033 = vst [vmem:[#allocation1 + $0x5] ss:$9 sm:$0xff] %v1488_v53  ;;  %v1517_v53 = vperm.slane %v6878_v34, 2 }
 0x2e2   :  { %2034 = vst [vmem:[#allocation1 + $0x6] ss:$9 sm:$0xff] %v1489_v50  ;;  %v1518_v50 = vperm.slane %v6878_v34, 3 }
 0x2e3   :  { %2035 = vst [vmem:[#allocation1 + $0x7] ss:$9 sm:$0xff] %v1490_v52  ;;  %v1519_v52 = vperm.slane %v6878_v34, 4 }
 0x2ea   :  { %v5804_v18 = vld [vmem:[#allocation1] sm:$0xff] }
 0x2eb   :  { %2037 = vst [vmem:[#allocation1] ss:$9 sm:$0xff] %v1491_v19  ;;  %v1520_v19 = vperm.slane %v6878_v34, 5 }
 0x2ec   :  { %2038 = vst [vmem:[#allocation1 + $0x1] ss:$9 sm:$0xff] %v1492_v7  ;;  %v1521_v7 = vperm.slane %v6878_v34, 6 }
 0x2ed   :  { %2039 = vst [vmem:[#allocation1 + $0x2] ss:$9 sm:$0xff] %v1493_v22  ;;  %v1522_v22 = vperm.slane %v6878_v34, 7 }
 0x2ee   :  { %2040 = vst [vmem:[#allocation1 + $0x3] ss:$9 sm:$0xff] %v1494_v49  ;;  %v6879_v49 = vld [vmem:[#allocation37_spill] sm:$0xff] }
 0x2ef   :  { %2041 = vst [vmem:[#allocation1 + $0x4] ss:$9 sm:$0xff] %v1495_v60  ;;  %v1523_v60 = vperm.slane %v6879_v49, 0  ;;  %vm841_vm12 = vcmp.eq.s32.totalorder %v4898_v30, %v6879_v49 }
 0x2f0   :  { %2042 = vst [vmem:[#allocation1 + $0x5] ss:$9 sm:$0xff] %v1496_v4  ;;  %v1524_v4 = vperm.slane %v6879_v49, 1  ;;  %3903 = vmatmul.msk.f32.gmra.mxu1 %vm841_vm12, %v6816_v55  ;;  %vm2577_vm12 = vcmask 326912  }
 0x2f1   :  { %2043 = vst [vmem:[#allocation1 + $0x6] ss:$9 sm:$0xff] %v1497_v45 }
 0x2f2   :  { %2044 = vst [vmem:[#allocation1 + $0x7] ss:$9 sm:$0xff] %v1498_v25  ;;  %v1525_v25 = vperm.slane %v6879_v49, 2 }
 0x2f9   :  { %v5818_v28 = vld [vmem:[#allocation1] sm:$0xff] }
 0x2fa   :  { %2046 = vst [vmem:[#allocation1] ss:$9 sm:$0xff] %v1499_v0  ;;  %v1526_v0 = vperm.slane %v6879_v49, 3 }
 0x2fb   :  { %2047 = vst [vmem:[#allocation1 + $0x1] ss:$9 sm:$0xff] %v1500_v15  ;;  %v1527_v15 = vperm.slane %v6879_v49, 4 }
 0x2fc   :  { %2048 = vst [vmem:[#allocation1 + $0x2] ss:$9 sm:$0xff] %v1501_v12  ;;  %v1528_v12 = vperm.slane %v6879_v49, 5 }
 0x2fd   :  { %2049 = vst [vmem:[#allocation1 + $0x3] ss:$9 sm:$0xff] %v1502_v41  ;;  %v1529_v41 = vperm.slane %v6879_v49, 6 }
 0x2fe   :  { %2050 = vst [vmem:[#allocation1 + $0x4] ss:$9 sm:$0xff] %v1503_v10  ;;  %v1530_v10 = vperm.slane %v6879_v49, 7  ;;  %v6916_v49 = vld [vmem:[#allocation29_spill] sm:$0xff] }
 0x2ff   :  { %2051 = vst [vmem:[#allocation1 + $0x5] ss:$9 sm:$0xff] %v1504_v3  ;;  %v6880_v3 = vld [vmem:[#allocation38_spill] sm:$0xff] }
 0x300   :  { %2052 = vst [vmem:[#allocation1 + $0x6] ss:$9 sm:$0xff] %v1505_v44  ;;  %v1531_v44 = vperm.slane %v6880_v3, 0  ;;  %vm842_vm14 = vcmp.eq.s32.totalorder %v4898_v30, %v6880_v3 }
 0x301   :  { %2053 = vst [vmem:[#allocation1 + $0x7] ss:$9 sm:$0xff] %v1506_v13  ;;  %v1532_v13 = vperm.slane %v6880_v3, 1  ;;  %3904 = vmatmul.msk.f32.gmra.mxu1 %vm842_vm14, %v6816_v55  ;;  %vm2585_vm14 = vcmask 458112  }
 0x308   :  { %v5827_v46 = vld [vmem:[#allocation1] sm:$0xff] }
 0x309   :  { %2055 = vst [vmem:[#allocation1] ss:$9 sm:$0xff] %v1507_v29 }
 0x30a   :  { %2056 = vst [vmem:[#allocation1 + $0x1] ss:$9 sm:$0xff] %v1508_v54  ;;  %v1533_v54 = vperm.slane %v6880_v3, 2 }
 0x30b   :  { %2057 = vst [vmem:[#allocation1 + $0x2] ss:$9 sm:$0xff] %v1509_v36  ;;  %v1534_v36 = vperm.slane %v6880_v3, 3 }
 0x30c   :  { %2058 = vst [vmem:[#allocation1 + $0x3] ss:$9 sm:$0xff] %v1510_v56  ;;  %v1535_v56 = vperm.slane %v6880_v3, 4 }
 0x30d   :  { %2059 = vst [vmem:[#allocation1 + $0x4] ss:$9 sm:$0xff] %v1511_v57  ;;  %v1536_v57 = vperm.slane %v6880_v3, 5 }
 0x30e   :  { %2060 = vst [vmem:[#allocation1 + $0x5] ss:$9 sm:$0xff] %v1512_v42  ;;  %v1537_v42 = vperm.slane %v6880_v3, 6 }
 0x30f   :  { %2061 = vst [vmem:[#allocation1 + $0x6] ss:$9 sm:$0xff] %v1513_v38  ;;  %v1538_v38 = vperm.slane %v6880_v3, 7 }
 0x310   :  { %2062 = vst [vmem:[#allocation1 + $0x7] ss:$9 sm:$0xff] %v1514_v43  ;;  %v5865_v43 = vpop.xlane.xlu2 %792 }
 0x311   :  { %6881 = vst [vmem:[#allocation11_spill] sm:$0xff] %v5865_v43  ;;  %vm866_vm6 = vcmp.eq.s32.totalorder %v4898_v30, %v5865_v43 }
 0x312   :  { %3928 = vmatmul.msk.f32.gmra.mxu3 %vm866_vm6, %v6816_v55 }
 0x317   :  { %v5837_v37 = vld [vmem:[#allocation1] sm:$0xff] }
 0x318   :  { %2064 = vst [vmem:[#allocation1] ss:$9 sm:$0xff] %v1515_v63  ;;  %v6882_v63 = vld [vmem:[#allocation45_spill] sm:$0xff] }
 0x319   :  { %2065 = vst [vmem:[#allocation1 + $0x1] ss:$9 sm:$0xff] %v1516_v61  ;;  %v1539_v61 = vperm.slane %v6882_v63, 0  ;;  %vm843_vm1 = vcmp.eq.s32.totalorder %v4898_v30, %v6882_v63 }
 0x31a   :  { %2066 = vst [vmem:[#allocation1 + $0x2] ss:$9 sm:$0xff] %v1517_v53  ;;  %v4028_v53 = vld [vmem:[%s6723_s0 + $0x1e8] sm:$0xff]  ;;  %3905 = vmatmul.msk.f32.gmra.mxu1 %vm843_vm1, %v6816_v55  ;;  %vm2593_vm1 = vcmask 589312  }
 0x31b   :  { %2067 = vst [vmem:[#allocation1 + $0x3] ss:$9 sm:$0xff] %v1518_v50  ;;  %v2791_v50 = vmul.f32 %v4028_v53, %v4028_v53 }
 0x31c   :  { %2068 = vst [vmem:[#allocation1 + $0x4] ss:$9 sm:$0xff] %v1519_v52  ;;  %v1540_v52 = vperm.slane %v6882_v63, 1 }
 0x31d   :  { %2069 = vst [vmem:[#allocation1 + $0x5] ss:$9 sm:$0xff] %v1520_v19 }
 0x31e   :  { %2070 = vst [vmem:[#allocation1 + $0x6] ss:$9 sm:$0xff] %v1521_v7  ;;  %v1541_v7 = vperm.slane %v6882_v63, 2 }
 0x31f   :  { %2071 = vst [vmem:[#allocation1 + $0x7] ss:$9 sm:$0xff] %v1522_v22  ;;  %v4029_v22 = vld [vmem:[%s6723_s0 + $0x1e0] sm:$0xff] }
 0x326   :  { %v5847_v45 = vld [vmem:[#allocation1] sm:$0xff] }
 0x327   :  { %2073 = vst [vmem:[#allocation1] ss:$9 sm:$0xff] %v1523_v60  ;;  %v2790_v60 = vmul.f32 %v4029_v22, %v4029_v22 }
 0x328   :  { %2074 = vst [vmem:[#allocation1 + $0x1] ss:$9 sm:$0xff] %v1524_v4  ;;  %v1542_v4 = vperm.slane %v6882_v63, 3 }
 0x329   :  { %2075 = vst [vmem:[#allocation1 + $0x2] ss:$9 sm:$0xff] %v1525_v25  ;;  %v1543_v25 = vperm.slane %v6882_v63, 4  ;;  %v2974_v33 = vsel %vm99_vm0, %v2790_v60, 0.0  ;;  %v6887_v60 = vld [vmem:[#allocation7_spill] sm:$0xff] }
 0x32a   :  { %2076 = vst [vmem:[#allocation1 + $0x3] ss:$9 sm:$0xff] %v1526_v0  ;;  %v1544_v0 = vperm.slane %v6882_v63, 5  ;;  %2975 = vadd.xlane.f32.xlu0 %v2974_v33 }
 0x32b   :  { %2077 = vst [vmem:[#allocation1 + $0x4] ss:$9 sm:$0xff] %v1527_v15  ;;  %v2977_v15 = vsel %vm99_vm0, %v2791_v50, 0.0  ;;  %v6885_v50 = vld [vmem:[#allocation16_spill] sm:$0xff] }
 0x32c   :  { %2078 = vst [vmem:[#allocation1 + $0x5] ss:$9 sm:$0xff] %v1528_v12  ;;  %v1545_v12 = vperm.slane %v6882_v63, 6  ;;  %2978 = vadd.xlane.f32.xlu2 %v2977_v15  ;;  %v6890_v15 = vld [vmem:[#allocation46_spill] sm:$0xff] }
 0x32d   :  { %2079 = vst [vmem:[#allocation1 + $0x6] ss:$9 sm:$0xff] %v1529_v41  ;;  %v1546_v41 = vperm.slane %v6882_v63, 7  ;;  %v1548_v33 = vperm.slane %v6890_v15, 1  ;;  %vm844_vm3 = vcmp.eq.s32.totalorder %v4898_v30, %v6890_v15 }
 0x32e   :  { %2080 = vst [vmem:[#allocation1 + $0x7] ss:$9 sm:$0xff] %v1530_v10  ;;  %v1139_v10 = vpop.f32.mrf.mxu3  ;;  %3906 = vmatmul.msk.f32.gmra.mxu1 %vm844_vm3, %v6816_v55  ;;  %vm2601_vm3 = vcmask 720512  }
 0x32f   :  { %1251 = vst.msk [vmem:[%s6726_s3 + $0x140] sm:$0xff] %vm99_vm0, %v1139_v10 }
 0x334   :  { %3110 = vmin.xlane.f32.xlu2 %v6887_v60 }
 0x335   :  { %v5857_v29 = vld [vmem:[#allocation1] sm:$0xff] }
 0x336   :  { %2082 = vst [vmem:[#allocation1] ss:$9 sm:$0xff] %v1531_v44  ;;  %v5891_v44 = vpop.xlane.xlu2 %3068 }
 0x337   :  { %2083 = vst [vmem:[#allocation1 + $0x1] ss:$9 sm:$0xff] %v1532_v13  ;;  %v1055_v13 = vpop.f32.mrf.mxu1 }
 0x338   :  { %2084 = vst [vmem:[#allocation1 + $0x2] ss:$9 sm:$0xff] %v1533_v54  ;;  %v4030_v54 = vld [vmem:[%s6723_s0 + $0x1f0] sm:$0xff] }
 0x339   :  { %2085 = vst [vmem:[#allocation1 + $0x3] ss:$9 sm:$0xff] %v1534_v36  ;;  %v2792_v36 = vmul.f32 %v4030_v54, %v4030_v54  ;;  %v6891_v54 = vld [vmem:[#allocation6_spill] sm:$0xff] }
 0x33a   :  { %2086 = vst [vmem:[#allocation1 + $0x4] ss:$9 sm:$0xff] %v1535_v56  ;;  %v3041_v56 = vpop.xlane.xlu0 %3040  ;;  %3108 = vmin.xlane.f32.xlu0 %v6891_v54  ;;  %v1554_v54 = vperm.slane %v6890_v15, 7 }
 0x33b   :  { %2087 = vst [vmem:[#allocation1 + $0x5] ss:$9 sm:$0xff] %v1536_v57  ;;  %v3043_v57 = vpop.xlane.xlu1 %3042 }
 0x33c   :  { %2088 = vst [vmem:[#allocation1 + $0x6] ss:$9 sm:$0xff] %v1537_v42  ;;  %v6883_v42 = vld [vmem:[#allocation15_spill] sm:$0xff] }
 0x33d   :  { %2089 = vst [vmem:[#allocation1 + $0x7] ss:$9 sm:$0xff] %v1538_v38  ;;  %v3464_v38 = vadd.f32 %v3041_v56, %v6883_v42  ;;  %v1549_v56 = vperm.slane %v6890_v15, 2 }
 0x33e   :  { %1223 = vst.msk [vmem:[%s6726_s3 + $0x60] sm:$0xff] %vm99_vm0, %v1055_v13  ;;  %v5927_v42 = vpop.xlane.xlu2 %2924 }
 0x33f   :  { %v3619_v22 = vsel %vm6784_vm11, %v3464_v38, 0.0 }
 0x340   :  { %v3620_v16 = vadd.f32 %v3619_v22, %v5752_v35  ;;  %v6892_v35 = vld [vmem:[#allocation20_spill] sm:$0xff]  ;;  %v1551_v22 = vperm.slane %v6890_v15, 4 }
 0x344   :  { %v5872_v19 = vld [vmem:[#allocation1] sm:$0xff] }
 0x345   :  { %2091 = vst [vmem:[#allocation1] ss:$9 sm:$0xff] %v1539_v61  ;;  %v6884_v61 = vld [vmem:[#allocation17_spill] sm:$0xff] }
 0x346   :  { %2092 = vst [vmem:[#allocation1 + $0x1] ss:$9 sm:$0xff] %v1540_v52  ;;  %v3465_v53 = vadd.f32 %v3043_v57, %v6884_v61  ;;  %v6886_v52 = vld [vmem:[#allocation31_spill] sm:$0xff]  ;;  %v6893_v61 = vld [vmem:[#allocation40_spill] sm:$0xff] }
 0x347   :  { %2093 = vst [vmem:[#allocation1 + $0x2] ss:$9 sm:$0xff] %v1541_v7  ;;  %v3466_v7 = vadd.f32 %v6886_v52, %v6885_v50  ;;  %v1550_v50 = vperm.slane %v6890_v15, 3  ;;  %v1058_v52 = vpop.f32.mrf.mxu1 }
 0x348   :  { %2094 = vst [vmem:[#allocation1 + $0x3] ss:$9 sm:$0xff] %v1542_v4  ;;  %v6888_v4 = vld [vmem:[#allocation18_spill] sm:$0xff]  ;;  %v3621_v13 = vsel %vm6784_vm11, %v3465_v53, 0.0 }
 0x349   :  { %2095 = vst [vmem:[#allocation1 + $0x4] ss:$9 sm:$0xff] %v1543_v25  ;;  %v6889_v25 = vld [vmem:[#allocation39_spill] sm:$0xff]  ;;  %v3622_v57 = vadd.f32 %v3621_v13, %v3620_v16  ;;  %v3623_v38 = vsel %vm6784_vm11, %v3466_v7, 0.0  ;;  %v6896_v16 = vld [vmem:[#allocation42_spill] sm:$0xff]  ;;  %v1552_v7 = vperm.slane %v6890_v15, 5 }
 0x34a   :  { %2096 = vst [vmem:[#allocation1 + $0x5] ss:$9 sm:$0xff] %v1544_v0  ;;  %v3467_v0 = vadd.f32 %v6889_v25, %v6888_v4  ;;  %v5935_v4 = vpop.xlane.xlu0 %794  ;;  %v3071_v25 = vpop.xlane.xlu1 %3070 }
 0x34b   :  { %2097 = vst [vmem:[#allocation1 + $0x6] ss:$9 sm:$0xff] %v1545_v12  ;;  %v1547_v12 = vperm.slane %v6890_v15, 0  ;;  %v3624_v60 = vadd.f32 %v3623_v38, %v3622_v57  ;;  %vm867_vm8 = vcmp.eq.s32.totalorder %v4898_v30, %v5935_v4  ;;  %v6898_v57 = vld [vmem:[#allocation48_spill] sm:$0xff] }
 0x34c   :  { %2098 = vst [vmem:[#allocation1 + $0x7] ss:$9 sm:$0xff] %v1546_v41  ;;  %v2980_v41 = vsel %vm99_vm0, %v2792_v36, 0.0  ;;  %v3468_v36 = vadd.f32 %v6893_v61, %v6892_v35  ;;  %v3625_v53 = vsel %vm6784_vm11, %v3467_v0, 0.0  ;;  %v1553_v0 = vperm.slane %v6890_v15, 6  ;;  %3929 = vmatmul.msk.f32.gmra.mxu3 %vm867_vm8, %v6816_v55  ;;  %v6900_v35 = vld [vmem:[#allocation49_spill] sm:$0xff] }
 0x34d   :  { %2981 = vadd.xlane.f32.xlu1 %v2980_v41  ;;  %6894 = vst [vmem:[#allocation9_spill] sm:$0xff] %v5935_v4  ;;  %v3471_v61 = vadd.f32 %v6900_v35, %v6899_v6  ;;  %v6912_v4 = vld [vmem:[#allocation65_spill] sm:$0xff]  ;;  %vm2565_vm8 = vcmask 130112  }
 0x34e   :  { %v3627_v13 = vsel %vm6784_vm11, %v3468_v36, 0.0  ;;  %1224 = vst.msk [vmem:[%s6726_s3 + $0x68] sm:$0xff] %vm99_vm0, %v1058_v52  ;;  %v5958_v36 = vpop.xlane.xlu2 %798 }
 0x34f   :  { %vm869_vm13 = vcmp.eq.s32.totalorder %v4898_v30, %v5958_v36 }
 0x352   :  { %v2922_v52 = vpop.xlane.xlu0 %2921 }
 0x353   :  { %v5922_v10 = vld [vmem:[#allocation1] sm:$0xff]  ;;  %v5976_v6 = vadd.f32 %v3071_v25, %v2922_v52 }
 0x354   :  { %2100 = vst [vmem:[#allocation1] ss:$9 sm:$0xff] %v1547_v12  ;;  %v6895_v12 = vld [vmem:[#allocation19_spill] sm:$0xff] }
 0x355   :  { %2101 = vst [vmem:[#allocation1 + $0x1] ss:$9 sm:$0xff] %v1548_v33  ;;  %v3469_v41 = vadd.f32 %v6896_v16, %v6895_v12  ;;  %v3626_v33 = vadd.f32 %v3625_v53, %v3624_v60  ;;  %v1142_v53 = vpop.f32.mrf.mxu3  ;;  %v6901_v16 = vld [vmem:[#allocation22_spill] sm:$0xff] }
 0x356   :  { %2102 = vst [vmem:[#allocation1 + $0x2] ss:$9 sm:$0xff] %v1549_v56  ;;  %v6897_v56 = vld [vmem:[#allocation21_spill] sm:$0xff] }
 0x357   :  { %2103 = vst [vmem:[#allocation1 + $0x3] ss:$9 sm:$0xff] %v1550_v50  ;;  %v3470_v38 = vadd.f32 %v6898_v57, %v6897_v56  ;;  %v3628_v50 = vadd.f32 %v3627_v13, %v3626_v33  ;;  %v5972_v13 = vpop.xlane.xlu1 %796  ;;  %v6905_v57 = vld [vmem:[#allocation57_spill] sm:$0xff] }
 0x358   :  { %2104 = vst [vmem:[#allocation1 + $0x4] ss:$9 sm:$0xff] %v1551_v22  ;;  %v3629_v22 = vsel %vm6784_vm11, %v3469_v41, 0.0  ;;  %v1061_v41 = vpop.f32.mrf.mxu1  ;;  %vm868_vm10 = vcmp.eq.s32.totalorder %v4898_v30, %v5972_v13 }
 0x359   :  { %2105 = vst [vmem:[#allocation1 + $0x5] ss:$9 sm:$0xff] %v1552_v7  ;;  %v3630_v60 = vadd.f32 %v3629_v22, %v3628_v50  ;;  %v3631_v12 = vsel %vm6784_vm11, %v3470_v38, 0.0  ;;  %v6902_v7 = vld [vmem:[#allocation53_spill] sm:$0xff]  ;;  %3930 = vmatmul.msk.f32.gmra.mxu3 %vm868_vm10, %v6816_v55  ;;  %vm2573_vm10 = vcmask 261312  }
 0x35a   :  { %2106 = vst [vmem:[#allocation1 + $0x6] ss:$9 sm:$0xff] %v1553_v0  ;;  %v3472_v56 = vadd.f32 %v6902_v7, %v6901_v16  ;;  %v3633_v0 = vsel %vm6784_vm11, %v3471_v61, 0.0  ;;  %v6906_v61 = vld [vmem:[#allocation51_spill] sm:$0xff]  ;;  %v6909_v16 = vld [vmem:[#allocation25_spill] sm:$0xff]  ;;  %v6910_v7 = vld [vmem:[#allocation66_spill] sm:$0xff]  ;;  %v3073_v39 = vpop.xlane.xlu0 %3072 }
 0x35b   :  { %2107 = vst [vmem:[#allocation1 + $0x7] ss:$9 sm:$0xff] %v1554_v54  ;;  %v3632_v33 = vadd.f32 %v3631_v12, %v3630_v60  ;;  %v6904_v54 = vld [vmem:[#allocation24_spill] sm:$0xff]  ;;  %v1555_v50 = vperm.slane %v6906_v61, 0  ;;  %v6908_v60 = vld [vmem:[#allocation58_spill] sm:$0xff]  ;;  %v3475_v25 = vadd.f32 %v6910_v7, %v6909_v16  ;;  %v1556_v34 = vperm.slane %v6906_v61, 1  ;;  %v3075_v7 = vpop.xlane.xlu2 %3074 }
 0x35c   :  { %1252 = vst.msk [vmem:[%s6726_s3 + $0x148] sm:$0xff] %vm99_vm0, %v1142_v53  ;;  %v3473_v38 = vadd.f32 %v6905_v57, %v6904_v54  ;;  %v3635_v22 = vsel %vm6784_vm11, %v3472_v56, 0.0  ;;  %v6907_v53 = vld [vmem:[#allocation26_spill] sm:$0xff]  ;;  %v1559_v57 = vperm.slane %v6906_v61, 4  ;;  %vm845_vm5 = vcmp.eq.s32.totalorder %v4898_v30, %v6906_v61 }
 0x35d   :  { %1225 = vst.msk [vmem:[%s6726_s3 + $0x70] sm:$0xff] %vm99_vm0, %v1061_v41  ;;  %v3634_v35 = vadd.f32 %v3633_v0, %v3632_v33  ;;  %v3474_v12 = vadd.f32 %v6908_v60, %v6907_v53  ;;  %v1557_v0 = vperm.slane %v6906_v61, 2  ;;  %v1558_v33 = vperm.slane %v6906_v61, 3  ;;  %v1145_v56 = vpop.f32.mrf.mxu3  ;;  %3907 = vmatmul.msk.f32.gmra.mxu1 %vm845_vm5, %v6816_v55 }
 0x35e   :  { %6903 = vst [vmem:[#allocation12_spill] sm:$0xff] %v5972_v13  ;;  %v3637_v54 = vsel %vm6784_vm11, %v3473_v38, 0.0  ;;  %v1560_v53 = vperm.slane %v6906_v61, 5  ;;  %v1561_v60 = vperm.slane %v6906_v61, 6  ;;  %vm2609_vm5 = vcmask 851712  }
 0x35f   :  { %v3636_v52 = vadd.f32 %v3635_v22, %v3634_v35  ;;  %v3639_v13 = vsel %vm6784_vm11, %v3474_v12, 0.0  ;;  %v3641_v35 = vsel %vm6784_vm11, %v3475_v25, 0.0  ;;  %v6911_v22 = vld [vmem:[#allocation27_spill] sm:$0xff]  ;;  %v3480_v12 = vadd.f32 %v3073_v39, %v5927_v42  ;;  %v6917_v39 = vld [vmem:[#allocation41_spill] sm:$0xff]  ;;  %1253 = vst.msk [vmem:[%s6726_s3 + $0x150] sm:$0xff] %vm99_vm0, %v1145_v56 }
 0x360   :  { %v3476_v43 = vadd.f32 %v6912_v4, %v6911_v22  ;;  %v1064_v38 = vpop.f32.mrf.mxu1  ;;  %v6915_v4 = vld [vmem:[#allocation43_spill] sm:$0xff]  ;;  %2374 = vperm.xlu2 %4007, %v6917_v39  }
 0x361   :  { %v3638_v16 = vadd.f32 %v3637_v54, %v3636_v52  ;;  %2377 = vperm.xlu0 %4005, %v6915_v4   ;;  %3931 = vmatmul.msk.f32.gmra.mxu3 %vm869_vm13, %v6816_v55  ;;  %1226 = vst.msk [vmem:[%s6726_s3 + $0x78] sm:$0xff] %vm99_vm0, %v1064_v38  ;;  %vm2581_vm13 = vcmask 392512  }
 0x362   :  { %v5991_v41 = vld [vmem:[#allocation1] sm:$0xff]  ;;  %v3643_v52 = vsel %vm6784_vm11, %v3476_v43, 0.0  ;;  %v2931_v56 = vpop.xlane.xlu0 %2930 }
 0x363   :  { %2109 = vst [vmem:[#allocation1] ss:$9 sm:$0xff] %v1555_v50  ;;  %v6913_v50 = vld [vmem:[#allocation28_spill] sm:$0xff]  ;;  %v3640_v23 = vadd.f32 %v3639_v13, %v3638_v16  ;;  %v2934_v43 = vpop.xlane.xlu2 %2933 }
 0x364   :  { %2110 = vst [vmem:[#allocation1 + $0x1] ss:$9 sm:$0xff] %v1556_v34  ;;  %v3477_v32 = vadd.f32 %v6914_v11, %v6913_v50  ;;  %v2928_v34 = vpop.xlane.xlu1 %2927  ;;  %v1562_v11 = vperm.slane %v6906_v61, 7  ;;  %v6921_v50 = vld [vmem:[#allocation32_spill] sm:$0xff] }
 0x365   :  { %2111 = vst [vmem:[#allocation1 + $0x2] ss:$9 sm:$0xff] %v1557_v0  ;;  %v3481_v25 = vadd.f32 %v3075_v7, %v2928_v34  ;;  %v3642_v13 = vadd.f32 %v3641_v35, %v3640_v23  ;;  %v3478_v0 = vadd.f32 %v5891_v44, %v6916_v49  ;;  %v1148_v23 = vpop.f32.mrf.mxu3  ;;  %v6918_v44 = vld [vmem:[#allocation34_spill] sm:$0xff]  ;;  %v6919_v7 = vld [vmem:[#allocation71_spill] sm:$0xff]  ;;  %vm870_vm15 = vcmp.eq.s32.totalorder %v4898_v30, %v6921_v50 }
 0x366   :  { %2112 = vst [vmem:[#allocation1 + $0x3] ss:$9 sm:$0xff] %v1558_v33  ;;  %v3645_v62 = vsel %vm6784_vm11, %v3477_v32, 0.0  ;;  %2371 = vperm.xlu1 %4006, %v6918_v44   ;;  %v6920_v35 = vld [vmem:[#allocation55_spill] sm:$0xff] }
 0x367   :  { %2113 = vst [vmem:[#allocation1 + $0x4] ss:$9 sm:$0xff] %v1559_v57  ;;  %v3644_v42 = vadd.f32 %v3643_v52, %v3642_v13  ;;  %v3647_v54 = vsel %vm6784_vm11, %v3478_v0, 0.0  ;;  %v1563_v22 = vperm.slane %v6920_v35, 0  ;;  %v1564_v34 = vperm.slane %v6920_v35, 1 }
 0x368   :  { %2114 = vst [vmem:[#allocation1 + $0x5] ss:$9 sm:$0xff] %v1560_v53  ;;  %v1067_v32 = vpop.f32.mrf.mxu1  ;;  %v1565_v3 = vperm.slane %v6920_v35, 2  ;;  %v1566_v52 = vperm.slane %v6920_v35, 3  ;;  %v3653_v49 = vsel %vm6784_vm11, %v3481_v25, 0.0  ;;  %v1567_v39 = vperm.slane %v6920_v35, 4 }
 0x369   :  { %2115 = vst [vmem:[#allocation1 + $0x6] ss:$9 sm:$0xff] %v1561_v60  ;;  %v3646_v33 = vadd.f32 %v3645_v62, %v3644_v42  ;;  %v3649_v60 = vsel %vm6784_vm11, %v5976_v6, 0.0  ;;  %2398 = vperm.xlu0 %4005, %v6919_v7   ;;  %v3651_v6 = vsel %vm6784_vm11, %v3480_v12, 0.0  ;;  %3932 = vmatmul.msk.f32.gmra.mxu3 %vm870_vm15, %v6816_v55  ;;  %v6923_v12 = vld [vmem:[#allocation50_spill] sm:$0xff]  ;;  %vm846_vm7 = vcmp.eq.s32.totalorder %v4898_v30, %v6920_v35 }
 0x36a   :  { %2116 = vst [vmem:[#allocation1 + $0x7] ss:$9 sm:$0xff] %v1562_v11  ;;  %v6922_v11 = vld [vmem:[#allocation47_spill] sm:$0xff]  ;;  %3908 = vmatmul.msk.f32.gmra.mxu1 %vm846_vm7, %v6816_v55  ;;  %vm2589_vm15 = vcmask 523712   ;;  %vm2617_vm7 = vcmask 982912  }
 0x36b   :  { %1254 = vst.msk [vmem:[%s6726_s3 + $0x158] sm:$0xff] %vm99_vm0, %v1148_v23  ;;  %v3648_v57 = vadd.f32 %v3647_v54, %v3646_v33  ;;  %2380 = vperm.xlu2 %4007, %v6922_v11   ;;  %v3081_v62 = vpop.xlane.xlu2 %3080  ;;  %v1568_v23 = vperm.slane %v6920_v35, 5  ;;  %v1569_v54 = vperm.slane %v6920_v35, 6 }
 0x36c   :  { %1227 = vst.msk [vmem:[%s6726_s3 + $0x80] sm:$0xff] %vm99_vm0, %v1067_v32  ;;  %v3077_v53 = vpop.xlane.xlu1 %3076 }
 0x36d   :  { %v3482_v16 = vadd.f32 %v3077_v53, %v2931_v56  ;;  %v3650_v38 = vadd.f32 %v3649_v60, %v3648_v57  ;;  %v1151_v0 = vpop.f32.mrf.mxu3  ;;  %v3079_v57 = vpop.xlane.xlu0 %3078  ;;  %v1570_v56 = vperm.slane %v6920_v35, 7 }
 0x36e   :  { %2383 = vperm.xlu1 %4006, %v6923_v12   ;;  %v3483_v53 = vadd.f32 %v3079_v57, %v2934_v43  ;;  %1255 = vst.msk [vmem:[%s6726_s3 + $0x160] sm:$0xff] %vm99_vm0, %v1151_v0 }
 0x36f   :  { %v3652_v13 = vadd.f32 %v3651_v6, %v3650_v38  ;;  %v3655_v33 = vsel %vm6784_vm11, %v3482_v16, 0.0  ;;  %v6924_v16 = vld [vmem:[#allocation33_spill] sm:$0xff]  ;;  %v6926_v6 = vld [vmem:[#allocation59_spill] sm:$0xff] }
 0x370   :  { %v1070_v44 = vpop.f32.mrf.mxu1  ;;  %vm871_vm2 = vcmp.eq.s32.totalorder %v4898_v30, %v6924_v16  ;;  %v3657_v7 = vsel %vm6784_vm11, %v3483_v53, 0.0 }
 0x371   :  { %v6047_v4 = vld [vmem:[#allocation1] sm:$0xff]  ;;  %v3654_v42 = vadd.f32 %v3653_v49, %v3652_v13  ;;  %2407 = vperm.xlu0 %4005, %v5319_v1   ;;  %3933 = vmatmul.msk.f32.gmra.mxu3 %vm871_vm2, %v6816_v55  ;;  %1228 = vst.msk [vmem:[%s6726_s3 + $0x88] sm:$0xff] %vm99_vm0, %v1070_v44  ;;  %vm2597_vm2 = vcmask 654912  }
 0x372   :  { %2118 = vst [vmem:[#allocation1] ss:$9 sm:$0xff] %v1563_v22  ;;  %v6925_v22 = vld [vmem:[#allocation54_spill] sm:$0xff] }
 0x373   :  { %2119 = vst [vmem:[#allocation1 + $0x1] ss:$9 sm:$0xff] %v1564_v34  ;;  %v3656_v32 = vadd.f32 %v3655_v33, %v3654_v42  ;;  %2386 = vperm.xlu2 %4007, %v6925_v22   ;;  %v2943_v34 = vpop.xlane.xlu2 %2942 }
 0x374   :  { %2120 = vst [vmem:[#allocation1 + $0x2] ss:$9 sm:$0xff] %v1565_v3  ;;  %v2937_v25 = vpop.xlane.xlu1 %2936 }
 0x375   :  { %2121 = vst [vmem:[#allocation1 + $0x3] ss:$9 sm:$0xff] %v1566_v52  ;;  %v3484_v60 = vadd.f32 %v3081_v62, %v2937_v25  ;;  %v3658_v1 = vadd.f32 %v3657_v7, %v3656_v32  ;;  %v1154_v43 = vpop.f32.mrf.mxu3  ;;  %v2940_v3 = vpop.xlane.xlu0 %2939  ;;  %v6927_v52 = vld [vmem:[#allocation56_spill] sm:$0xff]  ;;  %v6928_v62 = vld [vmem:[#allocation35_spill] sm:$0xff] }
 0x376   :  { %2122 = vst [vmem:[#allocation1 + $0x4] ss:$9 sm:$0xff] %v1567_v39  ;;  %2389 = vperm.xlu1 %4006, %v6926_v6   ;;  %v1571_v49 = vperm.slane %v6927_v52, 0  ;;  %v1572_v39 = vperm.slane %v6927_v52, 1  ;;  %vm872_vm4 = vcmp.eq.s32.totalorder %v4898_v30, %v6928_v62  ;;  %v1573_v12 = vperm.slane %v6927_v52, 2  ;;  %v6930_v25 = vld [vmem:[#allocation68_spill] sm:$0xff] }
 0x377   :  { %2123 = vst [vmem:[#allocation1 + $0x5] ss:$9 sm:$0xff] %v1568_v23  ;;  %v3659_v63 = vsel %vm6784_vm11, %v3484_v60, 0.0  ;;  %v1574_v15 = vperm.slane %v6927_v52, 3  ;;  %v1575_v44 = vperm.slane %v6927_v52, 4  ;;  %v1576_v32 = vperm.slane %v6927_v52, 5 }
 0x378   :  { %2124 = vst [vmem:[#allocation1 + $0x6] ss:$9 sm:$0xff] %v1569_v54  ;;  %v3660_v38 = vadd.f32 %v3659_v63, %v3658_v1  ;;  %v1073_v11 = vpop.f32.mrf.mxu1  ;;  %v1578_v60 = vperm.slane %v6927_v52, 7 }
 0x379   :  { %2125 = vst [vmem:[#allocation1 + $0x7] ss:$9 sm:$0xff] %v1570_v56  ;;  %2416 = vperm.xlu0 %4005, %v5443_v5   ;;  %3934 = vmatmul.msk.f32.gmra.mxu3 %vm872_vm4, %v6816_v55  ;;  %v6929_v5 = vld [vmem:[#allocation62_spill] sm:$0xff]  ;;  %v1577_v56 = vperm.slane %v6927_v52, 6  ;;  %vm2605_vm4 = vcmask 786112  }
 0x37a   :  { %1256 = vst.msk [vmem:[%s6726_s3 + $0x168] sm:$0xff] %vm99_vm0, %v1154_v43  ;;  %v6931_v43 = vld [vmem:[#allocation44_spill] sm:$0xff] }
 0x37b   :  { %1229 = vst.msk [vmem:[%s6726_s3 + $0x90] sm:$0xff] %vm99_vm0, %v1073_v11  ;;  %2392 = vperm.xlu2 %4007, %v6929_v5   ;;  %v3087_v57 = vpop.xlane.xlu2 %3086  ;;  %vm873_vm6 = vcmp.eq.s32.totalorder %v4898_v30, %v6931_v43 }
 0x37c   :  { %v3083_v13 = vpop.xlane.xlu1 %3082 }
 0x37d   :  { %v3485_v0 = vadd.f32 %v3083_v13, %v2940_v3  ;;  %v1157_v54 = vpop.f32.mrf.mxu3  ;;  %v3085_v7 = vpop.xlane.xlu0 %3084  ;;  %v6933_v13 = vld [vmem:[#allocation74_spill] sm:$0xff] }
 0x37e   :  { %2395 = vperm.xlu1 %4006, %v6930_v25   ;;  %v3486_v1 = vadd.f32 %v3085_v7, %v2943_v34  ;;  %1257 = vst.msk [vmem:[%s6726_s3 + $0x170] sm:$0xff] %vm99_vm0, %v1157_v54  ;;  %v6932_v34 = vld [vmem:[#allocation72_spill] sm:$0xff] }
 0x37f   :  { %v3661_v23 = vsel %vm6784_vm11, %v3485_v0, 0.0 }
 0x380   :  { %v6093_v42 = vld [vmem:[#allocation1] sm:$0xff]  ;;  %v3662_v33 = vadd.f32 %v3661_v23, %v3660_v38  ;;  %v1076_v53 = vpop.f32.mrf.mxu1  ;;  %v3663_v38 = vsel %vm6784_vm11, %v3486_v1, 0.0 }
 0x381   :  { %2127 = vst [vmem:[#allocation1] ss:$9 sm:$0xff] %v1571_v49  ;;  %2425 = vperm.xlu0 %4005, %v5570_v31   ;;  %3935 = vmatmul.msk.f32.gmra.mxu3 %vm873_vm6, %v6816_v55  ;;  %v6934_v49 = vld [vmem:[#allocation63_spill] sm:$0xff]  ;;  %vm2613_vm6 = vcmask 917312  }
 0x382   :  { %2128 = vst [vmem:[#allocation1 + $0x1] ss:$9 sm:$0xff] %v1572_v39  ;;  %v3664_v31 = vadd.f32 %v3663_v38, %v3662_v33  ;;  %v1579_v0 = vperm.slane %v6934_v49, 0  ;;  %v1580_v23 = vperm.slane %v6934_v49, 1  ;;  %v1581_v33 = vperm.slane %v6934_v49, 2 }
 0x383   :  { %2129 = vst [vmem:[#allocation1 + $0x2] ss:$9 sm:$0xff] %v1573_v12  ;;  %2401 = vperm.xlu2 %4007, %v6932_v34   ;;  %v2952_v3 = vpop.xlane.xlu2 %2951  ;;  %v1586_v55 = vperm.slane %v6934_v49, 7 }
 0x384   :  { %2130 = vst [vmem:[#allocation1 + $0x3] ss:$9 sm:$0xff] %v1574_v15  ;;  %v2946_v22 = vpop.xlane.xlu1 %2945 }
 0x385   :  { %2131 = vst [vmem:[#allocation1 + $0x4] ss:$9 sm:$0xff] %v1575_v44  ;;  %v3487_v63 = vadd.f32 %v3087_v57, %v2946_v22  ;;  %v1160_v6 = vpop.f32.mrf.mxu3  ;;  %v2949_v39 = vpop.xlane.xlu0 %2948  ;;  %v1582_v44 = vperm.slane %v6934_v49, 3  ;;  %v1583_v57 = vperm.slane %v6934_v49, 4 }
 0x386   :  { %2132 = vst [vmem:[#allocation1 + $0x5] ss:$9 sm:$0xff] %v1576_v32  ;;  %2404 = vperm.xlu1 %4006, %v6933_v13   ;;  %v6935_v32 = vld [vmem:[#allocation77_spill] sm:$0xff] }
 0x387   :  { %2133 = vst [vmem:[#allocation1 + $0x6] ss:$9 sm:$0xff] %v1577_v56  ;;  %v3665_v61 = vsel %vm6784_vm11, %v3487_v63, 0.0  ;;  %v1585_v56 = vperm.slane %v6934_v49, 6 }
 0x388   :  { %2134 = vst [vmem:[#allocation1 + $0x7] ss:$9 sm:$0xff] %v1578_v60  ;;  %v3666_v11 = vadd.f32 %v3665_v61, %v3664_v31  ;;  %v1079_v52 = vpop.f32.mrf.mxu1 }
 0x389   :  { %1230 = vst.msk [vmem:[%s6726_s3 + $0x98] sm:$0xff] %vm99_vm0, %v1076_v53  ;;  %2434 = vperm.xlu0 %4005, %v5675_v20   ;;  %v1584_v20 = vperm.slane %v6934_v49, 5 }
 0x38a   :  { %1258 = vst.msk [vmem:[%s6726_s3 + $0x178] sm:$0xff] %vm99_vm0, %v1160_v6  ;;  %v6936_v6 = vld [vmem:[#allocation67_spill] sm:$0xff] }
 0x38b   :  { %1231 = vst.msk [vmem:[%s6726_s3 + $0xa0] sm:$0xff] %vm99_vm0, %v1079_v52  ;;  %2410 = vperm.xlu2 %4007, %v6935_v32   ;;  %v3093_v53 = vpop.xlane.xlu2 %3092  ;;  %v1588_v13 = vperm.slane %v6936_v6, 1 }
 0x38c   :  { %v3089_v12 = vpop.xlane.xlu1 %3088 }
 0x38d   :  { %v3488_v15 = vadd.f32 %v3089_v12, %v2949_v39  ;;  %v1163_v35 = vpop.f32.mrf.mxu3  ;;  %v3091_v7 = vpop.xlane.xlu0 %3090  ;;  %v1591_v12 = vperm.slane %v6936_v6, 4 }
 0x38e   :  { %2413 = vperm.xlu1 %4006, %v5391_v48   ;;  %v3489_v1 = vadd.f32 %v3091_v7, %v2952_v3  ;;  %1259 = vst.msk [vmem:[%s6726_s3 + $0x180] sm:$0xff] %vm99_vm0, %v1163_v35 }
 0x38f   :  { %v6137_v5 = vld [vmem:[#allocation1] sm:$0xff]  ;;  %v3667_v54 = vsel %vm6784_vm11, %v3488_v15, 0.0  ;;  %v1592_v15 = vperm.slane %v6936_v6, 5 }
 0x390   :  { %2136 = vst [vmem:[#allocation1] ss:$9 sm:$0xff] %v1579_v0  ;;  %v3668_v25 = vadd.f32 %v3667_v54, %v3666_v11  ;;  %v1082_v60 = vpop.f32.mrf.mxu1  ;;  %v3669_v48 = vsel %vm6784_vm11, %v3489_v1, 0.0  ;;  %v1587_v11 = vperm.slane %v6936_v6, 0  ;;  %v1589_v0 = vperm.slane %v6936_v6, 2 }
 0x391   :  { %2137 = vst [vmem:[#allocation1 + $0x1] ss:$9 sm:$0xff] %v1580_v23  ;;  %2443 = vperm.xlu0 %4005, %v5781_v2  }
 0x392   :  { %2138 = vst [vmem:[#allocation1 + $0x2] ss:$9 sm:$0xff] %v1581_v33  ;;  %v3670_v38 = vadd.f32 %v3669_v48, %v3668_v25 }
 0x393   :  { %2139 = vst [vmem:[#allocation1 + $0x3] ss:$9 sm:$0xff] %v1582_v44  ;;  %2419 = vperm.xlu2 %4007, %v5487_v21   ;;  %v2961_v2 = vpop.xlane.xlu2 %2960  ;;  %v1593_v44 = vperm.slane %v6936_v6, 6 }
 0x394   :  { %2140 = vst [vmem:[#allocation1 + $0x4] ss:$9 sm:$0xff] %v1583_v57  ;;  %v2955_v22 = vpop.xlane.xlu1 %2954 }
 0x395   :  { %2141 = vst [vmem:[#allocation1 + $0x5] ss:$9 sm:$0xff] %v1584_v20  ;;  %v3490_v63 = vadd.f32 %v3093_v53, %v2955_v22  ;;  %v1166_v31 = vpop.f32.mrf.mxu3  ;;  %v2958_v21 = vpop.xlane.xlu0 %2957 }
 0x396   :  { %2142 = vst [vmem:[#allocation1 + $0x6] ss:$9 sm:$0xff] %v1585_v56  ;;  %2422 = vperm.xlu1 %4006, %v5533_v17   ;;  %v1590_v17 = vperm.slane %v6936_v6, 3 }
 0x397   :  { %2143 = vst [vmem:[#allocation1 + $0x7] ss:$9 sm:$0xff] %v1586_v55  ;;  %v3671_v34 = vsel %vm6784_vm11, %v3490_v63, 0.0 }
 0x398   :  { %1232 = vst.msk [vmem:[%s6726_s3 + $0xa8] sm:$0xff] %vm99_vm0, %v1082_v60  ;;  %v3672_v61 = vadd.f32 %v3671_v34, %v3670_v38  ;;  %v1085_v3 = vpop.f32.mrf.mxu1  ;;  %v6937_v60 = vld [vmem:[#allocation69_spill] sm:$0xff] }
 0x399   :  { %1260 = vst.msk [vmem:[%s6726_s3 + $0x188] sm:$0xff] %vm99_vm0, %v1166_v31  ;;  %2452 = vperm.xlu0 %4005, %v5818_v28   ;;  %v1594_v28 = vperm.slane %v6936_v6, 7  ;;  %v1595_v7 = vperm.slane %v6937_v60, 0  ;;  %v1596_v1 = vperm.slane %v6937_v60, 1  ;;  %v1598_v31 = vperm.slane %v6937_v60, 3 }
 0x39a   :  { %1233 = vst.msk [vmem:[%s6726_s3 + $0xb0] sm:$0xff] %vm99_vm0, %v1085_v3 }
 0x39b   :  { %2428 = vperm.xlu2 %4007, %v5601_v59   ;;  %v3099_v32 = vpop.xlane.xlu2 %3098 }
 0x39c   :  { %v3095_v49 = vpop.xlane.xlu1 %3094 }
 0x39d   :  { %v3491_v39 = vadd.f32 %v3095_v49, %v2958_v21  ;;  %v1169_v54 = vpop.f32.mrf.mxu3  ;;  %v3097_v25 = vpop.xlane.xlu0 %3096 }
 0x39e   :  { %v6171_v52 = vld [vmem:[#allocation1] sm:$0xff]  ;;  %2431 = vperm.xlu1 %4006, %v5629_v40   ;;  %1261 = vst.msk [vmem:[%s6726_s3 + $0x190] sm:$0xff] %vm99_vm0, %v1169_v54  ;;  %v3492_v59 = vadd.f32 %v3097_v25, %v2961_v2  ;;  %v1599_v2 = vperm.slane %v6937_v60, 4 }
 0x39f   :  { %2145 = vst [vmem:[#allocation1] ss:$9 sm:$0xff] %v1587_v11  ;;  %v3673_v23 = vsel %vm6784_vm11, %v3491_v39, 0.0  ;;  %v1601_v11 = vperm.slane %v6937_v60, 6 }
 0x3a0   :  { %2146 = vst [vmem:[#allocation1 + $0x1] ss:$9 sm:$0xff] %v1588_v13  ;;  %v3674_v33 = vadd.f32 %v3673_v23, %v3672_v61  ;;  %v1088_v57 = vpop.f32.mrf.mxu1  ;;  %v3675_v40 = vsel %vm6784_vm11, %v3492_v59, 0.0  ;;  %v1602_v13 = vperm.slane %v6937_v60, 7  ;;  %v6938_v23 = vld [vmem:[#allocation73_spill] sm:$0xff] }
 0x3a1   :  { %2147 = vst [vmem:[#allocation1 + $0x2] ss:$9 sm:$0xff] %v1589_v0  ;;  %2461 = vperm.xlu0 %4005, %v5847_v45   ;;  %v1604_v54 = vperm.slane %v6938_v23, 1 }
 0x3a2   :  { %2148 = vst [vmem:[#allocation1 + $0x3] ss:$9 sm:$0xff] %v1590_v17  ;;  %v3676_v56 = vadd.f32 %v3675_v40, %v3674_v33  ;;  %v1607_v40 = vperm.slane %v6938_v23, 4 }
 0x3a3   :  { %2149 = vst [vmem:[#allocation1 + $0x4] ss:$9 sm:$0xff] %v1591_v12  ;;  %2437 = vperm.xlu2 %4007, %v5702_v26   ;;  %v2970_v45 = vpop.xlane.xlu2 %2969  ;;  %v1597_v26 = vperm.slane %v6937_v60, 2 }
 0x3a4   :  { %2150 = vst [vmem:[#allocation1 + $0x5] ss:$9 sm:$0xff] %v1592_v15  ;;  %v2964_v20 = vpop.xlane.xlu1 %2963  ;;  %v1603_v15 = vperm.slane %v6938_v23, 0 }
 0x3a5   :  { %2151 = vst [vmem:[#allocation1 + $0x6] ss:$9 sm:$0xff] %v1593_v44  ;;  %v3493_v35 = vadd.f32 %v3099_v32, %v2964_v20  ;;  %v1172_v55 = vpop.f32.mrf.mxu3  ;;  %v2967_v38 = vpop.xlane.xlu0 %2966 }
 0x3a6   :  { %2152 = vst [vmem:[#allocation1 + $0x7] ss:$9 sm:$0xff] %v1594_v28  ;;  %2440 = vperm.xlu1 %4006, %v5738_v58   ;;  %v1600_v58 = vperm.slane %v6937_v60, 5 }
 0x3a7   :  { %1234 = vst.msk [vmem:[%s6726_s3 + $0xb8] sm:$0xff] %vm99_vm0, %v1088_v57  ;;  %v3677_v53 = vsel %vm6784_vm11, %v3493_v35, 0.0  ;;  %v1606_v57 = vperm.slane %v6938_v23, 3 }
 0x3a8   :  { %v3678_v22 = vadd.f32 %v3677_v53, %v3676_v56  ;;  %1262 = vst.msk [vmem:[%s6726_s3 + $0x198] sm:$0xff] %vm99_vm0, %v1172_v55  ;;  %v1091_v48 = vpop.f32.mrf.mxu1  ;;  %v1608_v56 = vperm.slane %v6938_v23, 5  ;;  %v1610_v55 = vperm.slane %v6938_v23, 7 }
 0x3a9   :  { %2470 = vperm.xlu0 %4005, %v5922_v10   ;;  %1235 = vst.msk [vmem:[%s6726_s3 + $0xc0] sm:$0xff] %vm99_vm0, %v1091_v48 }
 0x3ab   :  { %2446 = vperm.xlu2 %4007, %v5792_v14   ;;  %v3105_v10 = vpop.xlane.xlu2 %3104 }
 0x3ac   :  { %v3101_v34 = vpop.xlane.xlu1 %3100 }
 0x3ad   :  { %v2153_v63 = vld [vmem:[#allocation1] sm:$0xff]  ;;  %v3494_v61 = vadd.f32 %v3101_v34, %v2967_v38  ;;  %v1175_v21 = vpop.f32.mrf.mxu3  ;;  %v3103_v14 = vpop.xlane.xlu0 %3102 }
 0x3ae   :  { %2154 = vst [vmem:[#allocation1] ss:$9 sm:$0xff] %v1595_v7  ;;  %2449 = vperm.xlu1 %4006, %v5804_v18   ;;  %v3495_v39 = vadd.f32 %v3103_v14, %v2970_v45 }
 0x3af   :  { %2155 = vst [vmem:[#allocation1 + $0x1] ss:$9 sm:$0xff] %v1596_v1  ;;  %v3679_v6 = vsel %vm6784_vm11, %v3494_v61, 0.0 }
 0x3b0   :  { %2156 = vst [vmem:[#allocation1 + $0x2] ss:$9 sm:$0xff] %v1597_v26  ;;  %v3680_v3 = vadd.f32 %v3679_v6, %v3678_v22  ;;  %v1094_v49 = vpop.f32.mrf.mxu1  ;;  %v3681_v18 = vsel %vm6784_vm11, %v3495_v39, 0.0  ;;  %v6939_v26 = vld [vmem:[#allocation75_spill] sm:$0xff] }
 0x3b1   :  { %2157 = vst [vmem:[#allocation1 + $0x3] ss:$9 sm:$0xff] %v1598_v31  ;;  %2479 = vperm.xlu0 %4005, %v6093_v42   ;;  %v1611_v38 = vperm.slane %v6939_v26, 0  ;;  %v1612_v31 = vperm.slane %v6939_v26, 1  ;;  %v1613_v6 = vperm.slane %v6939_v26, 2 }
 0x3b2   :  { %2158 = vst [vmem:[#allocation1 + $0x4] ss:$9 sm:$0xff] %v1599_v2  ;;  %v3682_v12 = vadd.f32 %v3681_v18, %v3680_v3  ;;  %v1614_v3 = vperm.slane %v6939_v26, 3 }
 0x3b3   :  { %2159 = vst [vmem:[#allocation1 + $0x5] ss:$9 sm:$0xff] %v1600_v58  ;;  %2455 = vperm.xlu2 %4007, %v5827_v46   ;;  %v2979_v42 = vpop.xlane.xlu2 %2978  ;;  %v1605_v46 = vperm.slane %v6938_v23, 2 }
 0x3b4   :  { %2160 = vst [vmem:[#allocation1 + $0x6] ss:$9 sm:$0xff] %v1601_v11  ;;  %v2973_v0 = vpop.xlane.xlu1 %2972 }
 0x3b5   :  { %2161 = vst [vmem:[#allocation1 + $0x7] ss:$9 sm:$0xff] %v1602_v13  ;;  %v3496_v17 = vadd.f32 %v3105_v10, %v2973_v0  ;;  %v1178_v44 = vpop.f32.mrf.mxu3  ;;  %v2976_v20 = vpop.xlane.xlu0 %2975  ;;  %v1615_v13 = vperm.slane %v6939_v26, 4  ;;  %v1617_v10 = vperm.slane %v6939_v26, 6 }
 0x3b6   :  { %1263 = vst.msk [vmem:[%s6726_s3 + $0x1a0] sm:$0xff] %vm99_vm0, %v1175_v21  ;;  %2458 = vperm.xlu1 %4006, %v5837_v37   ;;  %v1609_v37 = vperm.slane %v6938_v23, 6  ;;  %v1616_v21 = vperm.slane %v6939_v26, 5 }
 0x3b7   :  { %1236 = vst.msk [vmem:[%s6726_s3 + $0xc8] sm:$0xff] %vm99_vm0, %v1094_v49  ;;  %v3683_v33 = vsel %vm6784_vm11, %v3496_v17, 0.0  ;;  %v1618_v49 = vperm.slane %v6939_v26, 7  ;;  %v6299_v17 = vadd.s32 4294967288, %v4898_v30  ;;  %v6335_v26 = vadd.s32 4294967264, %v4898_v30 }
 0x3b8   :  { %1264 = vst.msk [vmem:[%s6726_s3 + $0x1a8] sm:$0xff] %vm99_vm0, %v1178_v44  ;;  %v1097_v32 = vpop.f32.mrf.mxu1  ;;  %v3684_v25 = vadd.f32 %v3683_v33, %v3682_v12 }
 0x3b9   :  { %2488 = vperm.xlu0 %4005, %v2153_v63   ;;  %1237 = vst.msk [vmem:[%s6726_s3 + $0xd0] sm:$0xff] %vm99_vm0, %v1097_v32 }
 0x3bb   :  { %2464 = vperm.xlu2 %4007, %v5857_v29   ;;  %v3111_v22 = vpop.xlane.xlu2 %3110 }
 0x3bc   :  { %v6234_v28 = vld [vmem:[#allocation1] sm:$0xff]  ;;  %v3107_v59 = vpop.xlane.xlu1 %3106 }
 0x3bd   :  { %2163 = vst [vmem:[#allocation1] ss:$9 sm:$0xff] %v1603_v15  ;;  %v3497_v35 = vadd.f32 %v3107_v59, %v2976_v20  ;;  %v1181_v7 = vpop.f32.mrf.mxu3  ;;  %v3109_v29 = vpop.xlane.xlu0 %3108  ;;  %v6303_v15 = vadd.s32 4294967280, %v4898_v30 }
 0x3be   :  { %2164 = vst [vmem:[#allocation1 + $0x1] ss:$9 sm:$0xff] %v1604_v54  ;;  %2467 = vperm.xlu1 %4006, %v5872_v19   ;;  %v3498_v19 = vadd.f32 %v3109_v29, %v2979_v42 }
 0x3bf   :  { %2165 = vst [vmem:[#allocation1 + $0x2] ss:$9 sm:$0xff] %v1605_v46  ;;  %v3685_v53 = vsel %vm6784_vm11, %v3497_v35, 0.0 }
 0x3c0   :  { %2166 = vst [vmem:[#allocation1 + $0x3] ss:$9 sm:$0xff] %v1606_v57  ;;  %v3686_v60 = vadd.f32 %v3685_v53, %v3684_v25  ;;  %v1100_v45 = vpop.f32.mrf.mxu1  ;;  %v3687_v48 = vsel %vm6784_vm11, %v3498_v19, 0.0 }
 0x3c1   :  { %2167 = vst [vmem:[#allocation1 + $0x4] ss:$9 sm:$0xff] %v1607_v40 }
 0x3c2   :  { %2168 = vst [vmem:[#allocation1 + $0x5] ss:$9 sm:$0xff] %v1608_v56  ;;  %v3688_v34 = vadd.f32 %v3687_v48, %v3686_v60  ;;  %v6941_v56 = vld [vmem:[#allocation78_spill] sm:$0xff] }
 0x3c3   :  { %2169 = vst [vmem:[#allocation1 + $0x6] ss:$9 sm:$0xff] %v1609_v37  ;;  %2473 = vperm.xlu2 %4007, %v5991_v41   ;;  %v2375_v23 = vpop.permute.xlu2 %2374  ;;  %v1627_v37 = vperm.slane %v6941_v56, 0  ;;  %v1628_v53 = vperm.slane %v6941_v56, 1  ;;  %v1629_v60 = vperm.slane %v6941_v56, 2  ;;  %v1631_v29 = vperm.slane %v6941_v56, 4 }
 0x3c4   :  { %2170 = vst [vmem:[#allocation1 + $0x7] ss:$9 sm:$0xff] %v1610_v55  ;;  %v2982_v1 = vpop.xlane.xlu1 %2981  ;;  %v2564_v46 = vperm.slane %v2375_v23, %v6299_v17  ;;  %v1633_v19 = vperm.slane %v6941_v56, 6  ;;  %v1634_v48 = vperm.slane %v6941_v56, 7 }
 0x3c5   :  { %1265 = vst.msk [vmem:[%s6726_s3 + $0x1b0] sm:$0xff] %vm99_vm0, %v1181_v7  ;;  %v3499_v63 = vadd.f32 %v3111_v22, %v2982_v1  ;;  %v1184_v58 = vpop.f32.mrf.mxu3  ;;  %v6326_v7 = vadd.s32 4294967272, %v4898_v30  ;;  %v1630_v22 = vperm.slane %v6941_v56, 3  ;;  %v1632_v1 = vperm.slane %v6941_v56, 5 }
 0x3c6   :  { %1238 = vst.msk [vmem:[%s6726_s3 + $0xd8] sm:$0xff] %vm99_vm0, %v1100_v45  ;;  %2476 = vperm.xlu1 %4006, %v6047_v4  }
 0x3c7   :  { %v3689_v2 = vsel %vm6784_vm11, %v3499_v63, 0.0  ;;  %1266 = vst.msk [vmem:[%s6726_s3 + $0x1b8] sm:$0xff] %vm99_vm0, %v1184_v58  ;;  %vm6785_vm11 = vcmask 1048512  }
 0x3c8   :  { %v6268_v11 = vadd.f32 %v3689_v2, %v3688_v34  ;;  %v1103_v41 = vpop.f32.mrf.mxu1 }
 0x3c9   :  { %1239 = vst.msk [vmem:[%s6726_s3 + $0xe0] sm:$0xff] %vm99_vm0, %v1103_v41 }
 0x3cb   :  { %v2171_v61 = vld [vmem:[#allocation1] sm:$0xff]  ;;  %2482 = vperm.xlu2 %4007, %v6137_v5   ;;  %v2381_v45 = vpop.permute.xlu2 %2380 }
 0x3cc   :  { %2172 = vst [vmem:[#allocation1] ss:$9 sm:$0xff] %v1611_v38  ;;  %v6940_v5 = vld [vmem:[#allocation76_spill] sm:$0xff]  ;;  %v2572_v63 = vperm.slane %v2381_v45, %v6326_v7 }
 0x3cd   :  { %2173 = vst [vmem:[#allocation1 + $0x1] ss:$9 sm:$0xff] %v1612_v31  ;;  %v1187_v4 = vpop.f32.mrf.mxu3  ;;  %v1619_v0 = vperm.slane %v6940_v5, 0  ;;  %v1621_v18 = vperm.slane %v6940_v5, 2  ;;  %v1622_v12 = vperm.slane %v6940_v5, 3  ;;  %v1623_v33 = vperm.slane %v6940_v5, 4 }
 0x3ce   :  { %2174 = vst [vmem:[#allocation1 + $0x2] ss:$9 sm:$0xff] %v1613_v6  ;;  %2485 = vperm.xlu1 %4006, %v6171_v52   ;;  %v1620_v52 = vperm.slane %v6940_v5, 1  ;;  %v1624_v54 = vperm.slane %v6940_v5, 5  ;;  %v1625_v42 = vperm.slane %v6940_v5, 6  ;;  %v1626_v57 = vperm.slane %v6940_v5, 7 }
 0x3cf   :  { %2175 = vst [vmem:[#allocation1 + $0x3] ss:$9 sm:$0xff] %v1614_v3  ;;  %v1635_v6 = vperm.slane %v5406_v8, 0  ;;  %v1636_v3 = vperm.slane %v5406_v8, 1  ;;  %v1641_v5 = vperm.slane %v5406_v8, 6 }
 0x3d0   :  { %2176 = vst [vmem:[#allocation1 + $0x4] ss:$9 sm:$0xff] %v1615_v13  ;;  %v1106_v14 = vpop.f32.mrf.mxu1  ;;  %v1637_v13 = vperm.slane %v5406_v8, 2 }
 0x3d1   :  { %2177 = vst [vmem:[#allocation1 + $0x5] ss:$9 sm:$0xff] %v1616_v21  ;;  %v6352_v21 = vadd.s32 4294967256, %v4898_v30 }
 0x3d2   :  { %2178 = vst [vmem:[#allocation1 + $0x6] ss:$9 sm:$0xff] %v1617_v10  ;;  %v1638_v10 = vperm.slane %v5406_v8, 3 }
 0x3d3   :  { %2179 = vst [vmem:[#allocation1 + $0x7] ss:$9 sm:$0xff] %v1618_v49  ;;  %2491 = vperm.xlu2 %4007, %v6234_v28   ;;  %v2378_v44 = vpop.permute.xlu0 %2377  ;;  %v2387_v49 = vpop.permute.xlu2 %2386 }
 0x3d4   :  { %1267 = vst.msk [vmem:[%s6726_s3 + $0x1c0] sm:$0xff] %vm99_vm0, %v1187_v4  ;;  %v2568_v25 = vperm.slane %v2378_v44, %v6303_v15  ;;  %v1639_v4 = vperm.slane %v5406_v8, 4 }
 0x3d5   :  { %1240 = vst.msk [vmem:[%s6726_s3 + $0xe8] sm:$0xff] %vm99_vm0, %v1106_v14  ;;  %v1190_v40 = vpop.f32.mrf.mxu3  ;;  %v1640_v14 = vperm.slane %v5406_v8, 5 }
 0x3d6   :  { %2494 = vperm.xlu1 %4006, %v2171_v61   ;;  %1268 = vst.msk [vmem:[%s6726_s3 + $0x1c8] sm:$0xff] %vm99_vm0, %v1190_v40  ;;  %v1649_v40 = vperm.slane %v5459_v51, 6 }
 0x3d8   :  { %v2372_v28 = vpop.permute.xlu1 %2371  ;;  %v1109_v20 = vpop.f32.mrf.mxu1 }
 0x3d9   :  { %v2562_v32 = vperm.slane %v2372_v28, %v4898_v30  ;;  %1241 = vst.msk [vmem:[%s6726_s3 + $0xf0] sm:$0xff] %vm99_vm0, %v1109_v20  ;;  %v1644_v28 = vperm.slane %v5459_v51, 1  ;;  %v1647_v20 = vperm.slane %v5459_v51, 4 }
 0x3da   :  { %v2180_v39 = vld [vmem:[#allocation1] sm:$0xff] }
 0x3db   :  { %2181 = vst [vmem:[#allocation1] ss:$9 sm:$0xff] %v1619_v0  ;;  %2497 = vperm.xlu0 %4005, %v2180_v39   ;;  %v2566_v59 = vsel %vm2565_vm8, %v2564_v46, %v2562_v32  ;;  %v2580_v0 = vperm.slane %v2387_v49, %v6352_v21  ;;  %v6361_v39 = vadd.s32 4294967248, %v4898_v30  ;;  %v1645_v46 = vperm.slane %v5459_v51, 2 }
 0x3dc   :  { %2182 = vst [vmem:[#allocation1 + $0x1] ss:$9 sm:$0xff] %v1620_v52  ;;  %v2570_v35 = vsel %vm2569_vm9, %v2568_v25, %v2566_v59  ;;  %v1642_v52 = vperm.slane %v5406_v8, 7  ;;  %v6378_v32 = vadd.s32 4294967240, %v4898_v30  ;;  %v2393_v25 = vpop.permute.xlu2 %2392  ;;  %v1648_v59 = vperm.slane %v5459_v51, 5 }
 0x3dd   :  { %2183 = vst [vmem:[#allocation1 + $0x2] ss:$9 sm:$0xff] %v1621_v18  ;;  %v2574_v34 = vsel %vm2573_vm10, %v2572_v63, %v2570_v35  ;;  %v1193_v61 = vpop.f32.mrf.mxu3  ;;  %v6385_v35 = vadd.s32 4294967224, %v4898_v30  ;;  %v1658_v49 = vperm.slane %v5471_v47, 7 }
 0x3de   :  { %2184 = vst [vmem:[#allocation1 + $0x3] ss:$9 sm:$0xff] %v1622_v12  ;;  %v2588_v56 = vperm.slane %v2393_v25, %v6378_v32  ;;  %v1663_v25 = vperm.slane %v5544_v27, 4 }
 0x3df   :  { %2185 = vst [vmem:[#allocation1 + $0x4] ss:$9 sm:$0xff] %v1623_v33 }
 0x3e0   :  { %2186 = vst [vmem:[#allocation1 + $0x5] ss:$9 sm:$0xff] %v1624_v54  ;;  %v1112_v38 = vpop.f32.mrf.mxu1  ;;  %v2384_v31 = vpop.permute.xlu1 %2383  ;;  %v1643_v54 = vperm.slane %v5459_v51, 0 }
 0x3e1   :  { %2187 = vst [vmem:[#allocation1 + $0x6] ss:$9 sm:$0xff] %v1625_v42  ;;  %v2576_v2 = vperm.slane %v2384_v31, %v6335_v26  ;;  %v1653_v31 = vperm.slane %v5471_v47, 2 }
 0x3e2   :  { %2188 = vst [vmem:[#allocation1 + $0x7] ss:$9 sm:$0xff] %v1626_v57  ;;  %v1646_v57 = vperm.slane %v5459_v51, 3 }
 0x3e3   :  { %1269 = vst.msk [vmem:[%s6726_s3 + $0x1d0] sm:$0xff] %vm99_vm0, %v1193_v61  ;;  %v2578_v58 = vsel %vm2577_vm12, %v2576_v2, %v2574_v34  ;;  %v6409_v61 = vadd.s32 4294967216, %v4898_v30  ;;  %v1654_v2 = vperm.slane %v5471_v47, 3 }
 0x3e4   :  { %1242 = vst.msk [vmem:[%s6726_s3 + $0xf8] sm:$0xff] %vm99_vm0, %v1112_v38  ;;  %v2582_v12 = vsel %vm2581_vm13, %v2580_v0, %v2578_v58  ;;  %v1652_v38 = vperm.slane %v5471_v47, 1  ;;  %v2402_v58 = vpop.permute.xlu2 %2401 }
 0x3e5   :  { %v1196_v33 = vpop.f32.mrf.mxu3 }
 0x3e6   :  { %1270 = vst.msk [vmem:[%s6726_s3 + $0x1d8] sm:$0xff] %vm99_vm0, %v1196_v33 }
 0x3e8   :  { %v1115_v18 = vpop.f32.mrf.mxu1  ;;  %v2390_v23 = vpop.permute.xlu1 %2389 }
 0x3e9   :  { %v2189_v55 = vld [vmem:[#allocation1] sm:$0xff]  ;;  %v2584_v44 = vperm.slane %v2390_v23, %v6361_v39  ;;  %1243 = vst.msk [vmem:[%s6726_s3 + $0x100] sm:$0xff] %vm99_vm0, %v1115_v18 }
 0x3ea   :  { %2190 = vst [vmem:[#allocation1] ss:$9 sm:$0xff] %v1627_v37  ;;  %2500 = vperm.xlu2 %4007, %v2189_v55   ;;  %v1650_v37 = vperm.slane %v5459_v51, 7 }
 0x3eb   :  { %2191 = vst [vmem:[#allocation1 + $0x1] ss:$9 sm:$0xff] %v1628_v53  ;;  %v2586_v8 = vsel %vm2585_vm14, %v2584_v44, %v2582_v12  ;;  %v2399_v53 = vpop.permute.xlu0 %2398  ;;  %v1659_v44 = vperm.slane %v5544_v27, 0 }
 0x3ec   :  { %2192 = vst [vmem:[#allocation1 + $0x2] ss:$9 sm:$0xff] %v1629_v60  ;;  %v6390_v60 = vadd.s32 4294967232, %v4898_v30  ;;  %v2590_v45 = vsel %vm2589_vm15, %v2588_v56, %v2586_v8  ;;  %v1660_v8 = vperm.slane %v5544_v27, 1 }
 0x3ed   :  { %2193 = vst [vmem:[#allocation1 + $0x3] ss:$9 sm:$0xff] %v1630_v22  ;;  %v1199_v55 = vpop.f32.mrf.mxu3 }
 0x3ee   :  { %2194 = vst [vmem:[#allocation1 + $0x4] ss:$9 sm:$0xff] %v1631_v29 }
 0x3ef   :  { %2195 = vst [vmem:[#allocation1 + $0x5] ss:$9 sm:$0xff] %v1632_v1 }
 0x3f0   :  { %2196 = vst [vmem:[#allocation1 + $0x6] ss:$9 sm:$0xff] %v1633_v19  ;;  %v1118_v22 = vpop.f32.mrf.mxu1  ;;  %v2396_v29 = vpop.permute.xlu1 %2395  ;;  %v2596_v19 = vperm.slane %v2399_v53, %v6385_v35 }
 0x3f1   :  { %2197 = vst [vmem:[#allocation1 + $0x7] ss:$9 sm:$0xff] %v1634_v48  ;;  %v2592_v1 = vperm.slane %v2396_v29, %v6390_v60  ;;  %v1651_v48 = vperm.slane %v5471_v47, 0 }
 0x3f2   :  { %1271 = vst.msk [vmem:[%s6726_s3 + $0x1e0] sm:$0xff] %vm99_vm0, %v1199_v55 }
 0x3f3   :  { %1244 = vst.msk [vmem:[%s6726_s3 + $0x108] sm:$0xff] %vm99_vm0, %v1118_v22  ;;  %v2594_v51 = vsel %vm2593_vm1, %v2592_v1, %v2590_v45  ;;  %v6452_v22 = vadd.s32 4294967184, %v4898_v30 }
 0x3f4   :  { %v2598_v63 = vsel %vm2597_vm2, %v2596_v19, %v2594_v51 }
 0x3f8   :  { %v2198_v41 = vld [vmem:[#allocation1] sm:$0xff]  ;;  %v1121_v0 = vpop.f32.mrf.mxu1  ;;  %v2405_v18 = vpop.permute.xlu1 %2404 }
 0x3f9   :  { %2199 = vst [vmem:[#allocation1] ss:$9 sm:$0xff] %v1635_v6  ;;  %2503 = vperm.xlu1 %4006, %v2198_v41   ;;  %v1655_v6 = vperm.slane %v5471_v47, 4  ;;  %v1657_v41 = vperm.slane %v5471_v47, 6 }
 0x3fa   :  { %2200 = vst [vmem:[#allocation1 + $0x1] ss:$9 sm:$0xff] %v1636_v3  ;;  %v1656_v3 = vperm.slane %v5471_v47, 5 }
 0x3fb   :  { %2201 = vst [vmem:[#allocation1 + $0x2] ss:$9 sm:$0xff] %v1637_v13  ;;  %v6416_v13 = vadd.s32 4294967200, %v4898_v30 }
 0x3fc   :  { %2202 = vst [vmem:[#allocation1 + $0x3] ss:$9 sm:$0xff] %v1638_v10  ;;  %v2600_v10 = vperm.slane %v2402_v58, %v6409_v61  ;;  %v1671_v58 = vperm.slane %v5578_v9, 4 }
 0x3fd   :  { %2203 = vst [vmem:[#allocation1 + $0x4] ss:$9 sm:$0xff] %v1639_v4  ;;  %v2408_v4 = vpop.permute.xlu0 %2407 }
 0x3fe   :  { %2204 = vst [vmem:[#allocation1 + $0x5] ss:$9 sm:$0xff] %v1640_v14  ;;  %v1202_v14 = vpop.f32.mrf.mxu3  ;;  %v2608_v23 = vperm.slane %v2408_v4, %v6416_v13 }
 0x3ff   :  { %2205 = vst [vmem:[#allocation1 + $0x6] ss:$9 sm:$0xff] %v1641_v5  ;;  %v6421_v5 = vadd.s32 4294967208, %v4898_v30 }
 0x400   :  { %2206 = vst [vmem:[#allocation1 + $0x7] ss:$9 sm:$0xff] %v1642_v52  ;;  %v2602_v52 = vsel %vm2601_vm3, %v2600_v10, %v2598_v63  ;;  %v1124_v45 = vpop.f32.mrf.mxu1  ;;  %v2414_v1 = vpop.permute.xlu1 %2413  ;;  %v1674_v10 = vperm.slane %v5578_v9, 7 }
 0x401   :  { %v2604_v12 = vperm.slane %v2405_v18, %v6421_v5  ;;  %1272 = vst.msk [vmem:[%s6726_s3 + $0x1e8] sm:$0xff] %vm99_vm0, %v1202_v14  ;;  %v2616_v19 = vperm.slane %v2414_v1, %v6452_v22 }
 0x402   :  { %1245 = vst.msk [vmem:[%s6726_s3 + $0x110] sm:$0xff] %vm99_vm0, %v1121_v0 }
 0x403   :  { %v2606_v47 = vsel %vm2605_vm4, %v2604_v12, %v2602_v52  ;;  %1246 = vst.msk [vmem:[%s6726_s3 + $0x118] sm:$0xff] %vm99_vm0, %v1124_v45 }
 0x404   :  { %v2610_v33 = vsel %vm2609_vm5, %v2608_v23, %v2606_v47  ;;  %v1675_v47 = vperm.slane %v5588_v24, 0 }
 0x405   :  { %v2417_v53 = vpop.permute.xlu0 %2416 }
 0x406   :  { %v1205_v55 = vpop.f32.mrf.mxu3 }
 0x407   :  { %v2207_v42 = vld [vmem:[#allocation1] sm:$0xff]  ;;  %1273 = vst.msk [vmem:[%s6726_s3 + $0x1f0] sm:$0xff] %vm99_vm0, %v1205_v55 }
 0x408   :  { %2506 = vperm.xlu0 %4005, %v2207_v42   ;;  %2208 = vst [vmem:[#allocation1] ss:$9 sm:$0xff] %v1643_v54  ;;  %v6440_v42 = vadd.s32 4294967192, %v4898_v30  ;;  %v1127_v14 = vpop.f32.mrf.mxu1  ;;  %v2423_v0 = vpop.permute.xlu1 %2422 }
 0x409   :  { %2209 = vst [vmem:[#allocation1 + $0x1] ss:$9 sm:$0xff] %v1644_v28  ;;  %v1661_v28 = vperm.slane %v5544_v27, 2  ;;  %v2624_v18 = vperm.slane %v2423_v0, %v6299_v17 }
 0x40a   :  { %2210 = vst [vmem:[#allocation1 + $0x2] ss:$9 sm:$0xff] %v1645_v46  ;;  %v1662_v46 = vperm.slane %v5544_v27, 3 }
 0x40b   :  { %2211 = vst [vmem:[#allocation1 + $0x3] ss:$9 sm:$0xff] %v1646_v57  ;;  %v2411_v57 = vpop.permute.xlu2 %2410 }
 0x40c   :  { %2212 = vst [vmem:[#allocation1 + $0x4] ss:$9 sm:$0xff] %v1647_v20  ;;  %v1664_v20 = vperm.slane %v5544_v27, 5  ;;  %v2612_v56 = vperm.slane %v2411_v57, %v6440_v42  ;;  %v1680_v57 = vperm.slane %v5588_v24, 5 }
 0x40d   :  { %2213 = vst [vmem:[#allocation1 + $0x5] ss:$9 sm:$0xff] %v1648_v59  ;;  %v1665_v59 = vperm.slane %v5544_v27, 6 }
 0x40e   :  { %2214 = vst [vmem:[#allocation1 + $0x6] ss:$9 sm:$0xff] %v1649_v40  ;;  %v6447_v40 = vadd.s32 4294967176, %v4898_v30  ;;  %v2614_v29 = vsel %vm2613_vm6, %v2612_v56, %v2610_v33  ;;  %v1208_v4 = vpop.f32.mrf.mxu3  ;;  %v1676_v33 = vperm.slane %v5588_v24, 1  ;;  %v1682_v56 = vperm.slane %v5588_v24, 7 }
 0x40f   :  { %2215 = vst [vmem:[#allocation1 + $0x7] ss:$9 sm:$0xff] %v1650_v37  ;;  %v1666_v37 = vperm.slane %v5544_v27, 7  ;;  %v2618_v27 = vsel %vm2617_vm7, %v2616_v19, %v2614_v29  ;;  %v6942_v19 = vld [vmem:[#allocation52_spill] sm:$0xff] }
 0x410   :  { %v2620_v51 = vperm.slane %v2417_v53, %v6447_v40  ;;  %1274 = vst.msk [vmem:[%s6726_s3 + $0x1f8] sm:$0xff] %vm99_vm0, %v1208_v4  ;;  %v2432_v53 = vpop.permute.xlu1 %2431 }
 0x411   :  { %1247 = vst.msk [vmem:[%s6726_s3 + $0x120] sm:$0xff] %vm99_vm0, %v1127_v14  ;;  %v2630_v55 = vperm.slane %v2432_v53, %v6335_v26 }
 0x412   :  { %v6467_v63 = vsel %vm6785_vm11, %v2620_v51, %v2618_v27  ;;  %v1683_v51 = vperm.slane %v6942_v19, 0  ;;  %v1684_v27 = vperm.slane %v6942_v19, 1 }
 0x416   :  { %v2216_v34 = vld [vmem:[#allocation1] sm:$0xff] }
 0x417   :  { %2509 = vperm.xlu2 %4007, %v2216_v34   ;;  %2217 = vst [vmem:[#allocation1] ss:$9 sm:$0xff] %v1651_v48  ;;  %v1667_v48 = vperm.slane %v5578_v9, 0 }
 0x418   :  { %2218 = vst [vmem:[#allocation1 + $0x1] ss:$9 sm:$0xff] %v1652_v38  ;;  %v1668_v38 = vperm.slane %v5578_v9, 1 }
 0x419   :  { %2219 = vst [vmem:[#allocation1 + $0x2] ss:$9 sm:$0xff] %v1653_v31  ;;  %v1669_v31 = vperm.slane %v5578_v9, 2 }
 0x41a   :  { %2220 = vst [vmem:[#allocation1 + $0x3] ss:$9 sm:$0xff] %v1654_v2  ;;  %v1670_v2 = vperm.slane %v5578_v9, 3 }
 0x41b   :  { %2221 = vst [vmem:[#allocation1 + $0x4] ss:$9 sm:$0xff] %v1655_v6  ;;  %v1672_v6 = vperm.slane %v5578_v9, 5 }
 0x41c   :  { %2222 = vst [vmem:[#allocation1 + $0x5] ss:$9 sm:$0xff] %v1656_v3  ;;  %v1673_v3 = vperm.slane %v5578_v9, 6 }
 0x41d   :  { %2223 = vst [vmem:[#allocation1 + $0x6] ss:$9 sm:$0xff] %v1657_v41  ;;  %v2420_v41 = vpop.permute.xlu2 %2419 }
 0x41e   :  { %2224 = vst [vmem:[#allocation1 + $0x7] ss:$9 sm:$0xff] %v1658_v49  ;;  %v2426_v49 = vpop.permute.xlu0 %2425  ;;  %v2623_v52 = vperm.slane %v2420_v41, %v4898_v30  ;;  %v1690_v41 = vperm.slane %v6942_v19, 7 }
 0x41f   :  { %v2626_v12 = vperm.slane %v2426_v49, %v6303_v15  ;;  %v2441_v49 = vpop.permute.xlu1 %2440 }
 0x420   :  { %v2625_v9 = vsel %vm2565_vm8, %v2624_v18, %v2623_v52  ;;  %v2636_v4 = vperm.slane %v2441_v49, %v6378_v32  ;;  %v6943_v18 = vld [vmem:[#allocation60_spill] sm:$0xff] }
 0x421   :  { %v2627_v23 = vsel %vm2569_vm9, %v2626_v12, %v2625_v9  ;;  %v1691_v12 = vperm.slane %v6943_v18, 0  ;;  %v1692_v9 = vperm.slane %v6943_v18, 1 }
 0x425   :  { %v2225_v54 = vld [vmem:[#allocation1] sm:$0xff] }
 0x426   :  { %2512 = vperm.xlu1 %4006, %v2225_v54   ;;  %2226 = vst [vmem:[#allocation1] ss:$9 sm:$0xff] %v1659_v44  ;;  %v2429_v54 = vpop.permute.xlu2 %2428 }
 0x427   :  { %2227 = vst [vmem:[#allocation1 + $0x1] ss:$9 sm:$0xff] %v1660_v8  ;;  %v1677_v8 = vperm.slane %v5588_v24, 2 }
 0x428   :  { %2228 = vst [vmem:[#allocation1 + $0x2] ss:$9 sm:$0xff] %v1661_v28  ;;  %v1678_v28 = vperm.slane %v5588_v24, 3 }
 0x429   :  { %2229 = vst [vmem:[#allocation1 + $0x3] ss:$9 sm:$0xff] %v1662_v46  ;;  %v1679_v46 = vperm.slane %v5588_v24, 4 }
 0x42a   :  { %2230 = vst [vmem:[#allocation1 + $0x4] ss:$9 sm:$0xff] %v1663_v25  ;;  %v2628_v25 = vperm.slane %v2429_v54, %v6326_v7  ;;  %v1696_v54 = vperm.slane %v6943_v18, 5 }
 0x42b   :  { %2231 = vst [vmem:[#allocation1 + $0x5] ss:$9 sm:$0xff] %v1664_v20  ;;  %v1681_v20 = vperm.slane %v5588_v24, 6  ;;  %v1685_v24 = vperm.slane %v6942_v19, 2 }
 0x42c   :  { %2232 = vst [vmem:[#allocation1 + $0x6] ss:$9 sm:$0xff] %v1665_v59  ;;  %v2435_v59 = vpop.permute.xlu0 %2434 }
 0x42d   :  { %2233 = vst [vmem:[#allocation1 + $0x7] ss:$9 sm:$0xff] %v1666_v37  ;;  %v2629_v37 = vsel %vm2573_vm10, %v2628_v25, %v2627_v23  ;;  %v2632_v45 = vperm.slane %v2435_v59, %v6352_v21  ;;  %v1698_v25 = vperm.slane %v6943_v18, 7  ;;  %v2450_v59 = vpop.permute.xlu1 %2449 }
 0x42e   :  { %v2631_v29 = vsel %vm2577_vm12, %v2630_v55, %v2629_v37 }
 0x42f   :  { %v2633_v1 = vsel %vm2581_vm13, %v2632_v45, %v2631_v29  ;;  %v6944_v29 = vld [vmem:[#allocation64_spill] sm:$0xff] }
 0x434   :  { %v2234_v34 = vld [vmem:[#allocation1] sm:$0xff] }
 0x435   :  { %2515 = vperm.xlu0 %4005, %v2234_v34   ;;  %2235 = vst [vmem:[#allocation1] ss:$9 sm:$0xff] %v1667_v48  ;;  %v1686_v34 = vperm.slane %v6942_v19, 3 }
 0x436   :  { %2236 = vst [vmem:[#allocation1 + $0x1] ss:$9 sm:$0xff] %v1668_v38  ;;  %v2438_v38 = vpop.permute.xlu2 %2437 }
 0x437   :  { %2237 = vst [vmem:[#allocation1 + $0x2] ss:$9 sm:$0xff] %v1669_v31  ;;  %v1687_v31 = vperm.slane %v6942_v19, 4 }
 0x438   :  { %2238 = vst [vmem:[#allocation1 + $0x3] ss:$9 sm:$0xff] %v1670_v2  ;;  %v1688_v2 = vperm.slane %v6942_v19, 5 }
 0x439   :  { %2239 = vst [vmem:[#allocation1 + $0x4] ss:$9 sm:$0xff] %v1671_v58  ;;  %v2634_v58 = vperm.slane %v2438_v38, %v6361_v39  ;;  %v1704_v38 = vperm.slane %v6944_v29, 5 }
 0x43a   :  { %2240 = vst [vmem:[#allocation1 + $0x5] ss:$9 sm:$0xff] %v1672_v6  ;;  %v1689_v6 = vperm.slane %v6942_v19, 6  ;;  %v1700_v19 = vperm.slane %v6944_v29, 1 }
 0x43b   :  { %2241 = vst [vmem:[#allocation1 + $0x6] ss:$9 sm:$0xff] %v1673_v3  ;;  %v2444_v3 = vpop.permute.xlu0 %2443 }
 0x43c   :  { %2242 = vst [vmem:[#allocation1 + $0x7] ss:$9 sm:$0xff] %v1674_v10  ;;  %v2635_v10 = vsel %vm2585_vm14, %v2634_v58, %v2633_v1  ;;  %v2638_v14 = vperm.slane %v2444_v3, %v6390_v60  ;;  %v1699_v1 = vperm.slane %v6944_v29, 0  ;;  %v1706_v58 = vperm.slane %v6944_v29, 7 }
 0x43d   :  { %v2637_v0 = vsel %vm2589_vm15, %v2636_v4, %v2635_v10 }
 0x43e   :  { %v2639_v52 = vsel %vm2593_vm1, %v2638_v14, %v2637_v0 }
 0x443   :  { %v2243_v44 = vld [vmem:[#allocation1] sm:$0xff] }
 0x444   :  { %2518 = vperm.xlu2 %4007, %v2243_v44   ;;  %2244 = vst [vmem:[#allocation1] ss:$9 sm:$0xff] %v1675_v47  ;;  %v1693_v47 = vperm.slane %v6943_v18, 2  ;;  %v1694_v44 = vperm.slane %v6943_v18, 3 }
 0x445   :  { %2245 = vst [vmem:[#allocation1 + $0x1] ss:$9 sm:$0xff] %v1676_v33  ;;  %v2447_v33 = vpop.permute.xlu2 %2446 }
 0x446   :  { %2246 = vst [vmem:[#allocation1 + $0x2] ss:$9 sm:$0xff] %v1677_v8  ;;  %v1695_v8 = vperm.slane %v6943_v18, 4 }
 0x447   :  { %2247 = vst [vmem:[#allocation1 + $0x3] ss:$9 sm:$0xff] %v1678_v28  ;;  %v2640_v28 = vperm.slane %v2447_v33, %v6385_v35 }
 0x448   :  { %2248 = vst [vmem:[#allocation1 + $0x4] ss:$9 sm:$0xff] %v1679_v46  ;;  %v1697_v46 = vperm.slane %v6943_v18, 6  ;;  %v6945_v18 = vld [vmem:[#allocation61_spill] sm:$0xff] }
 0x449   :  { %2249 = vst [vmem:[#allocation1 + $0x5] ss:$9 sm:$0xff] %v1680_v57  ;;  %v2453_v57 = vpop.permute.xlu0 %2452  ;;  %v1710_v33 = vperm.slane %v6945_v18, 3 }
 0x44a   :  { %2250 = vst [vmem:[#allocation1 + $0x6] ss:$9 sm:$0xff] %v1681_v20  ;;  %v2641_v20 = vsel %vm2597_vm2, %v2640_v28, %v2639_v52  ;;  %v2644_v37 = vperm.slane %v2453_v57, %v6421_v5  ;;  %v1713_v28 = vperm.slane %v6945_v18, 6 }
 0x44b   :  { %2251 = vst [vmem:[#allocation1 + $0x7] ss:$9 sm:$0xff] %v1682_v56  ;;  %v2642_v56 = vperm.slane %v2450_v59, %v6409_v61 }
 0x44d   :  { %v2643_v53 = vsel %vm2601_vm3, %v2642_v56, %v2641_v20  ;;  %v2456_v45 = vpop.permute.xlu2 %2455  ;;  %v6946_v56 = vld [vmem:[#allocation8_spill] sm:$0xff] }
 0x44e   :  { %v2645_v55 = vsel %vm2605_vm4, %v2644_v37, %v2643_v53  ;;  %v1715_v37 = vperm.slane %v6946_v56, 0  ;;  %v1716_v53 = vperm.slane %v6946_v56, 1 }
 0x452   :  { %v2252_v48 = vld [vmem:[#allocation1] sm:$0xff] }
 0x453   :  { %2521 = vperm.xlu1 %4006, %v2252_v48   ;;  %2253 = vst [vmem:[#allocation1] ss:$9 sm:$0xff] %v1683_v51  ;;  %v1702_v48 = vperm.slane %v6944_v29, 3 }
 0x454   :  { %2254 = vst [vmem:[#allocation1 + $0x1] ss:$9 sm:$0xff] %v1684_v27  ;;  %v1701_v27 = vperm.slane %v6944_v29, 2 }
 0x455   :  { %2255 = vst [vmem:[#allocation1 + $0x2] ss:$9 sm:$0xff] %v1685_v24  ;;  %v1703_v24 = vperm.slane %v6944_v29, 4 }
 0x456   :  { %2256 = vst [vmem:[#allocation1 + $0x3] ss:$9 sm:$0xff] %v1686_v34  ;;  %v2646_v34 = vperm.slane %v2456_v45, %v6416_v13  ;;  %v1717_v45 = vperm.slane %v6946_v56, 2 }
 0x457   :  { %2257 = vst [vmem:[#allocation1 + $0x4] ss:$9 sm:$0xff] %v1687_v31  ;;  %v1705_v31 = vperm.slane %v6944_v29, 6  ;;  %v1718_v29 = vperm.slane %v6946_v56, 3 }
 0x458   :  { %2258 = vst [vmem:[#allocation1 + $0x5] ss:$9 sm:$0xff] %v1688_v2  ;;  %v2462_v2 = vpop.permute.xlu0 %2461  ;;  %v2647_v3 = vsel %vm2609_vm5, %v2646_v34, %v2645_v55 }
 0x459   :  { %2259 = vst [vmem:[#allocation1 + $0x6] ss:$9 sm:$0xff] %v1689_v6  ;;  %v2465_v6 = vpop.permute.xlu2 %2464  ;;  %v2650_v49 = vperm.slane %v2462_v2, %v6452_v22 }
 0x45a   :  { %2260 = vst [vmem:[#allocation1 + $0x7] ss:$9 sm:$0xff] %v1690_v41  ;;  %v2459_v41 = vpop.permute.xlu1 %2458  ;;  %v2652_v4 = vperm.slane %v2465_v6, %v6447_v40 }
 0x45b   :  { %v2648_v10 = vperm.slane %v2459_v41, %v6440_v42 }
 0x45d   :  { %v2649_v14 = vsel %vm2613_vm6, %v2648_v10, %v2647_v3  ;;  %v6948_v10 = vld [vmem:[#allocation9_spill] sm:$0xff] }
 0x45e   :  { %v2651_v0 = vsel %vm2617_vm7, %v2650_v49, %v2649_v14  ;;  %v1731_v49 = vperm.slane %v6948_v10, 0 }
 0x45f   :  { %v6548_v52 = vsel %vm6785_vm11, %v2652_v4, %v2651_v0  ;;  %v1732_v4 = vperm.slane %v6948_v10, 1  ;;  %v1733_v0 = vperm.slane %v6948_v10, 2  ;;  %vm2719_vm11 = vcmask 1040384  }
 0x461   :  { %v2261_v23 = vld [vmem:[#allocation1] sm:$0xff] }
 0x462   :  { %2524 = vperm.xlu0 %4005, %v2261_v23   ;;  %2262 = vst [vmem:[#allocation1] ss:$9 sm:$0xff] %v1691_v12  ;;  %v1707_v12 = vperm.slane %v6945_v18, 0  ;;  %v2468_v57 = vpop.permute.xlu1 %2467 }
 0x463   :  { %2263 = vst [vmem:[#allocation1 + $0x1] ss:$9 sm:$0xff] %v1692_v9  ;;  %v1708_v9 = vperm.slane %v6945_v18, 1  ;;  %v2654_v20 = vperm.slane %v2468_v57, %v4898_v30 }
 0x464   :  { %2264 = vst [vmem:[#allocation1 + $0x2] ss:$9 sm:$0xff] %v1693_v47  ;;  %v1709_v47 = vperm.slane %v6945_v18, 2 }
 0x465   :  { %2265 = vst [vmem:[#allocation1 + $0x3] ss:$9 sm:$0xff] %v1694_v44  ;;  %v1711_v44 = vperm.slane %v6945_v18, 4 }
 0x466   :  { %2266 = vst [vmem:[#allocation1 + $0x4] ss:$9 sm:$0xff] %v1695_v8  ;;  %v1712_v8 = vperm.slane %v6945_v18, 5 }
 0x467   :  { %2267 = vst [vmem:[#allocation1 + $0x5] ss:$9 sm:$0xff] %v1696_v54  ;;  %v2471_v54 = vpop.permute.xlu0 %2470 }
 0x468   :  { %2268 = vst [vmem:[#allocation1 + $0x6] ss:$9 sm:$0xff] %v1697_v46  ;;  %v1714_v46 = vperm.slane %v6945_v18, 7  ;;  %v1734_v18 = vperm.slane %v6948_v10, 3 }
 0x469   :  { %2269 = vst [vmem:[#allocation1 + $0x7] ss:$9 sm:$0xff] %v1698_v25  ;;  %v2655_v25 = vperm.slane %v2471_v54, %v6299_v17 }
 0x46b   :  { %v6561_v59 = vsel %vm2565_vm8, %v2655_v25, %v2654_v20 }
 0x470   :  { %v2270_v51 = vld [vmem:[#allocation1] sm:$0xff] }
 0x471   :  { %2527 = vperm.xlu2 %4007, %v2270_v51   ;;  %2271 = vst [vmem:[#allocation1] ss:$9 sm:$0xff] %v1699_v1  ;;  %v1719_v1 = vperm.slane %v6946_v56, 4  ;;  %v1721_v51 = vperm.slane %v6946_v56, 6 }
 0x472   :  { %2272 = vst [vmem:[#allocation1 + $0x1] ss:$9 sm:$0xff] %v1700_v19  ;;  %v1720_v19 = vperm.slane %v6946_v56, 5 }
 0x473   :  { %2273 = vst [vmem:[#allocation1 + $0x2] ss:$9 sm:$0xff] %v1701_v27  ;;  %v1722_v27 = vperm.slane %v6946_v56, 7 }
 0x474   :  { %2274 = vst [vmem:[#allocation1 + $0x3] ss:$9 sm:$0xff] %v1702_v48  ;;  %v6947_v48 = vld [vmem:[#allocation11_spill] sm:$0xff] }
 0x475   :  { %2275 = vst [vmem:[#allocation1 + $0x4] ss:$9 sm:$0xff] %v1703_v24  ;;  %v1723_v24 = vperm.slane %v6947_v48, 0  ;;  %v1726_v2 = vperm.slane %v6947_v48, 3  ;;  %v1728_v6 = vperm.slane %v6947_v48, 5  ;;  %v1729_v3 = vperm.slane %v6947_v48, 6 }
 0x476   :  { %2276 = vst [vmem:[#allocation1 + $0x5] ss:$9 sm:$0xff] %v1704_v38  ;;  %v1724_v38 = vperm.slane %v6947_v48, 1  ;;  %v1730_v41 = vperm.slane %v6947_v48, 7 }
 0x477   :  { %2277 = vst [vmem:[#allocation1 + $0x6] ss:$9 sm:$0xff] %v1705_v31  ;;  %v1725_v31 = vperm.slane %v6947_v48, 2 }
 0x478   :  { %2278 = vst [vmem:[#allocation1 + $0x7] ss:$9 sm:$0xff] %v1706_v58  ;;  %v1727_v58 = vperm.slane %v6947_v48, 4  ;;  %v1755_v48 = vperm.slane %v6921_v50, 0 }
 0x47f   :  { %v2279_v23 = vld [vmem:[#allocation1] sm:$0xff] }
 0x480   :  { %2530 = vperm.xlu1 %4006, %v2279_v23   ;;  %2280 = vst [vmem:[#allocation1] ss:$9 sm:$0xff] %v1707_v12  ;;  %v1735_v12 = vperm.slane %v6948_v10, 4  ;;  %v1737_v23 = vperm.slane %v6948_v10, 6 }
 0x481   :  { %2281 = vst [vmem:[#allocation1 + $0x1] ss:$9 sm:$0xff] %v1708_v9  ;;  %v1736_v9 = vperm.slane %v6948_v10, 5 }
 0x482   :  { %2282 = vst [vmem:[#allocation1 + $0x2] ss:$9 sm:$0xff] %v1709_v47  ;;  %v1738_v47 = vperm.slane %v6948_v10, 7 }
 0x483   :  { %2283 = vst [vmem:[#allocation1 + $0x3] ss:$9 sm:$0xff] %v1710_v33  ;;  %v2716_v33 = vrot.slane %v6548_v52, 7 }
 0x484   :  { %2284 = vst [vmem:[#allocation1 + $0x4] ss:$9 sm:$0xff] %v1711_v44  ;;  %v6949_v44 = vld [vmem:[#allocation12_spill] sm:$0xff] }
 0x485   :  { %2285 = vst [vmem:[#allocation1 + $0x5] ss:$9 sm:$0xff] %v1712_v8  ;;  %v1739_v8 = vperm.slane %v6949_v44, 0  ;;  %v1740_v54 = vperm.slane %v6949_v44, 1  ;;  %v1741_v57 = vperm.slane %v6949_v44, 2  ;;  %v1742_v25 = vperm.slane %v6949_v44, 3 }
 0x486   :  { %2286 = vst [vmem:[#allocation1 + $0x6] ss:$9 sm:$0xff] %v1713_v28  ;;  %v1743_v20 = vperm.slane %v6949_v44, 4  ;;  %v1744_v52 = vperm.slane %v6949_v44, 5  ;;  %v1745_v56 = vperm.slane %v6949_v44, 6 }
 0x487   :  { %2287 = vst [vmem:[#allocation1 + $0x7] ss:$9 sm:$0xff] %v1714_v46  ;;  %v6591_v46 = vsel %vm2719_vm11, %v6467_v63, %v2716_v33  ;;  %v1747_v63 = vperm.slane %v5958_v36, 0  ;;  %v1774_v33 = vperm.slane %v6928_v62, 3 }
 0x48e   :  { %v2288_v55 = vld [vmem:[#allocation1] sm:$0xff] }
 0x48f   :  { %2533 = vperm.xlu0 %4005, %v2288_v55   ;;  %2289 = vst [vmem:[#allocation1] ss:$9 sm:$0xff] %v1715_v37  ;;  %v1746_v37 = vperm.slane %v6949_v44, 7  ;;  %v1775_v44 = vperm.slane %v6928_v62, 4 }
 0x490   :  { %2290 = vst [vmem:[#allocation1 + $0x1] ss:$9 sm:$0xff] %v1716_v53  ;;  %v1748_v53 = vperm.slane %v5958_v36, 1 }
 0x491   :  { %2291 = vst [vmem:[#allocation1 + $0x2] ss:$9 sm:$0xff] %v1717_v45  ;;  %v1749_v45 = vperm.slane %v5958_v36, 2 }
 0x492   :  { %2292 = vst [vmem:[#allocation1 + $0x3] ss:$9 sm:$0xff] %v1718_v29  ;;  %v1750_v29 = vperm.slane %v5958_v36, 3 }
 0x493   :  { %2293 = vst [vmem:[#allocation1 + $0x4] ss:$9 sm:$0xff] %v1719_v1  ;;  %v1751_v1 = vperm.slane %v5958_v36, 4 }
 0x494   :  { %2294 = vst [vmem:[#allocation1 + $0x5] ss:$9 sm:$0xff] %v1720_v19  ;;  %v1752_v19 = vperm.slane %v5958_v36, 5 }
 0x495   :  { %2295 = vst [vmem:[#allocation1 + $0x6] ss:$9 sm:$0xff] %v1721_v51  ;;  %v1753_v51 = vperm.slane %v5958_v36, 6 }
 0x496   :  { %2296 = vst [vmem:[#allocation1 + $0x7] ss:$9 sm:$0xff] %v1722_v27  ;;  %v1754_v27 = vperm.slane %v5958_v36, 7  ;;  %v1760_v36 = vperm.slane %v6921_v50, 5 }
 0x49d   :  { %v2297_v34 = vld [vmem:[#allocation1] sm:$0xff] }
 0x49e   :  { %2536 = vperm.xlu2 %4007, %v2297_v34   ;;  %2298 = vst [vmem:[#allocation1] ss:$9 sm:$0xff] %v1723_v24  ;;  %v1756_v24 = vperm.slane %v6921_v50, 1  ;;  %v1757_v34 = vperm.slane %v6921_v50, 2 }
 0x49f   :  { %2299 = vst [vmem:[#allocation1 + $0x1] ss:$9 sm:$0xff] %v1724_v38 }
 0x4a0   :  { %2300 = vst [vmem:[#allocation1 + $0x2] ss:$9 sm:$0xff] %v1725_v31  ;;  %v1758_v31 = vperm.slane %v6921_v50, 3 }
 0x4a1   :  { %2301 = vst [vmem:[#allocation1 + $0x3] ss:$9 sm:$0xff] %v1726_v2  ;;  %v1759_v2 = vperm.slane %v6921_v50, 4 }
 0x4a2   :  { %2302 = vst [vmem:[#allocation1 + $0x4] ss:$9 sm:$0xff] %v1727_v58  ;;  %v1761_v58 = vperm.slane %v6921_v50, 6 }
 0x4a3   :  { %2303 = vst [vmem:[#allocation1 + $0x5] ss:$9 sm:$0xff] %v1728_v6  ;;  %v1762_v6 = vperm.slane %v6921_v50, 7  ;;  %v1768_v50 = vperm.slane %v6924_v16, 5 }
 0x4a4   :  { %2304 = vst [vmem:[#allocation1 + $0x6] ss:$9 sm:$0xff] %v1729_v3  ;;  %v1763_v3 = vperm.slane %v6924_v16, 0 }
 0x4a5   :  { %2305 = vst [vmem:[#allocation1 + $0x7] ss:$9 sm:$0xff] %v1730_v41  ;;  %v1764_v41 = vperm.slane %v6924_v16, 1 }
 0x4ac   :  { %v2306_v14 = vld [vmem:[#allocation1] sm:$0xff] }
 0x4ad   :  { %2539 = vperm.xlu1 %4006, %v2306_v14   ;;  %2307 = vst [vmem:[#allocation1] ss:$9 sm:$0xff] %v1731_v49  ;;  %v1765_v49 = vperm.slane %v6924_v16, 2  ;;  %v1767_v14 = vperm.slane %v6924_v16, 4 }
 0x4ae   :  { %2308 = vst [vmem:[#allocation1 + $0x1] ss:$9 sm:$0xff] %v1732_v4  ;;  %v1766_v4 = vperm.slane %v6924_v16, 3 }
 0x4af   :  { %2309 = vst [vmem:[#allocation1 + $0x2] ss:$9 sm:$0xff] %v1733_v0  ;;  %v1769_v0 = vperm.slane %v6924_v16, 6 }
 0x4b0   :  { %2310 = vst [vmem:[#allocation1 + $0x3] ss:$9 sm:$0xff] %v1734_v18  ;;  %v1770_v18 = vperm.slane %v6924_v16, 7  ;;  %v1776_v16 = vperm.slane %v6928_v62, 5 }
 0x4b1   :  { %2311 = vst [vmem:[#allocation1 + $0x4] ss:$9 sm:$0xff] %v1735_v12  ;;  %v1771_v12 = vperm.slane %v6928_v62, 0 }
 0x4b2   :  { %2312 = vst [vmem:[#allocation1 + $0x5] ss:$9 sm:$0xff] %v1736_v9  ;;  %v1772_v9 = vperm.slane %v6928_v62, 1 }
 0x4b3   :  { %2313 = vst [vmem:[#allocation1 + $0x6] ss:$9 sm:$0xff] %v1737_v23 }
 0x4b4   :  { %2314 = vst [vmem:[#allocation1 + $0x7] ss:$9 sm:$0xff] %v1738_v47  ;;  %v1773_v47 = vperm.slane %v6928_v62, 2 }
 0x4bb   :  { %v2315_v28 = vld [vmem:[#allocation1] sm:$0xff] }
 0x4bc   :  { %2542 = vperm.xlu0 %4005, %v2315_v28   ;;  %2316 = vst [vmem:[#allocation1] ss:$9 sm:$0xff] %v1739_v8  ;;  %v1777_v8 = vperm.slane %v6928_v62, 6  ;;  %v1779_v28 = vperm.slane %v6931_v43, 0 }
 0x4bd   :  { %2317 = vst [vmem:[#allocation1 + $0x1] ss:$9 sm:$0xff] %v1740_v54  ;;  %v1778_v54 = vperm.slane %v6928_v62, 7  ;;  %v1784_v62 = vperm.slane %v6931_v43, 5 }
 0x4be   :  { %2318 = vst [vmem:[#allocation1 + $0x2] ss:$9 sm:$0xff] %v1741_v57  ;;  %v1780_v57 = vperm.slane %v6931_v43, 1 }
 0x4bf   :  { %2319 = vst [vmem:[#allocation1 + $0x3] ss:$9 sm:$0xff] %v1742_v25 }
 0x4c0   :  { %2320 = vst [vmem:[#allocation1 + $0x4] ss:$9 sm:$0xff] %v1743_v20  ;;  %v1781_v20 = vperm.slane %v6931_v43, 2 }
 0x4c1   :  { %2321 = vst [vmem:[#allocation1 + $0x5] ss:$9 sm:$0xff] %v1744_v52  ;;  %v1782_v52 = vperm.slane %v6931_v43, 3 }
 0x4c2   :  { %2322 = vst [vmem:[#allocation1 + $0x6] ss:$9 sm:$0xff] %v1745_v56  ;;  %v1783_v56 = vperm.slane %v6931_v43, 4 }
 0x4c3   :  { %2323 = vst [vmem:[#allocation1 + $0x7] ss:$9 sm:$0xff] %v1746_v37  ;;  %v1785_v37 = vperm.slane %v6931_v43, 6 }
 0x4ca   :  { %v2324_v55 = vld [vmem:[#allocation1] sm:$0xff] }
 0x4cb   :  { %2545 = vperm.xlu2 %4007, %v2324_v55   ;;  %2325 = vst [vmem:[#allocation1] ss:$9 sm:$0xff] %v1747_v63  ;;  %v1786_v63 = vperm.slane %v6931_v43, 7  ;;  %v6950_v55 = vld [vmem:[#allocation10_spill] sm:$0xff] }
 0x4cc   :  { %2326 = vst [vmem:[#allocation1 + $0x1] ss:$9 sm:$0xff] %v1748_v53 }
 0x4cd   :  { %2327 = vst [vmem:[#allocation1 + $0x2] ss:$9 sm:$0xff] %v1749_v45  ;;  %v2474_v45 = vpop.permute.xlu2 %2473 }
 0x4ce   :  { %2328 = vst [vmem:[#allocation1 + $0x3] ss:$9 sm:$0xff] %v1750_v29  ;;  %v2477_v29 = vpop.permute.xlu1 %2476 }
 0x4cf   :  { %2329 = vst [vmem:[#allocation1 + $0x4] ss:$9 sm:$0xff] %v1751_v1  ;;  %v4031_v1 = vld [vmem:[%s6723_s0 + $0x1f8] sm:$0xff]  ;;  %s4060_s0 = smov [#allocation2]  }
 0x4d0   :  { %2330 = vst [vmem:[#allocation1 + $0x5] ss:$9 sm:$0xff] %v1752_v19  ;;  %v2793_v19 = vmul.f32 %v4031_v1, %v4031_v1  ;;  %s3711_s9 = sshll.u32 %s4060_s0, 4  ;;  %s3712_s9 = int_to_ptr.vmem [resolvable:$true] %s3711_s9 }
 0x4d1   :  { %2331 = vst [vmem:[#allocation1 + $0x6] ss:$9 sm:$0xff] %v1753_v51  ;;  %v2480_v51 = vpop.permute.xlu0 %2479 }
 0x4d2   :  { %2332 = vst [vmem:[#allocation1 + $0x7] ss:$9 sm:$0xff] %v1754_v27  ;;  %v2983_v27 = vsel %vm99_vm0, %v2793_v19, 0.0  ;;  %vm6951_vm0 = vcmask 1048512  }
 0x4d3   :  { %vm6952_vm11 = vmmov %vm6951_vm0 }
 0x4d9   :  { %v2333_v38 = vld [vmem:[#allocation1] sm:$0xff]  ;;  %v2489_v43 = vpop.permute.xlu0 %2488 }
 0x4da   :  { %2548 = vperm.xlu1 %4006, %v2333_v38   ;;  %2334 = vst [vmem:[#allocation1] ss:$9 sm:$0xff] %v1755_v48  ;;  %v2483_v48 = vpop.permute.xlu2 %2482 }
 0x4db   :  { %2335 = vst [vmem:[#allocation1 + $0x1] ss:$9 sm:$0xff] %v1756_v24  ;;  %v2486_v24 = vpop.permute.xlu1 %2485 }
 0x4dc   :  { %2336 = vst [vmem:[#allocation1 + $0x2] ss:$9 sm:$0xff] %v1757_v34 }
 0x4dd   :  { %2337 = vst [vmem:[#allocation1 + $0x3] ss:$9 sm:$0xff] %v1758_v31 }
 0x4de   :  { %2338 = vst [vmem:[#allocation1 + $0x4] ss:$9 sm:$0xff] %v1759_v2 }
 0x4df   :  { %2339 = vst [vmem:[#allocation1 + $0x5] ss:$9 sm:$0xff] %v1760_v36 }
 0x4e0   :  { %2340 = vst [vmem:[#allocation1 + $0x6] ss:$9 sm:$0xff] %v1761_v58 }
 0x4e1   :  { %2341 = vst [vmem:[#allocation1 + $0x7] ss:$9 sm:$0xff] %v1762_v6  ;;  %v2498_v31 = vpop.permute.xlu0 %2497 }
 0x4e2   :  { %v2492_v38 = vpop.permute.xlu2 %2491 }
 0x4e3   :  { %v2495_v34 = vpop.permute.xlu1 %2494 }
 0x4e8   :  { %v2342_v10 = vld [vmem:[#allocation1] sm:$0xff] }
 0x4e9   :  { %2551 = vperm.xlu0 %4005, %v2342_v10   ;;  %2343 = vst [vmem:[#allocation1] ss:$9 sm:$0xff] %v1763_v3  ;;  %v6644_v58 = vpop.permute.xlu0 %2506 }
 0x4ea   :  { %2344 = vst [vmem:[#allocation1 + $0x1] ss:$9 sm:$0xff] %v1764_v41  ;;  %v2501_v2 = vpop.permute.xlu2 %2500 }
 0x4eb   :  { %2345 = vst [vmem:[#allocation1 + $0x2] ss:$9 sm:$0xff] %v1765_v49  ;;  %v2504_v36 = vpop.permute.xlu1 %2503 }
 0x4ec   :  { %2346 = vst [vmem:[#allocation1 + $0x3] ss:$9 sm:$0xff] %v1766_v4 }
 0x4ed   :  { %2347 = vst [vmem:[#allocation1 + $0x4] ss:$9 sm:$0xff] %v1767_v14  ;;  %v2659_v14 = vperm.slane %v2477_v29, %v6326_v7 }
 0x4ee   :  { %2348 = vst [vmem:[#allocation1 + $0x5] ss:$9 sm:$0xff] %v1768_v50  ;;  %v2657_v50 = vperm.slane %v2474_v45, %v6303_v15 }
 0x4ef   :  { %2349 = vst [vmem:[#allocation1 + $0x6] ss:$9 sm:$0xff] %v1769_v0 }
 0x4f0   :  { %2350 = vst [vmem:[#allocation1 + $0x7] ss:$9 sm:$0xff] %v1770_v18  ;;  %v2658_v18 = vsel %vm2569_vm9, %v2657_v50, %v6561_v59 }
 0x4f1   :  { %v2516_v41 = vpop.permute.xlu0 %2515 }
 0x4f2   :  { %v6648_v3 = vpop.permute.xlu2 %2509 }
 0x4f3   :  { %v6646_v6 = vpop.permute.xlu1 %2512 }
 0x4f7   :  { %v2351_v23 = vld [vmem:[#allocation1] sm:$0xff] }
 0x4f8   :  { %2554 = vperm.xlu2 %4007, %v2351_v23   ;;  %2352 = vst [vmem:[#allocation1] ss:$9 sm:$0xff] %v1771_v12  ;;  %v2661_v23 = vperm.slane %v2480_v51, %v6335_v26 }
 0x4f9   :  { %2353 = vst [vmem:[#allocation1 + $0x1] ss:$9 sm:$0xff] %v1772_v9  ;;  %v2525_v4 = vpop.permute.xlu0 %2524  ;;  %v2660_v9 = vsel %vm2573_vm10, %v2659_v14, %v2658_v18 }
 0x4fa   :  { %2354 = vst [vmem:[#allocation1 + $0x2] ss:$9 sm:$0xff] %v1773_v47  ;;  %v2519_v49 = vpop.permute.xlu2 %2518 }
 0x4fb   :  { %2355 = vst [vmem:[#allocation1 + $0x3] ss:$9 sm:$0xff] %v1774_v33  ;;  %v2522_v10 = vpop.permute.xlu1 %2521  ;;  %v2662_v33 = vsel %vm2577_vm12, %v2661_v23, %v2660_v9  ;;  %v2686_v59 = vperm.slane %v2519_v49, %v6299_v17  ;;  %v2683_v9 = vperm.slane %v6646_v6, %v6447_v40  ;;  %v2681_v23 = vperm.slane %v6648_v3, %v6452_v22 }
 0x4fc   :  { %2356 = vst [vmem:[#allocation1 + $0x4] ss:$9 sm:$0xff] %v1775_v44  ;;  %v2665_v44 = vperm.slane %v2486_v24, %v6361_v39 }
 0x4fd   :  { %2357 = vst [vmem:[#allocation1 + $0x5] ss:$9 sm:$0xff] %v1776_v16  ;;  %v2663_v16 = vperm.slane %v2483_v48, %v6352_v21  ;;  %v2673_v48 = vperm.slane %v2498_v31, %v6409_v61 }
 0x4fe   :  { %2358 = vst [vmem:[#allocation1 + $0x6] ss:$9 sm:$0xff] %v1777_v8  ;;  %v2685_v8 = vperm.slane %v2516_v41, %v4898_v30  ;;  %v2675_v41 = vperm.slane %v2501_v2, %v6421_v5  ;;  %v2679_v2 = vperm.slane %v6644_v58, %v6440_v42 }
 0x4ff   :  { %2359 = vst [vmem:[#allocation1 + $0x7] ss:$9 sm:$0xff] %v1778_v54  ;;  %v2688_v54 = vperm.slane %v2522_v10, %v6303_v15  ;;  %v2671_v15 = vperm.slane %v2495_v34, %v6385_v35  ;;  %v2677_v34 = vperm.slane %v2504_v36, %v6416_v13 }
 0x501   :  { %v2534_v47 = vpop.permute.xlu0 %2533 }
 0x502   :  { %v2528_v12 = vpop.permute.xlu2 %2527  ;;  %v2696_v45 = vperm.slane %v2534_v47, %v6361_v39 }
 0x503   :  { %v2531_v0 = vpop.permute.xlu1 %2530 }
 0x504   :  { %v2694_v17 = vperm.slane %v2531_v0, %v6352_v21 }
 0x506   :  { %v2360_v25 = vld [vmem:[#allocation1] sm:$0xff] }
 0x507   :  { %2557 = vperm.xlu1 %4006, %v2360_v25   ;;  %2361 = vst [vmem:[#allocation1] ss:$9 sm:$0xff] %v1779_v28  ;;  %v2664_v28 = vsel %vm2581_vm13, %v2663_v16, %v2662_v33 }
 0x508   :  { %2362 = vst [vmem:[#allocation1 + $0x1] ss:$9 sm:$0xff] %v1780_v57  ;;  %v2690_v57 = vperm.slane %v2525_v4, %v6326_v7  ;;  %v2669_v7 = vperm.slane %v2492_v38, %v6390_v60 }
 0x509   :  { %2363 = vst [vmem:[#allocation1 + $0x2] ss:$9 sm:$0xff] %v1781_v20  ;;  %v2666_v20 = vsel %vm2585_vm14, %v2665_v44, %v2664_v28 }
 0x50a   :  { %2364 = vst [vmem:[#allocation1 + $0x3] ss:$9 sm:$0xff] %v1782_v52  ;;  %v2537_v52 = vpop.permute.xlu2 %2536 }
 0x50b   :  { %2365 = vst [vmem:[#allocation1 + $0x4] ss:$9 sm:$0xff] %v1783_v56  ;;  %v2667_v56 = vperm.slane %v2489_v43, %v6378_v32 }
 0x50c   :  { %2366 = vst [vmem:[#allocation1 + $0x5] ss:$9 sm:$0xff] %v1784_v62  ;;  %v2687_v62 = vsel %vm2565_vm8, %v2686_v59, %v2685_v8  ;;  %vm2721_vm8 = vcmask 1042434  }
 0x50d   :  { %2367 = vst [vmem:[#allocation1 + $0x6] ss:$9 sm:$0xff] %v1785_v37  ;;  %v2689_v37 = vsel %vm2569_vm9, %v2688_v54, %v2687_v62  ;;  %v2668_v30 = vsel %vm2589_vm15, %v2667_v56, %v2666_v20  ;;  %vm2723_vm9 = vcmask 1041408  }
 0x50e   :  { %2368 = vst [vmem:[#allocation1 + $0x7] ss:$9 sm:$0xff] %v1786_v63  ;;  %v2691_v63 = vsel %vm2573_vm10, %v2690_v57, %v2689_v37  ;;  %v2670_v29 = vsel %vm2593_vm1, %v2669_v7, %v2668_v30 }
 0x50f   :  { %v2672_v19 = vsel %vm2597_vm2, %v2671_v15, %v2670_v29 }
 0x510   :  { %v2674_v38 = vsel %vm2601_vm3, %v2673_v48, %v2672_v19 }
 0x511   :  { %v2676_v4 = vsel %vm2605_vm4, %v2675_v41, %v2674_v38 }
 0x515   :  { %v2369_v53 = vld [vmem:[#allocation1] sm:$0xff] }
 0x516   :  { %2560 = vperm.xlu0 %4005, %v2369_v53  }
 0x51f   :  { %v2540_v25 = vpop.permute.xlu1 %2539 }
 0x520   :  { %v2700_v43 = vperm.slane %v2540_v25, %v6390_v60 }
 0x525   :  { %v2546_v24 = vpop.permute.xlu2 %2545 }
 0x52e   :  { %v2543_v53 = vpop.permute.xlu0 %2542 }
 0x52f   :  { %v2702_v39 = vperm.slane %v2543_v53, %v6385_v35  ;;  %v2704_v35 = vperm.slane %v2546_v24, %v6409_v61 }
 0x531   :  { %3112 = vmin.xlane.f32.xlu1 %v6950_v55  ;;  %v2692_v55 = vperm.slane %v2528_v12, %v6335_v26  ;;  %v2698_v26 = vperm.slane %v2537_v52, %v6378_v32  ;;  %v2678_v32 = vsel %vm2609_vm5, %v2677_v34, %v2676_v4 }
 0x532   :  { %v2680_v12 = vsel %vm2613_vm6, %v2679_v2, %v2678_v32 }
 0x533   :  { %v2693_v1 = vsel %vm2577_vm12, %v2692_v55, %v2691_v63  ;;  %v2682_v47 = vsel %vm2617_vm7, %v2681_v23, %v2680_v12  ;;  %vm6954_vm12 = vcmask 7168  }
 0x534   :  { %v2695_v51 = vsel %vm2581_vm13, %v2694_v17, %v2693_v1  ;;  %v2684_v44 = vsel %vm6951_vm0, %v2683_v9, %v2682_v47 }
 0x535   :  { %v2697_v21 = vsel %vm2585_vm14, %v2696_v45, %v2695_v51  ;;  %v2717_v3 = vrot.slane %v2684_v44, 6 }
 0x536   :  { %v2699_v10 = vsel %vm2589_vm15, %v2698_v26, %v2697_v21 }
 0x537   :  { %v2701_v31 = vsel %vm2593_vm1, %v2700_v43, %v2699_v10 }
 0x538   :  { %v2703_v14 = vsel %vm2597_vm2, %v2702_v39, %v2701_v31 }
 0x539   :  { %v2705_v18 = vsel %vm2601_vm3, %v2704_v35, %v2703_v14 }
 0x540   :  { %2984 = vadd.xlane.f32.xlu0 %v2983_v27 }
 0x54c   :  { %v2549_v27 = vpop.permute.xlu1 %2548 }
 0x54d   :  { %v2706_v60 = vperm.slane %v2549_v27, %v6421_v5 }
 0x54f   :  { %v2707_v5 = vsel %vm2605_vm4, %v2706_v60, %v2705_v18 }
 0x552   :  { %v2555_v0 = vpop.permute.xlu2 %2554 }
 0x553   :  { %v2710_v58 = vperm.slane %v2555_v0, %v6440_v42 }
 0x55b   :  { %v2552_v49 = vpop.permute.xlu0 %2551 }
 0x55c   :  { %v2708_v50 = vperm.slane %v2552_v49, %v6416_v13 }
 0x55e   :  { %v2709_v61 = vsel %vm2609_vm5, %v2708_v50, %v2707_v5 }
 0x55f   :  { %v2711_v16 = vsel %vm2613_vm6, %v2710_v58, %v2709_v61 }
 0x579   :  { %v2558_v36 = vpop.permute.xlu1 %2557 }
 0x57a   :  { %v2712_v13 = vperm.slane %v2558_v36, %v6452_v22  ;;  %v6953_v22 = vlaneseq }
 0x57c   :  { %v2713_v8 = vsel %vm2617_vm7, %v2712_v13, %v2711_v16  ;;  %vm2727_vm10 = vcmp.lt.s32.totalorder %v6953_v22, 512 }
 0x588   :  { %v2561_v33 = vpop.permute.xlu0 %2560 }
 0x589   :  { %v2714_v6 = vperm.slane %v2561_v33, %v6447_v40 }
 0x58b   :  { %v2715_v54 = vsel %vm6952_vm11, %v2714_v6, %v2713_v8 }
 0x58c   :  { %v2718_v28 = vrot.slane %v2715_v54, 5 }
 0x58e   :  { %v2722_v42 = vsel %vm2721_vm8, %v2717_v3, %v2718_v28 }
 0x58f   :  { %v2724_v59 = vsel %vm2723_vm9, %v6591_v46, %v2722_v42 }
 0x590   :  { %2729 = vst.msk [vmem:[#allocation2] sm:$0xf] %vm2727_vm10, %v2724_v59 }
 0x591   :  { %3716 = dma.vmem_to_hbm [thread:$0]  %s3712_s9, 64, %s3714_s12, [#allocation3]  }
 0x5a4   :  { %v3113_v57 = vpop.xlane.xlu1 %3112 }
 0x5b3   :  { %v2985_v25 = vpop.xlane.xlu0 %2984 }
 0x5b4   :  { %v3500_v20 = vadd.f32 %v3113_v57, %v2985_v25 }
 0x5b6   :  { %v3691_v52 = vsel %vm6954_vm12, %v3500_v20, 0.0 }
 0x5b7   :  { %v3692_v40 = vadd.f32 %v3691_v52, %v6268_v11 }
 0x5b9   :  { %3693 = vadd.xlane.f32.xlu2 %v3692_v40 }
 0x62c   :  { %v3694_v56 = vpop.xlane.xlu2 %3693 }
 0x62d   :  { %v3695_v46 = vrot.slane %v3694_v56, 4 }
 0x62f   :  { %v3696_v62 = vadd.f32 %v3695_v46, %v3694_v56 }
 0x631   :  { %v3697_v37 = vrot.slane %v3696_v62, 2 }
 0x633   :  { %v3698_v30 = vadd.f32 %v3697_v37, %v3696_v62 }
 0x635   :  { %v3699_v15 = vrot.slane %v3698_v30, 1 }
 0x637   :  { %v3700_v63 = vadd.f32 %v3699_v15, %v3698_v30 }
 0x639   :  { %4000 = vpush %v3700_v63 }
 0x66a   :  { %s4001_s13 = spop %4000 }
 0x66b   :  { %v3702_v11 = vstv %s4001_s13 }
 0x66c   :  { %3703 = vst [vmem:[%s6728_s5] sm:$0x1] %v3702_v11 }
 0x66d   :  { %4056 = dma.done.wait [#allocation3], 64  }
 0x66e   :  { %4057 = vsyncadd [#allocation3], 4294967232 }
 0x66f   :  { %3727 = vsyncpa [#allocation3], 1 }

</bundles_post_ra>
